<compile_context>
chip_gen: v7x
topology: tpu7x:2x2x1
jax: 0.10.0
libtpu: 0.0.40
codegen_flags: <defaults>
</compile_context>

<pallas_src>
import functools

import jax
import jax.numpy as jnp
from jax import lax
from jax.experimental import pallas as pl
from jax.experimental.pallas import tpu as pltpu


def _probav_stats_body(p, t, spt_ref, marg_ref, tstat_ref, *, crop):
    """Accumulate per-split sufficient statistics for one (block_nc, H, W) block.

    p, t are f32 (already masked when mask_flag=True).  The 36 bias-corrected
    MSE candidates are fully determined by:
      * spt_ref  (36, W): per-shift cross terms  sum_n,window p_shifted * t
      * marg_ref (2, H, W): per-pixel sum_n p and sum_n p^2 (window-summed later)
      * tstat_ref(2, W): lane partials of sum t and sum t^2 over the crop window
    so the only per-shift full-volume work is the cross term.
    """
    bnc, h, w = p.shape
    ns = 2 * crop
    hf = bnc * h

    # Crop-window indicator (H, W): 1 inside [crop, H-crop) x [crop, W-crop).
    rows = lax.broadcasted_iota(jnp.int32, (h, w), 0)
    cols = lax.broadcasted_iota(jnp.int32, (h, w), 1)
    cm2 = ((rows >= crop) & (rows < h - crop) &
           (cols >= crop) & (cols < w - crop)).astype(jnp.float32)

    @pl.when(pl.program_id(1) == 0)
    def _init():
        spt_ref[...] = jnp.zeros_like(spt_ref)
        marg_ref[...] = jnp.zeros_like(marg_ref)
        tstat_ref[...] = jnp.zeros_like(tstat_ref)

    # Shift-invariant statistics (once per block, not per shift).
    marg_ref[0, 0, :, :] += jnp.sum(p, axis=0)       # per-pixel sum_n p
    marg_ref[0, 1, :, :] += jnp.sum(p * p, axis=0)   # per-pixel sum_n p^2

    t_cm = t * cm2[None, :, :]                        # target restricted to crop window
    tf = t_cm.reshape(hf, w)
    tstat_ref[0, 0:1, :] += jnp.sum(tf, axis=0, keepdims=True)        # S_t lane partial
    tstat_ref[0, 1:2, :] += jnp.sum(tf * tf, axis=0, keepdims=True)   # S_tt lane partial

    # Cross terms S_pt(u, v).  One shift family is hoisted out of the 6x6 loop:
    # 6 lane-rolled copies of the masked target (reused for every u) and one
    # sublane-rolled prediction per u -> 12 XLU rolls/step instead of 42.
    # Cyclic wrap is exact because every shift magnitude is <= crop, so wrapped
    # rows/cols always land where tf == 0 (the zeroed crop border).
    pf = p.reshape(hf, w)
    tf_v = []
    for v in range(ns):
        sw = (v - crop) % w
        tf_v.append(pltpu.roll(tf, sw, 1) if sw else tf)
    for u in range(ns):
        sh = (crop - u) % hf
        p_u = pltpu.roll(pf, sh, 0) if sh else pf
        for v in range(ns):
            idx = u * ns + v
            # Lane partials only; the single cross-lane reduce happens once in
            # the JAX epilogue (no 36-way concatenate, no scratch).
            spt_ref[0, idx:idx + 1, :] += jnp.sum(p_u * tf_v[v], axis=0,
                                                  keepdims=True)
    # TODO(synk): (8, W) vreg-height partials (reshape to (hf//8, 8, W) + sum
    # over axis 0) would also drop the per-shift intra-vreg sublane reduce
    # (~2% of remaining XLU work); the MXU reformulation of S_pt (P^T @ T band
    # sums) was skipped because of its bf16 precision caveat.


def _kernel_masked(p_ref, t_ref, m_ref, spt_ref, marg_ref, tstat_ref, *, crop):
    m = m_ref[...].astype(jnp.float32)
    _probav_stats_body(p_ref[...].astype(jnp.float32) * m,
                       t_ref[...].astype(jnp.float32) * m,
                       spt_ref, marg_ref, tstat_ref, crop=crop)


def _kernel_nomask(p_ref, t_ref, spt_ref, marg_ref, tstat_ref, *, crop):
    _probav_stats_body(p_ref[...].astype(jnp.float32),
                       t_ref[...].astype(jnp.float32),
                       spt_ref, marg_ref, tstat_ref, crop=crop)


def proba_v_loss(predict, target, target_mask=None, *, mask_flag=True,
                 brightness_bias_flag=True, crop_size=3, ssim_weight=0.5,
                 baseline=None, block_nc=None):
    """JAX/Pallas equivalent of ProbaVLoss.forward (default arguments)."""
    del ssim_weight  # only used by the crop_size=0 SSIM branch (not implemented)
    # TODO(synk): crop_size=0 branch (_full_loss with dssim/SSIM) and the
    # baseline/c_psnr correction are not exercised by the default forward and
    # are not implemented here.
    if not crop_size:
        raise NotImplementedError("crop_size=0 (_full_loss / SSIM) path not implemented")
    if baseline is not None:
        raise NotImplementedError("baseline / c_psnr correction path not implemented")

    n, c, h, w = predict.shape
    nc = n * c
    crop = int(crop_size)
    ns = 2 * crop
    nshift2 = ns * ns
    # Guard for the roll-wrap trick: the shifted crop window must stay in-bounds.
    assert 2 * crop < h and 2 * crop < w, "crop window must fit inside the image"
    hc, wc = h - 2 * crop, w - 2 * crop
    k_div = float(nc * hc * wc)          # MSE mean divisor (original, unpadded)

    def prep(x, as_mask=False):
        x = x.reshape(nc, h, w)
        if as_mask:
            # 0/1 masks are exact in bf16; halves the mask's HBM traffic.
            # (Use a float32 mask here if non-binary masks are ever passed.)
            return x.astype(jnp.bfloat16)
        if x.dtype not in (jnp.float32, jnp.bfloat16):
            x = x.astype(jnp.float32)
        return x                          # bf16 kept as-is; upcast inside kernel

    inputs = [prep(predict), prep(target)]
    if mask_flag:
        assert target_mask is not None
        inputs.append(prep(target_mask, as_mask=True))
    n_in = len(inputs)
    in_bytes_px = sum(int(x.dtype.itemsize) for x in inputs)

    # Per-generation VMEM-aware block sizing (v5e/v6e: 128 MiB, v7x: 64 MiB).
    try:
        vmem_cap = int(pltpu.get_tpu_info().vmem_capacity_bytes)
    except Exception:
        vmem_cap = 64 * 1024 * 1024

    # f32-aware accounting: double-buffered inputs + live full-block f32 temps
    # (masked p/t, t_cm, 6 held rolled target copies, p_u, product, squares).
    f32_live = 12
    per_img = h * w * (2 * in_bytes_px + 4 * f32_live)
    out_resident = 8 * (nshift2 * w + 2 * h * w + 2 * w)   # 2x-buffered f32 outputs
    if block_nc is None:
        budget = int(vmem_cap * 0.4) - out_resident
        block_nc = max(1, min(nc, budget // max(1, per_img), 32))
    block_nc = int(max(1, min(block_nc, nc)))

    nb_total = pl.cdiv(nc, block_nc)
    nsplit = 2 if nb_total >= 2 else 1        # v7x: shard halves across both TCs
    nb_inner = pl.cdiv(nb_total, nsplit)
    nc_pad = nsplit * nb_inner * block_nc
    if nc_pad != nc:
        pad = [(0, nc_pad - nc), (0, 0), (0, 0)]
        inputs = [jnp.pad(x, pad) for x in inputs]   # zero images: no effect on sums

    kernel_fn = _kernel_masked if mask_flag else _kernel_nomask
    kernel = functools.partial(kernel_fn, crop=crop)

    in_spec = pl.BlockSpec((block_nc, h, w), lambda s, i: (s * nb_inner + i, 0, 0))
    out_shapes = (
        jax.ShapeDtypeStruct((nsplit, nshift2, w), jnp.float32),   # S_pt lane partials
        jax.ShapeDtypeStruct((nsplit, 2, h, w), jnp.float32),      # sum_n p, sum_n p^2
        jax.ShapeDtypeStruct((nsplit, 2, w), jnp.float32),         # S_t, S_tt lane partials
    )
    out_specs = (
        pl.BlockSpec((1, nshift2, w), lambda s, i: (s, 0, 0)),
        pl.BlockSpec((1, 2, h, w), lambda s, i: (s, 0, 0, 0)),
        pl.BlockSpec((1, 2, w), lambda s, i: (s, 0, 0)),
    )
    grid_spec = pltpu.PrefetchScalarGridSpec(
        num_scalar_prefetch=0,
        grid=(nsplit, nb_inner),
        in_specs=[in_spec] * n_in,
        out_specs=out_specs,
    )

    vmem_need = block_nc * per_img + out_resident + (8 << 20)
    vmem_limit = int(min(vmem_cap * 0.9, max(32 << 20, vmem_need)))
    in_bytes = sum(int(x.size) * int(x.dtype.itemsize) for x in inputs)
    out_bytes = 4 * nsplit * (nshift2 * w + 2 * h * w + 2 * w)
    cost = pl.CostEstimate(
        flops=int((2 * nshift2 + 10) * nc_pad * h * w),
        transcendentals=0,
        bytes_accessed=int(in_bytes + out_bytes),
    )

    spt_out, marg_out, tstat_out = pl.pallas_call(
        kernel,
        out_shape=out_shapes,
        grid_spec=grid_spec,
        compiler_params=pltpu.CompilerParams(
            dimension_semantics=("parallel", "arbitrary"),
            vmem_limit_bytes=vmem_limit,
        ),
        cost_estimate=cost,
    )(*inputs)

    # ---- Tiny epilogue in plain JAX (36 scalars). ----
    spt = jnp.sum(spt_out, axis=(0, 2))          # (36,)
    marg = jnp.sum(marg_out, axis=0)             # (2, H, W)
    tsum = jnp.sum(tstat_out, axis=(0, 2))       # (2,)
    s_t, s_tt = tsum[0], tsum[1]

    def _window_sums(x2d):
        # Separable shifted-window sums: sp[u, v] = sum x2d[u:u+hc, v:v+wc].
        col = jnp.stack([jnp.sum(x2d[:, v:v + wc], axis=1) for v in range(ns)],
                        axis=1)                                  # (H, ns)
        return jnp.stack([jnp.sum(col[u:u + hc, :], axis=0) for u in range(ns)],
                         axis=0)                                 # (ns, ns)

    sp = _window_sums(marg[0]).reshape(-1)       # (36,) — u-major, matches spt
    spp = _window_sums(marg[1]).reshape(-1)

    inv_k = jnp.float32(1.0 / k_div)
    mse = (spp - 2.0 * spt + s_tt) * inv_k       # E[(p - t)^2] per shift
    if brightness_bias_flag:
        mean_d = (sp - s_t) * inv_k              # E[p - t] per shift
        # TODO(synk): for extreme global brightness offsets this E[d^2]-E[d]^2
        # form can lose f32 precision; an exact fix needs a pre-centering pass.
        mse = mse - mean_d * mean_d
    min_loss = jnp.min(mse) * jnp.float32(255.0 * 255.0)
    return jnp.minimum(jnp.float32(999999999.0), min_loss)


def _reference_loss(predict, target, target_mask, *, mask_flag=True,
                    brightness_bias_flag=True, crop_size=3):
    """Plain-JAX mirror of the PyTorch forward for verification."""
    p, t = predict, target
    if mask_flag:
        p = p * target_mask
        t = t * target_mask
    cs = crop_size
    mc = 2 * cs
    h, w = p.shape[-2:]
    tc = t[:, :, cs:h - cs, cs:w - cs] * 255.0
    best = jnp.float32(999999999.0)
    for u in range(mc):
        for v in range(mc):
            pc = p[:, :, u:h - mc + u, v:w - mc + v] * 255.0
            if brightness_bias_flag:
                pc = pc + jnp.mean(tc - pc)
            best = jnp.minimum(best, jnp.mean((pc - tc) ** 2))
    return best


if __name__ == "__main__":
    key = jax.random.PRNGKey(0)
    kp, kt, km = jax.random.split(key, 3)

    # Lane-dense W (multiple of 128); ProbaV itself is 1x384x384.
    N, C, H, W = 2, 1, 64, 128
    predict = jax.random.uniform(kp, (N, C, H, W), dtype=jnp.float32)
    target = jax.random.uniform(kt, (N, C, H, W), dtype=jnp.float32)
    target_mask = (jax.random.uniform(km, (N, C, H, W)) > 0.2).astype(jnp.float32)

    def check(got, want, tag):
        got = float(jax.block_until_ready(got))
        want = float(want)
        assert abs(got - want) <= 5e-3 * max(1.0, abs(want)), (tag, got, want)

    # Default path (mask + brightness bias), auto block size (single split).
    ref = jax.block_until_ready(_reference_loss(predict, target, target_mask))
    check(proba_v_loss(predict, target, target_mask), ref, "masked/auto")

    # Two-split parallel accumulation path (one image per grid step).
    check(proba_v_loss(predict, target, target_mask, block_nc=1), ref,
          "masked/block_nc=1")

    # Uneven grid + zero-padding path (3 images, block of 2, 2 splits).
    p3 = jnp.concatenate([predict, predict[:1] * 0.7], axis=0)
    t3 = jnp.concatenate([target, target[:1] * 0.9], axis=0)
    m3 = jnp.concatenate([target_mask, target_mask[:1]], axis=0)
    ref3 = jax.block_until_ready(_reference_loss(p3, t3, m3))
    check(proba_v_loss(p3, t3, m3, block_nc=2), ref3, "masked/padded")

    # mask_flag=False variant (no mask is ever DMA'd).
    refn = jax.block_until_ready(
        _reference_loss(predict, target, None, mask_flag=False))
    check(proba_v_loss(predict, target, None, mask_flag=False, block_nc=1),
          refn, "nomask")

    print("KERNEL_OK")
</pallas_src>

<mosaic_0001>
module attributes {stable_mosaic.version = 11 : i64} {
  func.func @_kernel_masked(%arg0: i32, %arg1: i32, %arg2: memref<2x64x128xf32, #tpu.memory_space<vmem>>, %arg3: memref<2x64x128xf32, #tpu.memory_space<vmem>>, %arg4: memref<2x64x128xbf16, #tpu.memory_space<vmem>>, %arg5: memref<1x36x128xf32, #tpu.memory_space<vmem>>, %arg6: memref<1x2x64x128xf32, #tpu.memory_space<vmem>>, %arg7: memref<1x2x128xf32, #tpu.memory_space<vmem>>) attributes {dimension_semantics = [#tpu.dimension_semantics<parallel>, #tpu.dimension_semantics<arbitrary>], iteration_bounds = array<i64: 1, 1>, scalar_prefetch = 0 : i64, scratch_operands = 0 : i64, tpu.core_type = #tpu.core_type<tc>, window_params = [{transform_indices = @transform_0, window_bounds = array<i64: 2, 64, 128>}, {transform_indices = @transform_1, window_bounds = array<i64: 2, 64, 128>}, {transform_indices = @transform_2, window_bounds = array<i64: 2, 64, 128>}, {transform_indices = @transform_3, window_bounds = array<i64: 1, 36, 128>}, {transform_indices = @transform_4, window_bounds = array<i64: 1, 2, 64, 128>}, {transform_indices = @transform_5, window_bounds = array<i64: 1, 2, 128>}]} {
    %c0 = arith.constant 0 : index
    %c0_0 = arith.constant 0 : index
    %c0_1 = arith.constant 0 : index
    %0 = vector.load %arg4[%c0, %c0_0, %c0_1] : memref<2x64x128xbf16, #tpu.memory_space<vmem>>, vector<2x64x128xbf16>
    %1 = arith.extf %0 : vector<2x64x128xbf16> to vector<2x64x128xf32>
    %c0_2 = arith.constant 0 : index
    %c0_3 = arith.constant 0 : index
    %c0_4 = arith.constant 0 : index
    %2 = vector.load %arg2[%c0_2, %c0_3, %c0_4] : memref<2x64x128xf32, #tpu.memory_space<vmem>>, vector<2x64x128xf32>
    %3 = arith.mulf %2, %1 : vector<2x64x128xf32>
    %c0_5 = arith.constant 0 : index
    %c0_6 = arith.constant 0 : index
    %c0_7 = arith.constant 0 : index
    %4 = vector.load %arg3[%c0_5, %c0_6, %c0_7] : memref<2x64x128xf32, #tpu.memory_space<vmem>>, vector<2x64x128xf32>
    %5 = arith.mulf %4, %1 : vector<2x64x128xf32>
    %6 = tpu.iota {dimensions = array<i32: 0>} : vector<64x128xi32>
    %7 = tpu.iota {dimensions = array<i32: 1>} : vector<64x128xi32>
    %c3_i32 = arith.constant 3 : i32
    %8 = vector.broadcast %c3_i32 : i32 to vector<64x128xi32>
    %9 = arith.cmpi sge, %6, %8 : vector<64x128xi32>
    %c61_i32 = arith.constant 61 : i32
    %10 = vector.broadcast %c61_i32 : i32 to vector<64x128xi32>
    %11 = arith.cmpi slt, %6, %10 : vector<64x128xi32>
    %12 = arith.andi %9, %11 : vector<64x128xi1>
    %c3_i32_8 = arith.constant 3 : i32
    %13 = vector.broadcast %c3_i32_8 : i32 to vector<64x128xi32>
    %14 = arith.cmpi sge, %7, %13 : vector<64x128xi32>
    %15 = arith.andi %12, %14 : vector<64x128xi1>
    %c125_i32 = arith.constant 125 : i32
    %16 = vector.broadcast %c125_i32 : i32 to vector<64x128xi32>
    %17 = arith.cmpi slt, %7, %16 : vector<64x128xi32>
    %18 = arith.andi %15, %17 : vector<64x128xi1>
    %19 = arith.extui %18 : vector<64x128xi1> to vector<64x128xi32>
    %20 = arith.sitofp %19 : vector<64x128xi32> to vector<64x128xf32>
    %c0_i32 = arith.constant 0 : i32
    %21 = arith.cmpi eq, %arg1, %c0_i32 : i32
    %22 = arith.extui %21 : i1 to i32
    %c0_i32_9 = arith.constant 0 : i32
    %23 = arith.cmpi ne, %22, %c0_i32_9 : i32
    scf.if %23 {
      %cst_264 = arith.constant 0.000000e+00 : f32
      %395 = vector.broadcast %cst_264 : f32 to vector<1x36x128xf32>
      %c0_265 = arith.constant 0 : index
      %c0_266 = arith.constant 0 : index
      %c0_267 = arith.constant 0 : index
      %396 = vector.load %arg5[%c0_265, %c0_266, %c0_267] : memref<1x36x128xf32, #tpu.memory_space<vmem>>, vector<1x36x128xf32>
      tpu.vector_store %arg5[%c0_265, %c0_266, %c0_267], %395 {strides = array<i32>} : memref<1x36x128xf32, #tpu.memory_space<vmem>>, vector<1x36x128xf32>,
      %cst_268 = arith.constant 0.000000e+00 : f32
      %397 = vector.broadcast %cst_268 : f32 to vector<1x2x64x128xf32>
      %c0_269 = arith.constant 0 : index
      %c0_270 = arith.constant 0 : index
      %c0_271 = arith.constant 0 : index
      %c0_272 = arith.constant 0 : index
      %398 = vector.load %arg6[%c0_269, %c0_270, %c0_271, %c0_272] : memref<1x2x64x128xf32, #tpu.memory_space<vmem>>, vector<1x2x64x128xf32>
      tpu.vector_store %arg6[%c0_269, %c0_270, %c0_271, %c0_272], %397 {strides = array<i32>} : memref<1x2x64x128xf32, #tpu.memory_space<vmem>>, vector<1x2x64x128xf32>,
      %cst_273 = arith.constant 0.000000e+00 : f32
      %399 = vector.broadcast %cst_273 : f32 to vector<1x2x128xf32>
      %c0_274 = arith.constant 0 : index
      %c0_275 = arith.constant 0 : index
      %c0_276 = arith.constant 0 : index
      %400 = vector.load %arg7[%c0_274, %c0_275, %c0_276] : memref<1x2x128xf32, #tpu.memory_space<vmem>>, vector<1x2x128xf32>
      tpu.vector_store %arg7[%c0_274, %c0_275, %c0_276], %399 {strides = array<i32>} : memref<1x2x128xf32, #tpu.memory_space<vmem>>, vector<1x2x128xf32>,
    } else {
    }
    %c0_10 = arith.constant 0 : index
    %c0_11 = arith.constant 0 : index
    %c0_12 = arith.constant 0 : index
    %c0_13 = arith.constant 0 : index
    %24 = vector.load %arg6[%c0_10, %c0_11, %c0_12, %c0_13] : memref<1x2x64x128xf32, #tpu.memory_space<vmem>>, vector<1x1x64x128xf32>
    %25 = vector.shape_cast %24 : vector<1x1x64x128xf32> to vector<64x128xf32>
    %cst = arith.constant dense<0.000000e+00> : vector<64x128xf32>
    %26 = vector.multi_reduction <add>, %3, %cst [0] : vector<2x64x128xf32> to vector<64x128xf32>
    %27 = arith.addf %25, %26 : vector<64x128xf32>
    %c0_14 = arith.constant 0 : index
    %c0_15 = arith.constant 0 : index
    %c0_16 = arith.constant 0 : index
    %c0_17 = arith.constant 0 : index
    %28 = vector.load %arg6[%c0_14, %c0_15, %c0_16, %c0_17] : memref<1x2x64x128xf32, #tpu.memory_space<vmem>>, vector<1x1x64x128xf32>
    %29 = vector.shape_cast %28 : vector<1x1x64x128xf32> to vector<64x128xf32>
    %30 = vector.shape_cast %27 : vector<64x128xf32> to vector<1x1x64x128xf32>
    tpu.vector_store %arg6[%c0_14, %c0_15, %c0_16, %c0_17], %30 {strides = array<i32>} : memref<1x2x64x128xf32, #tpu.memory_space<vmem>>, vector<1x1x64x128xf32>,
    %c0_18 = arith.constant 0 : index
    %c1 = arith.constant 1 : index
    %c0_19 = arith.constant 0 : index
    %c0_20 = arith.constant 0 : index
    %31 = vector.load %arg6[%c0_18, %c1, %c0_19, %c0_20] : memref<1x2x64x128xf32, #tpu.memory_space<vmem>>, vector<1x1x64x128xf32>
    %32 = vector.shape_cast %31 : vector<1x1x64x128xf32> to vector<64x128xf32>
    %33 = arith.mulf %3, %3 : vector<2x64x128xf32>
    %cst_21 = arith.constant dense<0.000000e+00> : vector<64x128xf32>
    %34 = vector.multi_reduction <add>, %33, %cst_21 [0] : vector<2x64x128xf32> to vector<64x128xf32>
    %35 = arith.addf %32, %34 : vector<64x128xf32>
    %c0_22 = arith.constant 0 : index
    %c1_23 = arith.constant 1 : index
    %c0_24 = arith.constant 0 : index
    %c0_25 = arith.constant 0 : index
    %36 = vector.load %arg6[%c0_22, %c1_23, %c0_24, %c0_25] : memref<1x2x64x128xf32, #tpu.memory_space<vmem>>, vector<1x1x64x128xf32>
    %37 = vector.shape_cast %36 : vector<1x1x64x128xf32> to vector<64x128xf32>
    %38 = vector.shape_cast %35 : vector<64x128xf32> to vector<1x1x64x128xf32>
    tpu.vector_store %arg6[%c0_22, %c1_23, %c0_24, %c0_25], %38 {strides = array<i32>} : memref<1x2x64x128xf32, #tpu.memory_space<vmem>>, vector<1x1x64x128xf32>,
    %39 = vector.shape_cast %20 : vector<64x128xf32> to vector<1x64x128xf32>
    %40 = vector.broadcast %39 : vector<1x64x128xf32> to vector<2x64x128xf32>
    %41 = arith.mulf %5, %40 : vector<2x64x128xf32>
    %42 = vector.shape_cast %41 : vector<2x64x128xf32> to vector<128x128xf32>
    %c0_26 = arith.constant 0 : index
    %c0_27 = arith.constant 0 : index
    %c0_28 = arith.constant 0 : index
    %43 = vector.load %arg7[%c0_26, %c0_27, %c0_28] : memref<1x2x128xf32, #tpu.memory_space<vmem>>, vector<1x1x128xf32>
    %44 = vector.shape_cast %43 : vector<1x1x128xf32> to vector<1x128xf32>
    %cst_29 = arith.constant dense<0.000000e+00> : vector<128xf32>
    %45 = vector.multi_reduction <add>, %42, %cst_29 [0] : vector<128x128xf32> to vector<128xf32>
    %46 = vector.shape_cast %45 : vector<128xf32> to vector<1x128xf32>
    %47 = arith.addf %44, %46 : vector<1x128xf32>
    %c0_30 = arith.constant 0 : index
    %c0_31 = arith.constant 0 : index
    %c0_32 = arith.constant 0 : index
    %48 = vector.load %arg7[%c0_30, %c0_31, %c0_32] : memref<1x2x128xf32, #tpu.memory_space<vmem>>, vector<1x1x128xf32>
    %49 = vector.shape_cast %48 : vector<1x1x128xf32> to vector<1x128xf32>
    %50 = vector.shape_cast %47 : vector<1x128xf32> to vector<1x1x128xf32>
    tpu.vector_store %arg7[%c0_30, %c0_31, %c0_32], %50 {strides = array<i32>} : memref<1x2x128xf32, #tpu.memory_space<vmem>>, vector<1x1x128xf32>,
    %c0_33 = arith.constant 0 : index
    %c1_34 = arith.constant 1 : index
    %c0_35 = arith.constant 0 : index
    %51 = vector.load %arg7[%c0_33, %c1_34, %c0_35] : memref<1x2x128xf32, #tpu.memory_space<vmem>>, vector<1x1x128xf32>
    %52 = vector.shape_cast %51 : vector<1x1x128xf32> to vector<1x128xf32>
    %53 = arith.mulf %42, %42 : vector<128x128xf32>
    %cst_36 = arith.constant dense<0.000000e+00> : vector<128xf32>
    %54 = vector.multi_reduction <add>, %53, %cst_36 [0] : vector<128x128xf32> to vector<128xf32>
    %55 = vector.shape_cast %54 : vector<128xf32> to vector<1x128xf32>
    %56 = arith.addf %52, %55 : vector<1x128xf32>
    %c0_37 = arith.constant 0 : index
    %c1_38 = arith.constant 1 : index
    %c0_39 = arith.constant 0 : index
    %57 = vector.load %arg7[%c0_37, %c1_38, %c0_39] : memref<1x2x128xf32, #tpu.memory_space<vmem>>, vector<1x1x128xf32>
    %58 = vector.shape_cast %57 : vector<1x1x128xf32> to vector<1x128xf32>
    %59 = vector.shape_cast %56 : vector<1x128xf32> to vector<1x1x128xf32>
    tpu.vector_store %arg7[%c0_37, %c1_38, %c0_39], %59 {strides = array<i32>} : memref<1x2x128xf32, #tpu.memory_space<vmem>>, vector<1x1x128xf32>,
    %60 = vector.shape_cast %3 : vector<2x64x128xf32> to vector<128x128xf32>
    %c125_i32_40 = arith.constant 125 : i32
    %61 = tpu.dynamic_rotate %42 by %c125_i32_40 dim 1 : vector<128x128xf32>, i32 -> vector<128x128xf32>
    %c126_i32 = arith.constant 126 : i32
    %62 = tpu.dynamic_rotate %42 by %c126_i32 dim 1 : vector<128x128xf32>, i32 -> vector<128x128xf32>
    %c127_i32 = arith.constant 127 : i32
    %63 = tpu.dynamic_rotate %42 by %c127_i32 dim 1 : vector<128x128xf32>, i32 -> vector<128x128xf32>
    %c1_i32 = arith.constant 1 : i32
    %64 = tpu.dynamic_rotate %42 by %c1_i32 dim 1 : vector<128x128xf32>, i32 -> vector<128x128xf32>
    %c2_i32 = arith.constant 2 : i32
    %65 = tpu.dynamic_rotate %42 by %c2_i32 dim 1 : vector<128x128xf32>, i32 -> vector<128x128xf32>
    %c3_i32_41 = arith.constant 3 : i32
    %66 = tpu.dynamic_rotate %60 by %c3_i32_41 dim 0 : vector<128x128xf32>, i32 -> vector<128x128xf32>
    %c0_42 = arith.constant 0 : index
    %c0_43 = arith.constant 0 : index
    %c0_44 = arith.constant 0 : index
    %67 = vector.load %arg5[%c0_42, %c0_43, %c0_44] : memref<1x36x128xf32, #tpu.memory_space<vmem>>, vector<1x1x128xf32>
    %68 = vector.shape_cast %67 : vector<1x1x128xf32> to vector<1x128xf32>
    %69 = arith.mulf %66, %61 : vector<128x128xf32>
    %cst_45 = arith.constant dense<0.000000e+00> : vector<128xf32>
    %70 = vector.multi_reduction <add>, %69, %cst_45 [0] : vector<128x128xf32> to vector<128xf32>
    %71 = vector.shape_cast %70 : vector<128xf32> to vector<1x128xf32>
    %72 = arith.addf %68, %71 : vector<1x128xf32>
    %c0_46 = arith.constant 0 : index
    %c0_47 = arith.constant 0 : index
    %c0_48 = arith.constant 0 : index
    %73 = vector.load %arg5[%c0_46, %c0_47, %c0_48] : memref<1x36x128xf32, #tpu.memory_space<vmem>>, vector<1x1x128xf32>
    %74 = vector.shape_cast %73 : vector<1x1x128xf32> to vector<1x128xf32>
    %75 = vector.shape_cast %72 : vector<1x128xf32> to vector<1x1x128xf32>
    tpu.vector_store %arg5[%c0_46, %c0_47, %c0_48], %75 {strides = array<i32>} : memref<1x36x128xf32, #tpu.memory_space<vmem>>, vector<1x1x128xf32>,
    %c0_49 = arith.constant 0 : index
    %c1_50 = arith.constant 1 : index
    %c0_51 = arith.constant 0 : index
    %76 = vector.load %arg5[%c0_49, %c1_50, %c0_51] : memref<1x36x128xf32, #tpu.memory_space<vmem>>, vector<1x1x128xf32>
    %77 = vector.shape_cast %76 : vector<1x1x128xf32> to vector<1x128xf32>
    %78 = arith.mulf %66, %62 : vector<128x128xf32>
    %cst_52 = arith.constant dense<0.000000e+00> : vector<128xf32>
    %79 = vector.multi_reduction <add>, %78, %cst_52 [0] : vector<128x128xf32> to vector<128xf32>
    %80 = vector.shape_cast %79 : vector<128xf32> to vector<1x128xf32>
    %81 = arith.addf %77, %80 : vector<1x128xf32>
    %c0_53 = arith.constant 0 : index
    %c1_54 = arith.constant 1 : index
    %c0_55 = arith.constant 0 : index
    %82 = vector.load %arg5[%c0_53, %c1_54, %c0_55] : memref<1x36x128xf32, #tpu.memory_space<vmem>>, vector<1x1x128xf32>
    %83 = vector.shape_cast %82 : vector<1x1x128xf32> to vector<1x128xf32>
    %84 = vector.shape_cast %81 : vector<1x128xf32> to vector<1x1x128xf32>
    tpu.vector_store %arg5[%c0_53, %c1_54, %c0_55], %84 {strides = array<i32>} : memref<1x36x128xf32, #tpu.memory_space<vmem>>, vector<1x1x128xf32>,
    %c0_56 = arith.constant 0 : index
    %c2 = arith.constant 2 : index
    %c0_57 = arith.constant 0 : index
    %85 = vector.load %arg5[%c0_56, %c2, %c0_57] : memref<1x36x128xf32, #tpu.memory_space<vmem>>, vector<1x1x128xf32>
    %86 = vector.shape_cast %85 : vector<1x1x128xf32> to vector<1x128xf32>
    %87 = arith.mulf %66, %63 : vector<128x128xf32>
    %cst_58 = arith.constant dense<0.000000e+00> : vector<128xf32>
    %88 = vector.multi_reduction <add>, %87, %cst_58 [0] : vector<128x128xf32> to vector<128xf32>
    %89 = vector.shape_cast %88 : vector<128xf32> to vector<1x128xf32>
    %90 = arith.addf %86, %89 : vector<1x128xf32>
    %c0_59 = arith.constant 0 : index
    %c2_60 = arith.constant 2 : index
    %c0_61 = arith.constant 0 : index
    %91 = vector.load %arg5[%c0_59, %c2_60, %c0_61] : memref<1x36x128xf32, #tpu.memory_space<vmem>>, vector<1x1x128xf32>
    %92 = vector.shape_cast %91 : vector<1x1x128xf32> to vector<1x128xf32>
    %93 = vector.shape_cast %90 : vector<1x128xf32> to vector<1x1x128xf32>
    tpu.vector_store %arg5[%c0_59, %c2_60, %c0_61], %93 {strides = array<i32>} : memref<1x36x128xf32, #tpu.memory_space<vmem>>, vector<1x1x128xf32>,
    %c0_62 = arith.constant 0 : index
    %c3 = arith.constant 3 : index
    %c0_63 = arith.constant 0 : index
    %94 = vector.load %arg5[%c0_62, %c3, %c0_63] : memref<1x36x128xf32, #tpu.memory_space<vmem>>, vector<1x1x128xf32>
    %95 = vector.shape_cast %94 : vector<1x1x128xf32> to vector<1x128xf32>
    %96 = arith.mulf %66, %42 : vector<128x128xf32>
    %cst_64 = arith.constant dense<0.000000e+00> : vector<128xf32>
    %97 = vector.multi_reduction <add>, %96, %cst_64 [0] : vector<128x128xf32> to vector<128xf32>
    %98 = vector.shape_cast %97 : vector<128xf32> to vector<1x128xf32>
    %99 = arith.addf %95, %98 : vector<1x128xf32>
    %c0_65 = arith.constant 0 : index
    %c3_66 = arith.constant 3 : index
    %c0_67 = arith.constant 0 : index
    %100 = vector.load %arg5[%c0_65, %c3_66, %c0_67] : memref<1x36x128xf32, #tpu.memory_space<vmem>>, vector<1x1x128xf32>
    %101 = vector.shape_cast %100 : vector<1x1x128xf32> to vector<1x128xf32>
    %102 = vector.shape_cast %99 : vector<1x128xf32> to vector<1x1x128xf32>
    tpu.vector_store %arg5[%c0_65, %c3_66, %c0_67], %102 {strides = array<i32>} : memref<1x36x128xf32, #tpu.memory_space<vmem>>, vector<1x1x128xf32>,
    %c0_68 = arith.constant 0 : index
    %c4 = arith.constant 4 : index
    %c0_69 = arith.constant 0 : index
    %103 = vector.load %arg5[%c0_68, %c4, %c0_69] : memref<1x36x128xf32, #tpu.memory_space<vmem>>, vector<1x1x128xf32>
    %104 = vector.shape_cast %103 : vector<1x1x128xf32> to vector<1x128xf32>
    %105 = arith.mulf %66, %64 : vector<128x128xf32>
    %cst_70 = arith.constant dense<0.000000e+00> : vector<128xf32>
    %106 = vector.multi_reduction <add>, %105, %cst_70 [0] : vector<128x128xf32> to vector<128xf32>
    %107 = vector.shape_cast %106 : vector<128xf32> to vector<1x128xf32>
    %108 = arith.addf %104, %107 : vector<1x128xf32>
    %c0_71 = arith.constant 0 : index
    %c4_72 = arith.constant 4 : index
    %c0_73 = arith.constant 0 : index
    %109 = vector.load %arg5[%c0_71, %c4_72, %c0_73] : memref<1x36x128xf32, #tpu.memory_space<vmem>>, vector<1x1x128xf32>
    %110 = vector.shape_cast %109 : vector<1x1x128xf32> to vector<1x128xf32>
    %111 = vector.shape_cast %108 : vector<1x128xf32> to vector<1x1x128xf32>
    tpu.vector_store %arg5[%c0_71, %c4_72, %c0_73], %111 {strides = array<i32>} : memref<1x36x128xf32, #tpu.memory_space<vmem>>, vector<1x1x128xf32>,
    %c0_74 = arith.constant 0 : index
    %c5 = arith.constant 5 : index
    %c0_75 = arith.constant 0 : index
    %112 = vector.load %arg5[%c0_74, %c5, %c0_75] : memref<1x36x128xf32, #tpu.memory_space<vmem>>, vector<1x1x128xf32>
    %113 = vector.shape_cast %112 : vector<1x1x128xf32> to vector<1x128xf32>
    %114 = arith.mulf %66, %65 : vector<128x128xf32>
    %cst_76 = arith.constant dense<0.000000e+00> : vector<128xf32>
    %115 = vector.multi_reduction <add>, %114, %cst_76 [0] : vector<128x128xf32> to vector<128xf32>
    %116 = vector.shape_cast %115 : vector<128xf32> to vector<1x128xf32>
    %117 = arith.addf %113, %116 : vector<1x128xf32>
    %c0_77 = arith.constant 0 : index
    %c5_78 = arith.constant 5 : index
    %c0_79 = arith.constant 0 : index
    %118 = vector.load %arg5[%c0_77, %c5_78, %c0_79] : memref<1x36x128xf32, #tpu.memory_space<vmem>>, vector<1x1x128xf32>
    %119 = vector.shape_cast %118 : vector<1x1x128xf32> to vector<1x128xf32>
    %120 = vector.shape_cast %117 : vector<1x128xf32> to vector<1x1x128xf32>
    tpu.vector_store %arg5[%c0_77, %c5_78, %c0_79], %120 {strides = array<i32>} : memref<1x36x128xf32, #tpu.memory_space<vmem>>, vector<1x1x128xf32>,
    %c2_i32_80 = arith.constant 2 : i32
    %121 = tpu.dynamic_rotate %60 by %c2_i32_80 dim 0 : vector<128x128xf32>, i32 -> vector<128x128xf32>
    %c0_81 = arith.constant 0 : index
    %c6 = arith.constant 6 : index
    %c0_82 = arith.constant 0 : index
    %122 = vector.load %arg5[%c0_81, %c6, %c0_82] : memref<1x36x128xf32, #tpu.memory_space<vmem>>, vector<1x1x128xf32>
    %123 = vector.shape_cast %122 : vector<1x1x128xf32> to vector<1x128xf32>
    %124 = arith.mulf %121, %61 : vector<128x128xf32>
    %cst_83 = arith.constant dense<0.000000e+00> : vector<128xf32>
    %125 = vector.multi_reduction <add>, %124, %cst_83 [0] : vector<128x128xf32> to vector<128xf32>
    %126 = vector.shape_cast %125 : vector<128xf32> to vector<1x128xf32>
    %127 = arith.addf %123, %126 : vector<1x128xf32>
    %c0_84 = arith.constant 0 : index
    %c6_85 = arith.constant 6 : index
    %c0_86 = arith.constant 0 : index
    %128 = vector.load %arg5[%c0_84, %c6_85, %c0_86] : memref<1x36x128xf32, #tpu.memory_space<vmem>>, vector<1x1x128xf32>
    %129 = vector.shape_cast %128 : vector<1x1x128xf32> to vector<1x128xf32>
    %130 = vector.shape_cast %127 : vector<1x128xf32> to vector<1x1x128xf32>
    tpu.vector_store %arg5[%c0_84, %c6_85, %c0_86], %130 {strides = array<i32>} : memref<1x36x128xf32, #tpu.memory_space<vmem>>, vector<1x1x128xf32>,
    %c0_87 = arith.constant 0 : index
    %c7 = arith.constant 7 : index
    %c0_88 = arith.constant 0 : index
    %131 = vector.load %arg5[%c0_87, %c7, %c0_88] : memref<1x36x128xf32, #tpu.memory_space<vmem>>, vector<1x1x128xf32>
    %132 = vector.shape_cast %131 : vector<1x1x128xf32> to vector<1x128xf32>
    %133 = arith.mulf %121, %62 : vector<128x128xf32>
    %cst_89 = arith.constant dense<0.000000e+00> : vector<128xf32>
    %134 = vector.multi_reduction <add>, %133, %cst_89 [0] : vector<128x128xf32> to vector<128xf32>
    %135 = vector.shape_cast %134 : vector<128xf32> to vector<1x128xf32>
    %136 = arith.addf %132, %135 : vector<1x128xf32>
    %c0_90 = arith.constant 0 : index
    %c7_91 = arith.constant 7 : index
    %c0_92 = arith.constant 0 : index
    %137 = vector.load %arg5[%c0_90, %c7_91, %c0_92] : memref<1x36x128xf32, #tpu.memory_space<vmem>>, vector<1x1x128xf32>
    %138 = vector.shape_cast %137 : vector<1x1x128xf32> to vector<1x128xf32>
    %139 = vector.shape_cast %136 : vector<1x128xf32> to vector<1x1x128xf32>
    tpu.vector_store %arg5[%c0_90, %c7_91, %c0_92], %139 {strides = array<i32>} : memref<1x36x128xf32, #tpu.memory_space<vmem>>, vector<1x1x128xf32>,
    %c0_93 = arith.constant 0 : index
    %c8 = arith.constant 8 : index
    %c0_94 = arith.constant 0 : index
    %140 = vector.load %arg5[%c0_93, %c8, %c0_94] : memref<1x36x128xf32, #tpu.memory_space<vmem>>, vector<1x1x128xf32>
    %141 = vector.shape_cast %140 : vector<1x1x128xf32> to vector<1x128xf32>
    %142 = arith.mulf %121, %63 : vector<128x128xf32>
    %cst_95 = arith.constant dense<0.000000e+00> : vector<128xf32>
    %143 = vector.multi_reduction <add>, %142, %cst_95 [0] : vector<128x128xf32> to vector<128xf32>
    %144 = vector.shape_cast %143 : vector<128xf32> to vector<1x128xf32>
    %145 = arith.addf %141, %144 : vector<1x128xf32>
    %c0_96 = arith.constant 0 : index
    %c8_97 = arith.constant 8 : index
    %c0_98 = arith.constant 0 : index
    %146 = vector.load %arg5[%c0_96, %c8_97, %c0_98] : memref<1x36x128xf32, #tpu.memory_space<vmem>>, vector<1x1x128xf32>
    %147 = vector.shape_cast %146 : vector<1x1x128xf32> to vector<1x128xf32>
    %148 = vector.shape_cast %145 : vector<1x128xf32> to vector<1x1x128xf32>
    tpu.vector_store %arg5[%c0_96, %c8_97, %c0_98], %148 {strides = array<i32>} : memref<1x36x128xf32, #tpu.memory_space<vmem>>, vector<1x1x128xf32>,
    %c0_99 = arith.constant 0 : index
    %c9 = arith.constant 9 : index
    %c0_100 = arith.constant 0 : index
    %149 = vector.load %arg5[%c0_99, %c9, %c0_100] : memref<1x36x128xf32, #tpu.memory_space<vmem>>, vector<1x1x128xf32>
    %150 = vector.shape_cast %149 : vector<1x1x128xf32> to vector<1x128xf32>
    %151 = arith.mulf %121, %42 : vector<128x128xf32>
    %cst_101 = arith.constant dense<0.000000e+00> : vector<128xf32>
    %152 = vector.multi_reduction <add>, %151, %cst_101 [0] : vector<128x128xf32> to vector<128xf32>
    %153 = vector.shape_cast %152 : vector<128xf32> to vector<1x128xf32>
    %154 = arith.addf %150, %153 : vector<1x128xf32>
    %c0_102 = arith.constant 0 : index
    %c9_103 = arith.constant 9 : index
    %c0_104 = arith.constant 0 : index
    %155 = vector.load %arg5[%c0_102, %c9_103, %c0_104] : memref<1x36x128xf32, #tpu.memory_space<vmem>>, vector<1x1x128xf32>
    %156 = vector.shape_cast %155 : vector<1x1x128xf32> to vector<1x128xf32>
    %157 = vector.shape_cast %154 : vector<1x128xf32> to vector<1x1x128xf32>
    tpu.vector_store %arg5[%c0_102, %c9_103, %c0_104], %157 {strides = array<i32>} : memref<1x36x128xf32, #tpu.memory_space<vmem>>, vector<1x1x128xf32>,
    %c0_105 = arith.constant 0 : index
    %c10 = arith.constant 10 : index
    %c0_106 = arith.constant 0 : index
    %158 = vector.load %arg5[%c0_105, %c10, %c0_106] : memref<1x36x128xf32, #tpu.memory_space<vmem>>, vector<1x1x128xf32>
    %159 = vector.shape_cast %158 : vector<1x1x128xf32> to vector<1x128xf32>
    %160 = arith.mulf %121, %64 : vector<128x128xf32>
    %cst_107 = arith.constant dense<0.000000e+00> : vector<128xf32>
    %161 = vector.multi_reduction <add>, %160, %cst_107 [0] : vector<128x128xf32> to vector<128xf32>
    %162 = vector.shape_cast %161 : vector<128xf32> to vector<1x128xf32>
    %163 = arith.addf %159, %162 : vector<1x128xf32>
    %c0_108 = arith.constant 0 : index
    %c10_109 = arith.constant 10 : index
    %c0_110 = arith.constant 0 : index
    %164 = vector.load %arg5[%c0_108, %c10_109, %c0_110] : memref<1x36x128xf32, #tpu.memory_space<vmem>>, vector<1x1x128xf32>
    %165 = vector.shape_cast %164 : vector<1x1x128xf32> to vector<1x128xf32>
    %166 = vector.shape_cast %163 : vector<1x128xf32> to vector<1x1x128xf32>
    tpu.vector_store %arg5[%c0_108, %c10_109, %c0_110], %166 {strides = array<i32>} : memref<1x36x128xf32, #tpu.memory_space<vmem>>, vector<1x1x128xf32>,
    %c0_111 = arith.constant 0 : index
    %c11 = arith.constant 11 : index
    %c0_112 = arith.constant 0 : index
    %167 = vector.load %arg5[%c0_111, %c11, %c0_112] : memref<1x36x128xf32, #tpu.memory_space<vmem>>, vector<1x1x128xf32>
    %168 = vector.shape_cast %167 : vector<1x1x128xf32> to vector<1x128xf32>
    %169 = arith.mulf %121, %65 : vector<128x128xf32>
    %cst_113 = arith.constant dense<0.000000e+00> : vector<128xf32>
    %170 = vector.multi_reduction <add>, %169, %cst_113 [0] : vector<128x128xf32> to vector<128xf32>
    %171 = vector.shape_cast %170 : vector<128xf32> to vector<1x128xf32>
    %172 = arith.addf %168, %171 : vector<1x128xf32>
    %c0_114 = arith.constant 0 : index
    %c11_115 = arith.constant 11 : index
    %c0_116 = arith.constant 0 : index
    %173 = vector.load %arg5[%c0_114, %c11_115, %c0_116] : memref<1x36x128xf32, #tpu.memory_space<vmem>>, vector<1x1x128xf32>
    %174 = vector.shape_cast %173 : vector<1x1x128xf32> to vector<1x128xf32>
    %175 = vector.shape_cast %172 : vector<1x128xf32> to vector<1x1x128xf32>
    tpu.vector_store %arg5[%c0_114, %c11_115, %c0_116], %175 {strides = array<i32>} : memref<1x36x128xf32, #tpu.memory_space<vmem>>, vector<1x1x128xf32>,
    %c1_i32_117 = arith.constant 1 : i32
    %176 = tpu.dynamic_rotate %60 by %c1_i32_117 dim 0 : vector<128x128xf32>, i32 -> vector<128x128xf32>
    %c0_118 = arith.constant 0 : index
    %c12 = arith.constant 12 : index
    %c0_119 = arith.constant 0 : index
    %177 = vector.load %arg5[%c0_118, %c12, %c0_119] : memref<1x36x128xf32, #tpu.memory_space<vmem>>, vector<1x1x128xf32>
    %178 = vector.shape_cast %177 : vector<1x1x128xf32> to vector<1x128xf32>
    %179 = arith.mulf %176, %61 : vector<128x128xf32>
    %cst_120 = arith.constant dense<0.000000e+00> : vector<128xf32>
    %180 = vector.multi_reduction <add>, %179, %cst_120 [0] : vector<128x128xf32> to vector<128xf32>
    %181 = vector.shape_cast %180 : vector<128xf32> to vector<1x128xf32>
    %182 = arith.addf %178, %181 : vector<1x128xf32>
    %c0_121 = arith.constant 0 : index
    %c12_122 = arith.constant 12 : index
    %c0_123 = arith.constant 0 : index
    %183 = vector.load %arg5[%c0_121, %c12_122, %c0_123] : memref<1x36x128xf32, #tpu.memory_space<vmem>>, vector<1x1x128xf32>
    %184 = vector.shape_cast %183 : vector<1x1x128xf32> to vector<1x128xf32>
    %185 = vector.shape_cast %182 : vector<1x128xf32> to vector<1x1x128xf32>
    tpu.vector_store %arg5[%c0_121, %c12_122, %c0_123], %185 {strides = array<i32>} : memref<1x36x128xf32, #tpu.memory_space<vmem>>, vector<1x1x128xf32>,
    %c0_124 = arith.constant 0 : index
    %c13 = arith.constant 13 : index
    %c0_125 = arith.constant 0 : index
    %186 = vector.load %arg5[%c0_124, %c13, %c0_125] : memref<1x36x128xf32, #tpu.memory_space<vmem>>, vector<1x1x128xf32>
    %187 = vector.shape_cast %186 : vector<1x1x128xf32> to vector<1x128xf32>
    %188 = arith.mulf %176, %62 : vector<128x128xf32>
    %cst_126 = arith.constant dense<0.000000e+00> : vector<128xf32>
    %189 = vector.multi_reduction <add>, %188, %cst_126 [0] : vector<128x128xf32> to vector<128xf32>
    %190 = vector.shape_cast %189 : vector<128xf32> to vector<1x128xf32>
    %191 = arith.addf %187, %190 : vector<1x128xf32>
    %c0_127 = arith.constant 0 : index
    %c13_128 = arith.constant 13 : index
    %c0_129 = arith.constant 0 : index
    %192 = vector.load %arg5[%c0_127, %c13_128, %c0_129] : memref<1x36x128xf32, #tpu.memory_space<vmem>>, vector<1x1x128xf32>
    %193 = vector.shape_cast %192 : vector<1x1x128xf32> to vector<1x128xf32>
    %194 = vector.shape_cast %191 : vector<1x128xf32> to vector<1x1x128xf32>
    tpu.vector_store %arg5[%c0_127, %c13_128, %c0_129], %194 {strides = array<i32>} : memref<1x36x128xf32, #tpu.memory_space<vmem>>, vector<1x1x128xf32>,
    %c0_130 = arith.constant 0 : index
    %c14 = arith.constant 14 : index
    %c0_131 = arith.constant 0 : index
    %195 = vector.load %arg5[%c0_130, %c14, %c0_131] : memref<1x36x128xf32, #tpu.memory_space<vmem>>, vector<1x1x128xf32>
    %196 = vector.shape_cast %195 : vector<1x1x128xf32> to vector<1x128xf32>
    %197 = arith.mulf %176, %63 : vector<128x128xf32>
    %cst_132 = arith.constant dense<0.000000e+00> : vector<128xf32>
    %198 = vector.multi_reduction <add>, %197, %cst_132 [0] : vector<128x128xf32> to vector<128xf32>
    %199 = vector.shape_cast %198 : vector<128xf32> to vector<1x128xf32>
    %200 = arith.addf %196, %199 : vector<1x128xf32>
    %c0_133 = arith.constant 0 : index
    %c14_134 = arith.constant 14 : index
    %c0_135 = arith.constant 0 : index
    %201 = vector.load %arg5[%c0_133, %c14_134, %c0_135] : memref<1x36x128xf32, #tpu.memory_space<vmem>>, vector<1x1x128xf32>
    %202 = vector.shape_cast %201 : vector<1x1x128xf32> to vector<1x128xf32>
    %203 = vector.shape_cast %200 : vector<1x128xf32> to vector<1x1x128xf32>
    tpu.vector_store %arg5[%c0_133, %c14_134, %c0_135], %203 {strides = array<i32>} : memref<1x36x128xf32, #tpu.memory_space<vmem>>, vector<1x1x128xf32>,
    %c0_136 = arith.constant 0 : index
    %c15 = arith.constant 15 : index
    %c0_137 = arith.constant 0 : index
    %204 = vector.load %arg5[%c0_136, %c15, %c0_137] : memref<1x36x128xf32, #tpu.memory_space<vmem>>, vector<1x1x128xf32>
    %205 = vector.shape_cast %204 : vector<1x1x128xf32> to vector<1x128xf32>
    %206 = arith.mulf %176, %42 : vector<128x128xf32>
    %cst_138 = arith.constant dense<0.000000e+00> : vector<128xf32>
    %207 = vector.multi_reduction <add>, %206, %cst_138 [0] : vector<128x128xf32> to vector<128xf32>
    %208 = vector.shape_cast %207 : vector<128xf32> to vector<1x128xf32>
    %209 = arith.addf %205, %208 : vector<1x128xf32>
    %c0_139 = arith.constant 0 : index
    %c15_140 = arith.constant 15 : index
    %c0_141 = arith.constant 0 : index
    %210 = vector.load %arg5[%c0_139, %c15_140, %c0_141] : memref<1x36x128xf32, #tpu.memory_space<vmem>>, vector<1x1x128xf32>
    %211 = vector.shape_cast %210 : vector<1x1x128xf32> to vector<1x128xf32>
    %212 = vector.shape_cast %209 : vector<1x128xf32> to vector<1x1x128xf32>
    tpu.vector_store %arg5[%c0_139, %c15_140, %c0_141], %212 {strides = array<i32>} : memref<1x36x128xf32, #tpu.memory_space<vmem>>, vector<1x1x128xf32>,
    %c0_142 = arith.constant 0 : index
    %c16 = arith.constant 16 : index
    %c0_143 = arith.constant 0 : index
    %213 = vector.load %arg5[%c0_142, %c16, %c0_143] : memref<1x36x128xf32, #tpu.memory_space<vmem>>, vector<1x1x128xf32>
    %214 = vector.shape_cast %213 : vector<1x1x128xf32> to vector<1x128xf32>
    %215 = arith.mulf %176, %64 : vector<128x128xf32>
    %cst_144 = arith.constant dense<0.000000e+00> : vector<128xf32>
    %216 = vector.multi_reduction <add>, %215, %cst_144 [0] : vector<128x128xf32> to vector<128xf32>
    %217 = vector.shape_cast %216 : vector<128xf32> to vector<1x128xf32>
    %218 = arith.addf %214, %217 : vector<1x128xf32>
    %c0_145 = arith.constant 0 : index
    %c16_146 = arith.constant 16 : index
    %c0_147 = arith.constant 0 : index
    %219 = vector.load %arg5[%c0_145, %c16_146, %c0_147] : memref<1x36x128xf32, #tpu.memory_space<vmem>>, vector<1x1x128xf32>
    %220 = vector.shape_cast %219 : vector<1x1x128xf32> to vector<1x128xf32>
    %221 = vector.shape_cast %218 : vector<1x128xf32> to vector<1x1x128xf32>
    tpu.vector_store %arg5[%c0_145, %c16_146, %c0_147], %221 {strides = array<i32>} : memref<1x36x128xf32, #tpu.memory_space<vmem>>, vector<1x1x128xf32>,
    %c0_148 = arith.constant 0 : index
    %c17 = arith.constant 17 : index
    %c0_149 = arith.constant 0 : index
    %222 = vector.load %arg5[%c0_148, %c17, %c0_149] : memref<1x36x128xf32, #tpu.memory_space<vmem>>, vector<1x1x128xf32>
    %223 = vector.shape_cast %222 : vector<1x1x128xf32> to vector<1x128xf32>
    %224 = arith.mulf %176, %65 : vector<128x128xf32>
    %cst_150 = arith.constant dense<0.000000e+00> : vector<128xf32>
    %225 = vector.multi_reduction <add>, %224, %cst_150 [0] : vector<128x128xf32> to vector<128xf32>
    %226 = vector.shape_cast %225 : vector<128xf32> to vector<1x128xf32>
    %227 = arith.addf %223, %226 : vector<1x128xf32>
    %c0_151 = arith.constant 0 : index
    %c17_152 = arith.constant 17 : index
    %c0_153 = arith.constant 0 : index
    %228 = vector.load %arg5[%c0_151, %c17_152, %c0_153] : memref<1x36x128xf32, #tpu.memory_space<vmem>>, vector<1x1x128xf32>
    %229 = vector.shape_cast %228 : vector<1x1x128xf32> to vector<1x128xf32>
    %230 = vector.shape_cast %227 : vector<1x128xf32> to vector<1x1x128xf32>
    tpu.vector_store %arg5[%c0_151, %c17_152, %c0_153], %230 {strides = array<i32>} : memref<1x36x128xf32, #tpu.memory_space<vmem>>, vector<1x1x128xf32>,
    %c0_154 = arith.constant 0 : index
    %c18 = arith.constant 18 : index
    %c0_155 = arith.constant 0 : index
    %231 = vector.load %arg5[%c0_154, %c18, %c0_155] : memref<1x36x128xf32, #tpu.memory_space<vmem>>, vector<1x1x128xf32>
    %232 = vector.shape_cast %231 : vector<1x1x128xf32> to vector<1x128xf32>
    %233 = arith.mulf %60, %61 : vector<128x128xf32>
    %cst_156 = arith.constant dense<0.000000e+00> : vector<128xf32>
    %234 = vector.multi_reduction <add>, %233, %cst_156 [0] : vector<128x128xf32> to vector<128xf32>
    %235 = vector.shape_cast %234 : vector<128xf32> to vector<1x128xf32>
    %236 = arith.addf %232, %235 : vector<1x128xf32>
    %c0_157 = arith.constant 0 : index
    %c18_158 = arith.constant 18 : index
    %c0_159 = arith.constant 0 : index
    %237 = vector.load %arg5[%c0_157, %c18_158, %c0_159] : memref<1x36x128xf32, #tpu.memory_space<vmem>>, vector<1x1x128xf32>
    %238 = vector.shape_cast %237 : vector<1x1x128xf32> to vector<1x128xf32>
    %239 = vector.shape_cast %236 : vector<1x128xf32> to vector<1x1x128xf32>
    tpu.vector_store %arg5[%c0_157, %c18_158, %c0_159], %239 {strides = array<i32>} : memref<1x36x128xf32, #tpu.memory_space<vmem>>, vector<1x1x128xf32>,
    %c0_160 = arith.constant 0 : index
    %c19 = arith.constant 19 : index
    %c0_161 = arith.constant 0 : index
    %240 = vector.load %arg5[%c0_160, %c19, %c0_161] : memref<1x36x128xf32, #tpu.memory_space<vmem>>, vector<1x1x128xf32>
    %241 = vector.shape_cast %240 : vector<1x1x128xf32> to vector<1x128xf32>
    %242 = arith.mulf %60, %62 : vector<128x128xf32>
    %cst_162 = arith.constant dense<0.000000e+00> : vector<128xf32>
    %243 = vector.multi_reduction <add>, %242, %cst_162 [0] : vector<128x128xf32> to vector<128xf32>
    %244 = vector.shape_cast %243 : vector<128xf32> to vector<1x128xf32>
    %245 = arith.addf %241, %244 : vector<1x128xf32>
    %c0_163 = arith.constant 0 : index
    %c19_164 = arith.constant 19 : index
    %c0_165 = arith.constant 0 : index
    %246 = vector.load %arg5[%c0_163, %c19_164, %c0_165] : memref<1x36x128xf32, #tpu.memory_space<vmem>>, vector<1x1x128xf32>
    %247 = vector.shape_cast %246 : vector<1x1x128xf32> to vector<1x128xf32>
    %248 = vector.shape_cast %245 : vector<1x128xf32> to vector<1x1x128xf32>
    tpu.vector_store %arg5[%c0_163, %c19_164, %c0_165], %248 {strides = array<i32>} : memref<1x36x128xf32, #tpu.memory_space<vmem>>, vector<1x1x128xf32>,
    %c0_166 = arith.constant 0 : index
    %c20 = arith.constant 20 : index
    %c0_167 = arith.constant 0 : index
    %249 = vector.load %arg5[%c0_166, %c20, %c0_167] : memref<1x36x128xf32, #tpu.memory_space<vmem>>, vector<1x1x128xf32>
    %250 = vector.shape_cast %249 : vector<1x1x128xf32> to vector<1x128xf32>
    %251 = arith.mulf %60, %63 : vector<128x128xf32>
    %cst_168 = arith.constant dense<0.000000e+00> : vector<128xf32>
    %252 = vector.multi_reduction <add>, %251, %cst_168 [0] : vector<128x128xf32> to vector<128xf32>
    %253 = vector.shape_cast %252 : vector<128xf32> to vector<1x128xf32>
    %254 = arith.addf %250, %253 : vector<1x128xf32>
    %c0_169 = arith.constant 0 : index
    %c20_170 = arith.constant 20 : index
    %c0_171 = arith.constant 0 : index
    %255 = vector.load %arg5[%c0_169, %c20_170, %c0_171] : memref<1x36x128xf32, #tpu.memory_space<vmem>>, vector<1x1x128xf32>
    %256 = vector.shape_cast %255 : vector<1x1x128xf32> to vector<1x128xf32>
    %257 = vector.shape_cast %254 : vector<1x128xf32> to vector<1x1x128xf32>
    tpu.vector_store %arg5[%c0_169, %c20_170, %c0_171], %257 {strides = array<i32>} : memref<1x36x128xf32, #tpu.memory_space<vmem>>, vector<1x1x128xf32>,
    %c0_172 = arith.constant 0 : index
    %c21 = arith.constant 21 : index
    %c0_173 = arith.constant 0 : index
    %258 = vector.load %arg5[%c0_172, %c21, %c0_173] : memref<1x36x128xf32, #tpu.memory_space<vmem>>, vector<1x1x128xf32>
    %259 = vector.shape_cast %258 : vector<1x1x128xf32> to vector<1x128xf32>
    %260 = arith.mulf %60, %42 : vector<128x128xf32>
    %cst_174 = arith.constant dense<0.000000e+00> : vector<128xf32>
    %261 = vector.multi_reduction <add>, %260, %cst_174 [0] : vector<128x128xf32> to vector<128xf32>
    %262 = vector.shape_cast %261 : vector<128xf32> to vector<1x128xf32>
    %263 = arith.addf %259, %262 : vector<1x128xf32>
    %c0_175 = arith.constant 0 : index
    %c21_176 = arith.constant 21 : index
    %c0_177 = arith.constant 0 : index
    %264 = vector.load %arg5[%c0_175, %c21_176, %c0_177] : memref<1x36x128xf32, #tpu.memory_space<vmem>>, vector<1x1x128xf32>
    %265 = vector.shape_cast %264 : vector<1x1x128xf32> to vector<1x128xf32>
    %266 = vector.shape_cast %263 : vector<1x128xf32> to vector<1x1x128xf32>
    tpu.vector_store %arg5[%c0_175, %c21_176, %c0_177], %266 {strides = array<i32>} : memref<1x36x128xf32, #tpu.memory_space<vmem>>, vector<1x1x128xf32>,
    %c0_178 = arith.constant 0 : index
    %c22 = arith.constant 22 : index
    %c0_179 = arith.constant 0 : index
    %267 = vector.load %arg5[%c0_178, %c22, %c0_179] : memref<1x36x128xf32, #tpu.memory_space<vmem>>, vector<1x1x128xf32>
    %268 = vector.shape_cast %267 : vector<1x1x128xf32> to vector<1x128xf32>
    %269 = arith.mulf %60, %64 : vector<128x128xf32>
    %cst_180 = arith.constant dense<0.000000e+00> : vector<128xf32>
    %270 = vector.multi_reduction <add>, %269, %cst_180 [0] : vector<128x128xf32> to vector<128xf32>
    %271 = vector.shape_cast %270 : vector<128xf32> to vector<1x128xf32>
    %272 = arith.addf %268, %271 : vector<1x128xf32>
    %c0_181 = arith.constant 0 : index
    %c22_182 = arith.constant 22 : index
    %c0_183 = arith.constant 0 : index
    %273 = vector.load %arg5[%c0_181, %c22_182, %c0_183] : memref<1x36x128xf32, #tpu.memory_space<vmem>>, vector<1x1x128xf32>
    %274 = vector.shape_cast %273 : vector<1x1x128xf32> to vector<1x128xf32>
    %275 = vector.shape_cast %272 : vector<1x128xf32> to vector<1x1x128xf32>
    tpu.vector_store %arg5[%c0_181, %c22_182, %c0_183], %275 {strides = array<i32>} : memref<1x36x128xf32, #tpu.memory_space<vmem>>, vector<1x1x128xf32>,
    %c0_184 = arith.constant 0 : index
    %c23 = arith.constant 23 : index
    %c0_185 = arith.constant 0 : index
    %276 = vector.load %arg5[%c0_184, %c23, %c0_185] : memref<1x36x128xf32, #tpu.memory_space<vmem>>, vector<1x1x128xf32>
    %277 = vector.shape_cast %276 : vector<1x1x128xf32> to vector<1x128xf32>
    %278 = arith.mulf %60, %65 : vector<128x128xf32>
    %cst_186 = arith.constant dense<0.000000e+00> : vector<128xf32>
    %279 = vector.multi_reduction <add>, %278, %cst_186 [0] : vector<128x128xf32> to vector<128xf32>
    %280 = vector.shape_cast %279 : vector<128xf32> to vector<1x128xf32>
    %281 = arith.addf %277, %280 : vector<1x128xf32>
    %c0_187 = arith.constant 0 : index
    %c23_188 = arith.constant 23 : index
    %c0_189 = arith.constant 0 : index
    %282 = vector.load %arg5[%c0_187, %c23_188, %c0_189] : memref<1x36x128xf32, #tpu.memory_space<vmem>>, vector<1x1x128xf32>
    %283 = vector.shape_cast %282 : vector<1x1x128xf32> to vector<1x128xf32>
    %284 = vector.shape_cast %281 : vector<1x128xf32> to vector<1x1x128xf32>
    tpu.vector_store %arg5[%c0_187, %c23_188, %c0_189], %284 {strides = array<i32>} : memref<1x36x128xf32, #tpu.memory_space<vmem>>, vector<1x1x128xf32>,
    %c127_i32_190 = arith.constant 127 : i32
    %285 = tpu.dynamic_rotate %60 by %c127_i32_190 dim 0 : vector<128x128xf32>, i32 -> vector<128x128xf32>
    %c0_191 = arith.constant 0 : index
    %c24 = arith.constant 24 : index
    %c0_192 = arith.constant 0 : index
    %286 = vector.load %arg5[%c0_191, %c24, %c0_192] : memref<1x36x128xf32, #tpu.memory_space<vmem>>, vector<1x1x128xf32>
    %287 = vector.shape_cast %286 : vector<1x1x128xf32> to vector<1x128xf32>
    %288 = arith.mulf %285, %61 : vector<128x128xf32>
    %cst_193 = arith.constant dense<0.000000e+00> : vector<128xf32>
    %289 = vector.multi_reduction <add>, %288, %cst_193 [0] : vector<128x128xf32> to vector<128xf32>
    %290 = vector.shape_cast %289 : vector<128xf32> to vector<1x128xf32>
    %291 = arith.addf %287, %290 : vector<1x128xf32>
    %c0_194 = arith.constant 0 : index
    %c24_195 = arith.constant 24 : index
    %c0_196 = arith.constant 0 : index
    %292 = vector.load %arg5[%c0_194, %c24_195, %c0_196] : memref<1x36x128xf32, #tpu.memory_space<vmem>>, vector<1x1x128xf32>
    %293 = vector.shape_cast %292 : vector<1x1x128xf32> to vector<1x128xf32>
    %294 = vector.shape_cast %291 : vector<1x128xf32> to vector<1x1x128xf32>
    tpu.vector_store %arg5[%c0_194, %c24_195, %c0_196], %294 {strides = array<i32>} : memref<1x36x128xf32, #tpu.memory_space<vmem>>, vector<1x1x128xf32>,
    %c0_197 = arith.constant 0 : index
    %c25 = arith.constant 25 : index
    %c0_198 = arith.constant 0 : index
    %295 = vector.load %arg5[%c0_197, %c25, %c0_198] : memref<1x36x128xf32, #tpu.memory_space<vmem>>, vector<1x1x128xf32>
    %296 = vector.shape_cast %295 : vector<1x1x128xf32> to vector<1x128xf32>
    %297 = arith.mulf %285, %62 : vector<128x128xf32>
    %cst_199 = arith.constant dense<0.000000e+00> : vector<128xf32>
    %298 = vector.multi_reduction <add>, %297, %cst_199 [0] : vector<128x128xf32> to vector<128xf32>
    %299 = vector.shape_cast %298 : vector<128xf32> to vector<1x128xf32>
    %300 = arith.addf %296, %299 : vector<1x128xf32>
    %c0_200 = arith.constant 0 : index
    %c25_201 = arith.constant 25 : index
    %c0_202 = arith.constant 0 : index
    %301 = vector.load %arg5[%c0_200, %c25_201, %c0_202] : memref<1x36x128xf32, #tpu.memory_space<vmem>>, vector<1x1x128xf32>
    %302 = vector.shape_cast %301 : vector<1x1x128xf32> to vector<1x128xf32>
    %303 = vector.shape_cast %300 : vector<1x128xf32> to vector<1x1x128xf32>
    tpu.vector_store %arg5[%c0_200, %c25_201, %c0_202], %303 {strides = array<i32>} : memref<1x36x128xf32, #tpu.memory_space<vmem>>, vector<1x1x128xf32>,
    %c0_203 = arith.constant 0 : index
    %c26 = arith.constant 26 : index
    %c0_204 = arith.constant 0 : index
    %304 = vector.load %arg5[%c0_203, %c26, %c0_204] : memref<1x36x128xf32, #tpu.memory_space<vmem>>, vector<1x1x128xf32>
    %305 = vector.shape_cast %304 : vector<1x1x128xf32> to vector<1x128xf32>
    %306 = arith.mulf %285, %63 : vector<128x128xf32>
    %cst_205 = arith.constant dense<0.000000e+00> : vector<128xf32>
    %307 = vector.multi_reduction <add>, %306, %cst_205 [0] : vector<128x128xf32> to vector<128xf32>
    %308 = vector.shape_cast %307 : vector<128xf32> to vector<1x128xf32>
    %309 = arith.addf %305, %308 : vector<1x128xf32>
    %c0_206 = arith.constant 0 : index
    %c26_207 = arith.constant 26 : index
    %c0_208 = arith.constant 0 : index
    %310 = vector.load %arg5[%c0_206, %c26_207, %c0_208] : memref<1x36x128xf32, #tpu.memory_space<vmem>>, vector<1x1x128xf32>
    %311 = vector.shape_cast %310 : vector<1x1x128xf32> to vector<1x128xf32>
    %312 = vector.shape_cast %309 : vector<1x128xf32> to vector<1x1x128xf32>
    tpu.vector_store %arg5[%c0_206, %c26_207, %c0_208], %312 {strides = array<i32>} : memref<1x36x128xf32, #tpu.memory_space<vmem>>, vector<1x1x128xf32>,
    %c0_209 = arith.constant 0 : index
    %c27 = arith.constant 27 : index
    %c0_210 = arith.constant 0 : index
    %313 = vector.load %arg5[%c0_209, %c27, %c0_210] : memref<1x36x128xf32, #tpu.memory_space<vmem>>, vector<1x1x128xf32>
    %314 = vector.shape_cast %313 : vector<1x1x128xf32> to vector<1x128xf32>
    %315 = arith.mulf %285, %42 : vector<128x128xf32>
    %cst_211 = arith.constant dense<0.000000e+00> : vector<128xf32>
    %316 = vector.multi_reduction <add>, %315, %cst_211 [0] : vector<128x128xf32> to vector<128xf32>
    %317 = vector.shape_cast %316 : vector<128xf32> to vector<1x128xf32>
    %318 = arith.addf %314, %317 : vector<1x128xf32>
    %c0_212 = arith.constant 0 : index
    %c27_213 = arith.constant 27 : index
    %c0_214 = arith.constant 0 : index
    %319 = vector.load %arg5[%c0_212, %c27_213, %c0_214] : memref<1x36x128xf32, #tpu.memory_space<vmem>>, vector<1x1x128xf32>
    %320 = vector.shape_cast %319 : vector<1x1x128xf32> to vector<1x128xf32>
    %321 = vector.shape_cast %318 : vector<1x128xf32> to vector<1x1x128xf32>
    tpu.vector_store %arg5[%c0_212, %c27_213, %c0_214], %321 {strides = array<i32>} : memref<1x36x128xf32, #tpu.memory_space<vmem>>, vector<1x1x128xf32>,
    %c0_215 = arith.constant 0 : index
    %c28 = arith.constant 28 : index
    %c0_216 = arith.constant 0 : index
    %322 = vector.load %arg5[%c0_215, %c28, %c0_216] : memref<1x36x128xf32, #tpu.memory_space<vmem>>, vector<1x1x128xf32>
    %323 = vector.shape_cast %322 : vector<1x1x128xf32> to vector<1x128xf32>
    %324 = arith.mulf %285, %64 : vector<128x128xf32>
    %cst_217 = arith.constant dense<0.000000e+00> : vector<128xf32>
    %325 = vector.multi_reduction <add>, %324, %cst_217 [0] : vector<128x128xf32> to vector<128xf32>
    %326 = vector.shape_cast %325 : vector<128xf32> to vector<1x128xf32>
    %327 = arith.addf %323, %326 : vector<1x128xf32>
    %c0_218 = arith.constant 0 : index
    %c28_219 = arith.constant 28 : index
    %c0_220 = arith.constant 0 : index
    %328 = vector.load %arg5[%c0_218, %c28_219, %c0_220] : memref<1x36x128xf32, #tpu.memory_space<vmem>>, vector<1x1x128xf32>
    %329 = vector.shape_cast %328 : vector<1x1x128xf32> to vector<1x128xf32>
    %330 = vector.shape_cast %327 : vector<1x128xf32> to vector<1x1x128xf32>
    tpu.vector_store %arg5[%c0_218, %c28_219, %c0_220], %330 {strides = array<i32>} : memref<1x36x128xf32, #tpu.memory_space<vmem>>, vector<1x1x128xf32>,
    %c0_221 = arith.constant 0 : index
    %c29 = arith.constant 29 : index
    %c0_222 = arith.constant 0 : index
    %331 = vector.load %arg5[%c0_221, %c29, %c0_222] : memref<1x36x128xf32, #tpu.memory_space<vmem>>, vector<1x1x128xf32>
    %332 = vector.shape_cast %331 : vector<1x1x128xf32> to vector<1x128xf32>
    %333 = arith.mulf %285, %65 : vector<128x128xf32>
    %cst_223 = arith.constant dense<0.000000e+00> : vector<128xf32>
    %334 = vector.multi_reduction <add>, %333, %cst_223 [0] : vector<128x128xf32> to vector<128xf32>
    %335 = vector.shape_cast %334 : vector<128xf32> to vector<1x128xf32>
    %336 = arith.addf %332, %335 : vector<1x128xf32>
    %c0_224 = arith.constant 0 : index
    %c29_225 = arith.constant 29 : index
    %c0_226 = arith.constant 0 : index
    %337 = vector.load %arg5[%c0_224, %c29_225, %c0_226] : memref<1x36x128xf32, #tpu.memory_space<vmem>>, vector<1x1x128xf32>
    %338 = vector.shape_cast %337 : vector<1x1x128xf32> to vector<1x128xf32>
    %339 = vector.shape_cast %336 : vector<1x128xf32> to vector<1x1x128xf32>
    tpu.vector_store %arg5[%c0_224, %c29_225, %c0_226], %339 {strides = array<i32>} : memref<1x36x128xf32, #tpu.memory_space<vmem>>, vector<1x1x128xf32>,
    %c126_i32_227 = arith.constant 126 : i32
    %340 = tpu.dynamic_rotate %60 by %c126_i32_227 dim 0 : vector<128x128xf32>, i32 -> vector<128x128xf32>
    %c0_228 = arith.constant 0 : index
    %c30 = arith.constant 30 : index
    %c0_229 = arith.constant 0 : index
    %341 = vector.load %arg5[%c0_228, %c30, %c0_229] : memref<1x36x128xf32, #tpu.memory_space<vmem>>, vector<1x1x128xf32>
    %342 = vector.shape_cast %341 : vector<1x1x128xf32> to vector<1x128xf32>
    %343 = arith.mulf %340, %61 : vector<128x128xf32>
    %cst_230 = arith.constant dense<0.000000e+00> : vector<128xf32>
    %344 = vector.multi_reduction <add>, %343, %cst_230 [0] : vector<128x128xf32> to vector<128xf32>
    %345 = vector.shape_cast %344 : vector<128xf32> to vector<1x128xf32>
    %346 = arith.addf %342, %345 : vector<1x128xf32>
    %c0_231 = arith.constant 0 : index
    %c30_232 = arith.constant 30 : index
    %c0_233 = arith.constant 0 : index
    %347 = vector.load %arg5[%c0_231, %c30_232, %c0_233] : memref<1x36x128xf32, #tpu.memory_space<vmem>>, vector<1x1x128xf32>
    %348 = vector.shape_cast %347 : vector<1x1x128xf32> to vector<1x128xf32>
    %349 = vector.shape_cast %346 : vector<1x128xf32> to vector<1x1x128xf32>
    tpu.vector_store %arg5[%c0_231, %c30_232, %c0_233], %349 {strides = array<i32>} : memref<1x36x128xf32, #tpu.memory_space<vmem>>, vector<1x1x128xf32>,
    %c0_234 = arith.constant 0 : index
    %c31 = arith.constant 31 : index
    %c0_235 = arith.constant 0 : index
    %350 = vector.load %arg5[%c0_234, %c31, %c0_235] : memref<1x36x128xf32, #tpu.memory_space<vmem>>, vector<1x1x128xf32>
    %351 = vector.shape_cast %350 : vector<1x1x128xf32> to vector<1x128xf32>
    %352 = arith.mulf %340, %62 : vector<128x128xf32>
    %cst_236 = arith.constant dense<0.000000e+00> : vector<128xf32>
    %353 = vector.multi_reduction <add>, %352, %cst_236 [0] : vector<128x128xf32> to vector<128xf32>
    %354 = vector.shape_cast %353 : vector<128xf32> to vector<1x128xf32>
    %355 = arith.addf %351, %354 : vector<1x128xf32>
    %c0_237 = arith.constant 0 : index
    %c31_238 = arith.constant 31 : index
    %c0_239 = arith.constant 0 : index
    %356 = vector.load %arg5[%c0_237, %c31_238, %c0_239] : memref<1x36x128xf32, #tpu.memory_space<vmem>>, vector<1x1x128xf32>
    %357 = vector.shape_cast %356 : vector<1x1x128xf32> to vector<1x128xf32>
    %358 = vector.shape_cast %355 : vector<1x128xf32> to vector<1x1x128xf32>
    tpu.vector_store %arg5[%c0_237, %c31_238, %c0_239], %358 {strides = array<i32>} : memref<1x36x128xf32, #tpu.memory_space<vmem>>, vector<1x1x128xf32>,
    %c0_240 = arith.constant 0 : index
    %c32 = arith.constant 32 : index
    %c0_241 = arith.constant 0 : index
    %359 = vector.load %arg5[%c0_240, %c32, %c0_241] : memref<1x36x128xf32, #tpu.memory_space<vmem>>, vector<1x1x128xf32>
    %360 = vector.shape_cast %359 : vector<1x1x128xf32> to vector<1x128xf32>
    %361 = arith.mulf %340, %63 : vector<128x128xf32>
    %cst_242 = arith.constant dense<0.000000e+00> : vector<128xf32>
    %362 = vector.multi_reduction <add>, %361, %cst_242 [0] : vector<128x128xf32> to vector<128xf32>
    %363 = vector.shape_cast %362 : vector<128xf32> to vector<1x128xf32>
    %364 = arith.addf %360, %363 : vector<1x128xf32>
    %c0_243 = arith.constant 0 : index
    %c32_244 = arith.constant 32 : index
    %c0_245 = arith.constant 0 : index
    %365 = vector.load %arg5[%c0_243, %c32_244, %c0_245] : memref<1x36x128xf32, #tpu.memory_space<vmem>>, vector<1x1x128xf32>
    %366 = vector.shape_cast %365 : vector<1x1x128xf32> to vector<1x128xf32>
    %367 = vector.shape_cast %364 : vector<1x128xf32> to vector<1x1x128xf32>
    tpu.vector_store %arg5[%c0_243, %c32_244, %c0_245], %367 {strides = array<i32>} : memref<1x36x128xf32, #tpu.memory_space<vmem>>, vector<1x1x128xf32>,
    %c0_246 = arith.constant 0 : index
    %c33 = arith.constant 33 : index
    %c0_247 = arith.constant 0 : index
    %368 = vector.load %arg5[%c0_246, %c33, %c0_247] : memref<1x36x128xf32, #tpu.memory_space<vmem>>, vector<1x1x128xf32>
    %369 = vector.shape_cast %368 : vector<1x1x128xf32> to vector<1x128xf32>
    %370 = arith.mulf %340, %42 : vector<128x128xf32>
    %cst_248 = arith.constant dense<0.000000e+00> : vector<128xf32>
    %371 = vector.multi_reduction <add>, %370, %cst_248 [0] : vector<128x128xf32> to vector<128xf32>
    %372 = vector.shape_cast %371 : vector<128xf32> to vector<1x128xf32>
    %373 = arith.addf %369, %372 : vector<1x128xf32>
    %c0_249 = arith.constant 0 : index
    %c33_250 = arith.constant 33 : index
    %c0_251 = arith.constant 0 : index
    %374 = vector.load %arg5[%c0_249, %c33_250, %c0_251] : memref<1x36x128xf32, #tpu.memory_space<vmem>>, vector<1x1x128xf32>
    %375 = vector.shape_cast %374 : vector<1x1x128xf32> to vector<1x128xf32>
    %376 = vector.shape_cast %373 : vector<1x128xf32> to vector<1x1x128xf32>
    tpu.vector_store %arg5[%c0_249, %c33_250, %c0_251], %376 {strides = array<i32>} : memref<1x36x128xf32, #tpu.memory_space<vmem>>, vector<1x1x128xf32>,
    %c0_252 = arith.constant 0 : index
    %c34 = arith.constant 34 : index
    %c0_253 = arith.constant 0 : index
    %377 = vector.load %arg5[%c0_252, %c34, %c0_253] : memref<1x36x128xf32, #tpu.memory_space<vmem>>, vector<1x1x128xf32>
    %378 = vector.shape_cast %377 : vector<1x1x128xf32> to vector<1x128xf32>
    %379 = arith.mulf %340, %64 : vector<128x128xf32>
    %cst_254 = arith.constant dense<0.000000e+00> : vector<128xf32>
    %380 = vector.multi_reduction <add>, %379, %cst_254 [0] : vector<128x128xf32> to vector<128xf32>
    %381 = vector.shape_cast %380 : vector<128xf32> to vector<1x128xf32>
    %382 = arith.addf %378, %381 : vector<1x128xf32>
    %c0_255 = arith.constant 0 : index
    %c34_256 = arith.constant 34 : index
    %c0_257 = arith.constant 0 : index
    %383 = vector.load %arg5[%c0_255, %c34_256, %c0_257] : memref<1x36x128xf32, #tpu.memory_space<vmem>>, vector<1x1x128xf32>
    %384 = vector.shape_cast %383 : vector<1x1x128xf32> to vector<1x128xf32>
    %385 = vector.shape_cast %382 : vector<1x128xf32> to vector<1x1x128xf32>
    tpu.vector_store %arg5[%c0_255, %c34_256, %c0_257], %385 {strides = array<i32>} : memref<1x36x128xf32, #tpu.memory_space<vmem>>, vector<1x1x128xf32>,
    %c0_258 = arith.constant 0 : index
    %c35 = arith.constant 35 : index
    %c0_259 = arith.constant 0 : index
    %386 = vector.load %arg5[%c0_258, %c35, %c0_259] : memref<1x36x128xf32, #tpu.memory_space<vmem>>, vector<1x1x128xf32>
    %387 = vector.shape_cast %386 : vector<1x1x128xf32> to vector<1x128xf32>
    %388 = arith.mulf %340, %65 : vector<128x128xf32>
    %cst_260 = arith.constant dense<0.000000e+00> : vector<128xf32>
    %389 = vector.multi_reduction <add>, %388, %cst_260 [0] : vector<128x128xf32> to vector<128xf32>
    %390 = vector.shape_cast %389 : vector<128xf32> to vector<1x128xf32>
    %391 = arith.addf %387, %390 : vector<1x128xf32>
    %c0_261 = arith.constant 0 : index
    %c35_262 = arith.constant 35 : index
    %c0_263 = arith.constant 0 : index
    %392 = vector.load %arg5[%c0_261, %c35_262, %c0_263] : memref<1x36x128xf32, #tpu.memory_space<vmem>>, vector<1x1x128xf32>
    %393 = vector.shape_cast %392 : vector<1x1x128xf32> to vector<1x128xf32>
    %394 = vector.shape_cast %391 : vector<1x128xf32> to vector<1x1x128xf32>
    tpu.vector_store %arg5[%c0_261, %c35_262, %c0_263], %394 {strides = array<i32>} : memref<1x36x128xf32, #tpu.memory_space<vmem>>, vector<1x1x128xf32>,
    return
  }
  func.func @transform_0(%arg0: i32, %arg1: i32) -> (i32, i32, i32) {
    %c1_i32 = arith.constant 1 : i32
    %0 = arith.muli %arg0, %c1_i32 : i32
    %1 = arith.addi %0, %arg1 : i32
    %c0_i32 = arith.constant 0 : i32
    %c0_i32_0 = arith.constant 0 : i32
    %c0_i32_1 = arith.constant 0 : i32
    return %1, %c0_i32, %c0_i32_0 : i32, i32, i32
  }
  func.func @transform_1(%arg0: i32, %arg1: i32) -> (i32, i32, i32) {
    %c1_i32 = arith.constant 1 : i32
    %0 = arith.muli %arg0, %c1_i32 : i32
    %1 = arith.addi %0, %arg1 : i32
    %c0_i32 = arith.constant 0 : i32
    %c0_i32_0 = arith.constant 0 : i32
    %c0_i32_1 = arith.constant 0 : i32
    return %1, %c0_i32, %c0_i32_0 : i32, i32, i32
  }
  func.func @transform_2(%arg0: i32, %arg1: i32) -> (i32, i32, i32) {
    %c1_i32 = arith.constant 1 : i32
    %0 = arith.muli %arg0, %c1_i32 : i32
    %1 = arith.addi %0, %arg1 : i32
    %c0_i32 = arith.constant 0 : i32
    %c0_i32_0 = arith.constant 0 : i32
    %c0_i32_1 = arith.constant 0 : i32
    return %1, %c0_i32, %c0_i32_0 : i32, i32, i32
  }
  func.func @transform_3(%arg0: i32, %arg1: i32) -> (i32, i32, i32) {
    %c0_i32 = arith.constant 0 : i32
    %c0_i32_0 = arith.constant 0 : i32
    %c0_i32_1 = arith.constant 0 : i32
    return %arg0, %c0_i32, %c0_i32_0 : i32, i32, i32
  }
  func.func @transform_4(%arg0: i32, %arg1: i32) -> (i32, i32, i32, i32) {
    %c0_i32 = arith.constant 0 : i32
    %c0_i32_0 = arith.constant 0 : i32
    %c0_i32_1 = arith.constant 0 : i32
    %c0_i32_2 = arith.constant 0 : i32
    return %arg0, %c0_i32, %c0_i32_0, %c0_i32_1 : i32, i32, i32, i32
  }
  func.func @transform_5(%arg0: i32, %arg1: i32) -> (i32, i32, i32) {
    %c0_i32 = arith.constant 0 : i32
    %c0_i32_0 = arith.constant 0 : i32
    %c0_i32_1 = arith.constant 0 : i32
    return %arg0, %c0_i32, %c0_i32_0 : i32, i32, i32
  }
}

</mosaic_0001>

<bundles_post_ra>
// kernel: tpu_custom_call.1
= control target key start
LH: loop header
LB: loop body
LE: loop exit
PB: predicated region body
PF: predicated region fallthrough
CT: control target
= control target key end

     0   :  { %11 = vsyncpa [#allocation3], 0  ;;  %s4788_s0 = inlined_call_operand.hbm [shape: f32[2,64,128], index: 0, kind: input, shape index: {}]   ;;  %s4789_s1 = inlined_call_operand.hbm [shape: f32[2,64,128], index: 1, kind: input, shape index: {}]   ;;  %s4790_s2 = inlined_call_operand.hbm [shape: bf16[2,64,128], index: 2, kind: input, shape index: {}]   ;;  %s4791_s3 = inlined_call_operand.vmem [shape: f32[1,36,128], index: 3, kind: output, shape index: {0}]   ;;  %s4792_s4 = inlined_call_operand.hbm [shape: f32[1,2,64,128], index: 4, kind: output, shape index: {1}]   ;;  %s4793_s5 = inlined_call_operand.hbm [shape: f32[1,2,128], index: 5, kind: output, shape index: {2}]  }
   0x1   :  { %12 = vsyncpa [#allocation6], 0 }
   0x2   :  { %13 = vsyncpa [#allocation4], 0 }
   0x3   :  { %14 = vsyncpa [#allocation10], 0  ;;  %s2414_s18 = smov [#allocation5]   ;;  %s2415_s20 = smov [#allocation2]  }
   0x4   :  { %s42_s19 = sshll.u32 %s2414_s18, 4  ;;  %s25_s21 = sshll.u32 %s2415_s20, 4  ;;  %s43_s19 = int_to_ptr.vmem [resolvable:$true] %s42_s19  ;;  %s2459_s21 = int_to_ptr.vmem [resolvable:$true] %s25_s21 }
   0x5   :  { %s2296_s24 = scalar_lea.hbm %s4789_s1, 2048 }
   0x6   :  { %p2297_p0 = scmp.ne.s32.totalorder %s4789_s1, %s2296_s24  ;;  %p2300_p1 = scmp.lt.u32.totalorder %s2296_s24, %s4789_s1 }
   0x8   :  { %p2302_p2 = pnand %p2300_p1, %p2297_p0 }
   0xa   :  { %2305 = shalt.err (!%p2302_p2)
}
   0xb   :  { %s2306_s29 = scalar_lea.vmem %s43_s19, 2048  ;;  %p2311_p4 = scmp.lt.s32.totalorder %s43_s19, %s43_s19 }
   0xc   :  { %p2307_p3 = scmp.ne.s32.totalorder %s43_s19, %s2306_s29  ;;  %p2312_p5 = scmp.lt.s32.totalorder %s2306_s29, %s2306_s29 }
   0xe   :  { %p2313_p6 = por %p2312_p5, %p2311_p4 }
  0x10   :  { %p2314_p7 = pnand %p2313_p6, %p2307_p3 }
  0x12   :  { %2317 = shalt.err (!%p2314_p7)
}
  0x13   :  { %s2416_s30 = smov 128   ;;  %s2417_s6 = smov 8  }
  0x14   :  { %48 = dma.hbm_to_vmem [thread:$0]  %s4789_s1, 2048, %s43_s19, [#allocation6], %s2416_s30, %s2416_s30, %s2417_s6  }
  0x15   :  { %s2318_s11 = scalar_lea.hbm %s4788_s0, 2048 }
  0x16   :  { %p2319_p8 = scmp.ne.s32.totalorder %s4788_s0, %s2318_s11  ;;  %p2322_p9 = scmp.lt.u32.totalorder %s2318_s11, %s4788_s0 }
  0x18   :  { %p2324_p10 = pnand %p2322_p9, %p2319_p8 }
  0x1a   :  { %2327 = shalt.err (!%p2324_p10)
}
  0x1b   :  { %s2328_s16 = scalar_lea.vmem %s2459_s21, 2048  ;;  %p2333_p12 = scmp.lt.s32.totalorder %s2459_s21, %s2459_s21 }
  0x1c   :  { %p2329_p11 = scmp.ne.s32.totalorder %s2459_s21, %s2328_s16  ;;  %p2334_p13 = scmp.lt.s32.totalorder %s2328_s16, %s2328_s16 }
  0x1e   :  { %p2335_p0 = por %p2334_p13, %p2333_p12 }
  0x20   :  { %p2336_p1 = pnand %p2335_p0, %p2329_p11 }
  0x22   :  { %2339 = shalt.err (!%p2336_p1)
}
  0x23   :  { %31 = dma.hbm_to_vmem [thread:$0]  %s4788_s0, 2048, %s2459_s21, [#allocation3], %s2416_s30, %s2416_s30, %s2417_s6  }
  0x24   :  { %s2418_s18 = smov [#allocation7]   ;;  %s2340_s23 = scalar_lea.hbm %s4790_s2, 1024 }
  0x25   :  { %s59_s19 = sshll.u32 %s2418_s18, 4  ;;  %p2341_p2 = scmp.ne.s32.totalorder %s4790_s2, %s2340_s23  ;;  %s60_s19 = int_to_ptr.vmem [resolvable:$true] %s59_s19 }
  0x26   :  { %p2344_p3 = scmp.lt.u32.totalorder %s2340_s23, %s4790_s2 }
  0x28   :  { %p2346_p4 = pnand %p2344_p3, %p2341_p2 }
  0x2a   :  { %2349 = shalt.err (!%p2346_p4)
}
  0x2b   :  { %s2350_s28 = scalar_lea.vmem %s60_s19, 1024  ;;  %p2355_p6 = scmp.lt.s32.totalorder %s60_s19, %s60_s19 }
  0x2c   :  { %p2351_p5 = scmp.ne.s32.totalorder %s60_s19, %s2350_s28  ;;  %p2356_p7 = scmp.lt.s32.totalorder %s2350_s28, %s2350_s28 }
  0x2e   :  { %p2357_p8 = por %p2356_p7, %p2355_p6 }
  0x30   :  { %p2358_p9 = pnand %p2357_p8, %p2351_p5 }
  0x32   :  { %2361 = shalt.err (!%p2358_p9)
}
  0x33   :  { %s2419_s0 = smov 64   ;;  %s2420_s21 = smov 4  }
  0x34   :  { %65 = dma.hbm_to_vmem [thread:$0]  %s4790_s2, 1024, %s60_s19, [#allocation6], %s2419_s0, %s2419_s0, %s2420_s21  }
  0x35   :  { %2406 = dma.done.wait [#allocation3], 2048  }
  0x36   :  { %2407 = vsyncadd [#allocation3], 4294965248 }
  0x37   :  { %2408 = dma.done.wait [#allocation6], 3072  }
  0x38   :  { %2409 = vsyncadd [#allocation6], 4294964224  ;;  %v177_v0 = vlaneseq  ;;  %v2421_v1 = vmov 0.0   ;;  %v2274_v5 = vld [vmem:[#allocation7 + $0x8] sm:$0xff]   ;;  %v147_v6 = vld [vmem:[#allocation5 + $0x10] sm:$0xff]  ;;  %s2422_s1 = smov 125  }
  0x39   :  { %250 = vst [vmem:[%s4791_s3] sm:$0xff] %v2421_v1  ;;  %251 = vst [vmem:[%s4791_s3 + $0x8] sm:$0xff] %v2421_v1  ;;  %v2248_v7 = vunpack.c.l.bf16 %v2274_v5  ;;  %v2536_v8 = vld [vmem:[#allocation7] sm:$0xff]   ;;  %v2249_v10 = vunpack.c.h.bf16 %v2274_v5  ;;  %v148_v13 = vld [vmem:[#allocation5 + $0x18] sm:$0xff]  ;;  %s2423_s17 = smov 126   ;;  %s2424_s18 = smov 127  }
  0x3a   :  { %252 = vst [vmem:[%s4791_s3 + $0x10] sm:$0xff] %v2421_v1  ;;  %253 = vst [vmem:[%s4791_s3 + $0x18] sm:$0xff] %v2421_v1  ;;  %v187_v2 = vand.u32 127, %v177_v0  ;;  %v2529_v3 = vshrl.u32 %v177_v0, 7  ;;  %v145_v9 = vld [vmem:[#allocation5] sm:$0xff]  ;;  %v2244_v12 = vunpack.c.l.bf16 %v2536_v8  ;;  %v2245_v14 = vunpack.c.h.bf16 %v2536_v8  ;;  %v146_v17 = vld [vmem:[#allocation5 + $0x8] sm:$0xff] }
  0x3b   :  { %254 = vst [vmem:[%s4791_s3 + $0x20] sm:$0xf] %v2421_v1  ;;  %271 = vst [vmem:[#allocation9] sm:$0x3] %v2421_v1  ;;  %v163_v15 = vmul.f32 %v2248_v7, %v147_v6  ;;  %v2547_v18 = vld [vmem:[#allocation7 + $0x10] sm:$0xff]   ;;  %v164_v20 = vmul.f32 %v2249_v10, %v148_v13  ;;  %v150_v21 = vld [vmem:[#allocation5 + $0x28] sm:$0xff] }
  0x3c   :  { %vm212_vm0 = vcmp.ge.s32.totalorder %v187_v2, 3  ;;  %vm221_vm1 = vcmp.lt.s32.totalorder %v187_v2, 125  ;;  %vm188_vm2 = vcmp.ge.s32.totalorder %v2529_v3, 3  ;;  %v185_v4 = vadd.s32 56, %v2529_v3  ;;  %v149_v26 = vld [vmem:[#allocation5 + $0x20] sm:$0xff]  ;;  %v2554_v27 = vld [vmem:[#allocation7 + $0x18] sm:$0xff]  }
  0x3d   :  { %vm223_vm3 = vmand %vm212_vm0, %vm221_vm1  ;;  %v161_v19 = vmul.f32 %v2244_v12, %v145_v9  ;;  %v162_v23 = vmul.f32 %v2245_v14, %v146_v17  ;;  %v2253_v24 = vunpack.c.h.bf16 %v2547_v18  ;;  %v2252_v25 = vunpack.c.l.bf16 %v2547_v18  ;;  %v115_v30 = vld [vmem:[#allocation2 + $0x10] sm:$0xff]  ;;  %v116_v31 = vld [vmem:[#allocation2 + $0x18] sm:$0xff]  ;;  %s2425_s19 = smov 1   ;;  %s2426_s20 = smov 2  }
  0x3e   :  { %vm213_vm4 = vmand %vm188_vm2, %vm212_vm0  ;;  %v2539_v11 = vsel %vm223_vm3, 1.0, %v2421_v1  ;;  %vm203_vm6 = vcmp.lt.s32.totalorder %v185_v4, 61  ;;  %v2257_v34 = vunpack.c.h.bf16 %v2554_v27  ;;  %v2570_v35 = vld [vmem:[#allocation7 + $0x20] sm:$0xff]   ;;  %v152_v39 = vld [vmem:[#allocation5 + $0x38] sm:$0xff]  ;;  %v2256_v40 = vunpack.c.l.bf16 %v2554_v27 }
  0x3f   :  { %vm222_vm5 = vmand %vm213_vm4, %vm221_vm1  ;;  %v2550_v22 = vmul.f32 %v2539_v11, %v163_v15  ;;  %v2567_v32 = vmul.f32 %v2539_v11, %v164_v20  ;;  %v166_v33 = vmul.f32 %v2253_v24, %v150_v21  ;;  %v113_v36 = vld [vmem:[#allocation2] sm:$0xff]  ;;  %v2575_v37 = vmul.f32 %v2539_v11, %v162_v23  ;;  %v151_v42 = vld [vmem:[#allocation5 + $0x30] sm:$0xff] }
  0x40   :  { %v2545_v16 = vsel %vm222_vm5, 1.0, %v2421_v1  ;;  %vm2560_vm7 = vmand %vm203_vm6, %vm212_vm0  ;;  %v165_v38 = vmul.f32 %v2252_v25, %v149_v26  ;;  %v2261_v43 = vunpack.c.h.bf16 %v2570_v35  ;;  %v2586_v44 = vld [vmem:[#allocation7 + $0x28] sm:$0xff]   ;;  %v2588_v45 = vmul.f32 %v2248_v7, %v115_v30  ;;  %v117_v52 = vld [vmem:[#allocation2 + $0x20] sm:$0xff] }
  0x41   :  { %5060 = vst [vmem:[#allocation15_spill] sm:$0xff] %v2550_v22  ;;  %v2557_v28 = vmul.f32 %v2545_v16, %v161_v19  ;;  %437 = vrot.lane.b32.xlu1 %v2550_v22, %s2422_s1  ;;  %5064 = vst [vmem:[#allocation17_spill] sm:$0xff] %v2567_v32  ;;  %v2590_v46 = vmul.f32 %v2249_v10, %v116_v31  ;;  %v114_v47 = vld [vmem:[#allocation2 + $0x8] sm:$0xff]  ;;  %v2260_v50 = vunpack.c.l.bf16 %v2570_v35  ;;  %v153_v54 = vld [vmem:[#allocation5 + $0x40] sm:$0xff]  ;;  %v2265_v55 = vunpack.c.h.bf16 %v2586_v44 }
  0x42   :  { %5065 = vst [vmem:[#allocation18_spill] sm:$0xff] %v2575_v37  ;;  %vm2581_vm8 = vmand %vm2560_vm7, %vm221_vm1  ;;  %v118_v48 = vld [vmem:[#allocation2 + $0x28] sm:$0xff]  ;;  %v2596_v51 = vmul.f32 %v2539_v11, %v166_v33  ;;  %v168_v53 = vmul.f32 %v2257_v34, %v152_v39  ;;  %v2264_v56 = vunpack.c.l.bf16 %v2586_v44  ;;  %v2600_v57 = vld [vmem:[#allocation7 + $0x30] sm:$0xff]   ;;  %v2602_v58 = vmul.f32 %v2244_v12, %v113_v36 }
  0x43   :  { %5061 = vst [vmem:[#allocation16_spill] sm:$0xff] %v2557_v28  ;;  %433 = vrot.lane.b32.xlu0 %v2557_v28, %s2422_s1  ;;  %5068 = vst [vmem:[#allocation19_spill] sm:$0xff] %v2588_v45  ;;  %v154_v49 = vld [vmem:[#allocation5 + $0x48] sm:$0xff]  ;;  %v2607_v59 = vmul.f32 %v2539_v11, %v165_v38  ;;  %v2612_v60 = vsel %vm2581_vm8, 1.0, %v2421_v1  ;;  %v167_v61 = vmul.f32 %v2256_v40, %v151_v42  ;;  %v156_v62 = vld [vmem:[#allocation5 + $0x58] sm:$0xff]  ;;  %v2269_v9 = vunpack.c.h.bf16 %v2600_v57 }
  0x44   :  { %5069 = vst [vmem:[#allocation20_spill] sm:$0xff] %v2590_v46  ;;  %5070 = vst [vmem:[#allocation21_spill] sm:$0xff] %v2596_v51  ;;  %v155_v63 = vld [vmem:[#allocation5 + $0x50] sm:$0xff]  ;;  %v2280_v0 = vld [vmem:[#allocation7 + $0x38] sm:$0xff]   ;;  %v2614_v2 = vmul.f32 %v2245_v14, %v114_v47  ;;  %v2616_v4 = vmul.f32 %v2253_v24, %v118_v48  ;;  %v170_v8 = vmul.f32 %v2261_v43, %v154_v49  ;;  %vm609_vm9 = vcmp.lt.s32.totalorder %v2529_v3, 3 }
  0x45   :  { %439 = vrot.lane.b32.xlu1 %v2567_v32, %s2422_s1  ;;  %5071 = vst [vmem:[#allocation22_spill] sm:$0xff] %v2602_v58  ;;  %5072 = vst [vmem:[#allocation23_spill] sm:$0xff] %v2607_v59  ;;  %v120_v5 = vld [vmem:[#allocation2 + $0x38] sm:$0xff]  ;;  %v119_v6 = vld [vmem:[#allocation2 + $0x30] sm:$0xff]  ;;  %vm882_vm10 = vcmp.lt.s32.totalorder %v2529_v3, 2  ;;  %v2621_v1 = vmul.f32 %v2252_v25, %v117_v52  ;;  %v169_v12 = vmul.f32 %v2260_v50, %v153_v54  ;;  %v2268_v14 = vunpack.c.l.bf16 %v2600_v57 }
  0x46   :  { %5073 = vst [vmem:[#allocation24_spill] sm:$0xff] %v2614_v2  ;;  %5074 = vst [vmem:[#allocation25_spill] sm:$0xff] %v2616_v4  ;;  %v122_v7 = vld [vmem:[#allocation2 + $0x48] sm:$0xff]  ;;  %v121_v10 = vld [vmem:[#allocation2 + $0x40] sm:$0xff]  ;;  %v2273_v17 = vunpack.c.h.bf16 %v2280_v0  ;;  %v2627_v18 = vmul.f32 %v2612_v60, %v168_v53  ;;  %v172_v19 = vmul.f32 %v2265_v55, %v156_v62  ;;  %v171_v21 = vmul.f32 %v2264_v56, %v155_v63 }
  0x47   :  { %435 = vrot.lane.b32.xlu0 %v2575_v37, %s2422_s1  ;;  %5075 = vst [vmem:[#allocation26_spill] sm:$0xff] %v2621_v1  ;;  %v124_v13 = vld [vmem:[#allocation2 + $0x58] sm:$0xff]  ;;  %v158_v15 = vld [vmem:[#allocation5 + $0x68] sm:$0xff]  ;;  %v123_v20 = vld [vmem:[#allocation2 + $0x50] sm:$0xff]  ;;  %v2272_v25 = vunpack.c.l.bf16 %v2280_v0  ;;  %v2631_v26 = vmul.f32 %v2257_v34, %v120_v5  ;;  %v2633_v27 = vmul.f32 %v2256_v40, %v119_v6  ;;  %v2636_v29 = vmul.f32 %v2539_v11, %v167_v61 }
  0x48   :  { %5076 = vst [vmem:[#allocation27_spill] sm:$0xff] %v2627_v18  ;;  %v157_v23 = vld [vmem:[#allocation5 + $0x60] sm:$0xff]  ;;  %v160_v24 = vld [vmem:[#allocation5 + $0x78] sm:$0xff]  ;;  %v2638_v30 = vmul.f32 %v2261_v43, %v122_v7  ;;  %v159_v33 = vld [vmem:[#allocation5 + $0x70] sm:$0xff]  ;;  %vm1155_vm11 = vcmp.lt.s32.totalorder %v2529_v3, 1  ;;  %vm1668_vm12 = vcmp.lt.s32.totalorder %v2529_v3, 7  ;;  %v2643_v35 = vmul.f32 %v2539_v11, %v170_v8 }
  0x49   :  { %443 = vrot.lane.b32.xlu1 %v2596_v51, %s2422_s1  ;;  %5077 = vst [vmem:[#allocation28_spill] sm:$0xff] %v2631_v26  ;;  %5078 = vst [vmem:[#allocation29_spill] sm:$0xff] %v2633_v27  ;;  %v128_v31 = vld [vmem:[#allocation2 + $0x78] sm:$0xff]  ;;  %v2645_v36 = vmul.f32 %v2260_v50, %v121_v10  ;;  %v2647_v34 = vmul.f32 %v2265_v55, %v124_v13  ;;  %v174_v38 = vmul.f32 %v2269_v9, %v158_v15  ;;  %v126_v41 = vld [vmem:[#allocation2 + $0x68] sm:$0xff] }
  0x4a   :  { %5079 = vst [vmem:[#allocation30_spill] sm:$0xff] %v2636_v29  ;;  %5080 = vst [vmem:[#allocation31_spill] sm:$0xff] %v2638_v30  ;;  %vm1941_vm13 = vcmp.lt.s32.totalorder %v2529_v3, 6  ;;  %v2651_v39 = vmul.f32 %v2545_v16, %v169_v12  ;;  %v2653_v40 = vmul.f32 %v2264_v56, %v123_v20  ;;  %v125_v42 = vld [vmem:[#allocation2 + $0x60] sm:$0xff]  ;;  %v173_v43 = vmul.f32 %v2268_v14, %v157_v23  ;;  %v127_v47 = vld [vmem:[#allocation2 + $0x70] sm:$0xff] }
  0x4b   :  { %441 = vrot.lane.b32.xlu0 %v2607_v59, %s2422_s1  ;;  %5081 = vst [vmem:[#allocation32_spill] sm:$0xff] %v2643_v35  ;;  %5082 = vst [vmem:[#allocation33_spill] sm:$0xff] %v2645_v36  ;;  %v176_v44 = vmul.f32 %v2273_v17, %v160_v24  ;;  %v2658_v48 = vmul.f32 %v2539_v11, %v172_v19  ;;  %v2661_v49 = vmul.f32 %v2539_v11, %v171_v21 }
  0x4c   :  { %5083 = vst [vmem:[#allocation34_spill] sm:$0xff] %v2647_v34  ;;  %5084 = vst [vmem:[#allocation35_spill] sm:$0xff] %v2651_v39  ;;  %v2663_v50 = vmul.f32 %v2273_v17, %v128_v31  ;;  %v175_v16 = vmul.f32 %v2272_v25, %v159_v33  ;;  %v594_v52 = vrot.slane %v2614_v2, 5  ;;  %v595_v53 = vrot.slane %v2588_v45, 5 }
  0x4d   :  { %5085 = vst [vmem:[#allocation36_spill] sm:$0xff] %v2653_v40  ;;  %447 = vrot.lane.b32.xlu1 %v2627_v18, %s2422_s1  ;;  %5086 = vst [vmem:[#allocation37_spill] sm:$0xff] %v2658_v48  ;;  %v867_v54 = vrot.slane %v2614_v2, 6  ;;  %v4794_v55 = vrot.slane %v2588_v45, 6  ;;  %v2671_v56 = vmul.f32 %v2269_v9, %v126_v41  ;;  %v2674_v57 = vmul.f32 %v2539_v11, %v174_v38 }
  0x4e   :  { %5087 = vst [vmem:[#allocation38_spill] sm:$0xff] %v2661_v49  ;;  %5088 = vst [vmem:[#allocation39_spill] sm:$0xff] %v2663_v50  ;;  %v2676_v61 = vmul.f32 %v2268_v14, %v125_v42  ;;  %v2678_v62 = vmul.f32 %v2272_v25, %v127_v47  ;;  %v2681_v63 = vmul.f32 %v2539_v11, %v173_v43  ;;  %v4795_v5 = vrot.slane %v2590_v46, 1 }
  0x4f   :  { %445 = vrot.lane.b32.xlu0 %v2636_v29, %s2422_s1  ;;  %5089 = vst [vmem:[#allocation40_spill] sm:$0xff] %v2671_v56  ;;  %5090 = vst [vmem:[#allocation41_spill] sm:$0xff] %v2674_v57  ;;  %v2684_v0 = vmul.f32 %v2612_v60, %v176_v44  ;;  %v4796_v6 = vrot.slane %v2590_v46, 2  ;;  %v2691_v7 = vmul.f32 %v2539_v11, %v175_v16  ;;  %v1140_v8 = vrot.slane %v2614_v2, 7 }
  0x50   :  { %5091 = vst [vmem:[#allocation42_spill] sm:$0xff] %v2676_v61  ;;  %5092 = vst [vmem:[#allocation43_spill] sm:$0xff] %v2678_v62  ;;  %v1141_v9 = vrot.slane %v2588_v45, 7  ;;  %v1654_v10 = vrot.slane %v2588_v45, 1  ;;  %v2700_v60 = vsel %vm609_vm9, %v594_v52, %v595_v53  ;;  %v2706_v12 = vsel %vm882_vm10, %v867_v54, %v4794_v55 }
  0x51   :  { %5093 = vst [vmem:[#allocation44_spill] sm:$0xff] %v2681_v63  ;;  %5094 = vst [vmem:[#allocation45_spill] sm:$0xff] %v2684_v0  ;;  %451 = vrot.lane.b32.xlu1 %v2643_v35, %s2422_s1  ;;  %v1927_v11 = vrot.slane %v2588_v45, 2  ;;  %v4797_v13 = vrot.slane %v2663_v50, 5  ;;  %v2712_v15 = vmul.f32 %v2700_v60, %v2550_v22  ;;  %v4798_v14 = vrot.slane %v2663_v50, 6 }
  0x52   :  { %5095 = vst [vmem:[#allocation46_spill] sm:$0xff] %v2691_v7  ;;  %5096 = vst [vmem:[#allocation47_spill] sm:$0xff] %v2700_v60  ;;  %v1653_v17 = vrot.slane %v2614_v2, 1  ;;  %v593_v19 = vrot.slane %v2602_v58, 5  ;;  %v1926_v20 = vrot.slane %v2614_v2, 2  ;;  %v866_v21 = vrot.slane %v2602_v58, 6 }
  0x53   :  { %449 = vrot.lane.b32.xlu0 %v2651_v39, %s2422_s1  ;;  %5097 = vst [vmem:[#allocation48_spill] sm:$0xff] %v2706_v12  ;;  %v4799_v23 = vrot.slane %v2602_v58, 1  ;;  %v4802_v24 = vrot.slane %v2602_v58, 2  ;;  %v2725_v25 = vsel %vm1155_vm11, %v1140_v8, %v1141_v9  ;;  %v2731_v31 = vsel %vm1668_vm12, %v1654_v10, %v4795_v5 }
  0x54   :  { %5098 = vst [vmem:[#allocation49_spill] sm:$0xff] %v2725_v25  ;;  %5099 = vst [vmem:[#allocation50_spill] sm:$0xff] %v2731_v31  ;;  %v1139_v38 = vrot.slane %v2602_v58, 7  ;;  %v2739_v41 = vmul.f32 %v2706_v12, %v2550_v22  ;;  %v2743_v42 = vmul.f32 %v2725_v25, %v2550_v22  ;;  %v1808_v43 = vmul.f32 %v2731_v31, %v2550_v22 }
  0x55   :  { %455 = vrot.lane.b32.xlu1 %v2658_v48, %s2422_s1  ;;  %v2751_v44 = vsel %vm1941_vm13, %v1927_v11, %v4796_v6  ;;  %v2757_v47 = vsel %vm609_vm9, %v4797_v13, %v593_v19  ;;  %v2768_v6 = vsel %vm882_vm10, %v4798_v14, %v866_v21  ;;  %v2774_v13 = vsel %vm1668_vm12, %v4799_v23, %v1653_v17 }
  0x56   :  { %5100 = vst [vmem:[#allocation51_spill] sm:$0xff] %v2751_v44  ;;  %5101 = vst [vmem:[#allocation52_spill] sm:$0xff] %v2757_v47  ;;  %v747_v33 = vmul.f32 %v2757_v47, %v2557_v28  ;;  %v2780_v5 = vsel %vm1941_vm13, %v4802_v24, %v1926_v20  ;;  %v1020_v55 = vmul.f32 %v2768_v6, %v2557_v28  ;;  %v5105_v14 = vrot.slane %v2663_v50, 7 }
  0x57   :  { %453 = vrot.lane.b32.xlu0 %v2661_v49, %s2422_s1  ;;  %5102 = vst [vmem:[#allocation53_spill] sm:$0xff] %v2768_v6  ;;  %5103 = vst [vmem:[#allocation54_spill] sm:$0xff] %v2774_v13  ;;  %v1806_v23 = vmul.f32 %v2774_v13, %v2557_v28  ;;  %v2079_v47 = vmul.f32 %v2780_v5, %v2557_v28  ;;  %v4825_v24 = vrot.slane %v2621_v1, 1  ;;  %v870_v60 = vrot.slane %v2621_v1, 6 }
  0x58   :  { %5104 = vst [vmem:[#allocation55_spill] sm:$0xff] %v2780_v5  ;;  %v2790_v16 = vsel %vm1155_vm11, %v5105_v14, %v1139_v38  ;;  %v2802_v6 = vsel %vm1668_vm12, %v1653_v17, %v1654_v10  ;;  %v2806_v14 = vsel %vm1941_vm13, %v1926_v20, %v1927_v11  ;;  %v2814_v25 = vsel %vm609_vm9, %v593_v19, %v594_v52 }
  0x59   :  { %459 = vrot.lane.b32.xlu1 %v2674_v57, %s2422_s1  ;;  %5106 = vst [vmem:[#allocation56_spill] sm:$0xff] %v2790_v16  ;;  %5107 = vst [vmem:[#allocation57_spill] sm:$0xff] %v2802_v6  ;;  %v1807_v13 = vmul.f32 %v2802_v6, %v2575_v37  ;;  %v2080_v5 = vmul.f32 %v2806_v14, %v2575_v37  ;;  %v2818_v31 = vsel %vm882_vm10, %v866_v21, %v867_v54 }
  0x5a   :  { %5108 = vst [vmem:[#allocation58_spill] sm:$0xff] %v2806_v14  ;;  %5109 = vst [vmem:[#allocation59_spill] sm:$0xff] %v2814_v25  ;;  %v5111_v10 = vrot.slane %v2590_v46, 5  ;;  %v748_v17 = vmul.f32 %v2814_v25, %v2575_v37  ;;  %v1021_v20 = vmul.f32 %v2818_v31, %v2575_v37  ;;  %v2832_v52 = vsel %vm1155_vm11, %v1139_v38, %v1140_v8 }
  0x5b   :  { %457 = vrot.lane.b32.xlu0 %v2681_v63, %s2422_s1  ;;  %5110 = vst [vmem:[#allocation60_spill] sm:$0xff] %v2818_v31  ;;  %5113 = vst [vmem:[#allocation62_spill] sm:$0xff] %v2832_v52  ;;  %v2081_v54 = vmul.f32 %v2751_v44, %v2550_v22  ;;  %v1294_v21 = vmul.f32 %v2832_v52, %v2575_v37  ;;  %v5114_v8 = vrot.slane %v2590_v46, 1  ;;  %v5117_v14 = vrot.slane %v2590_v46, 2 }
  0x5c   :  { %v2824_v11 = vsel %vm609_vm9, %v595_v53, %v5111_v10  ;;  %v1293_v53 = vmul.f32 %v2790_v16, %v2557_v28  ;;  %v5116_v10 = vrot.slane %v2621_v1, 2  ;;  %v5119_v52 = vrot.slane %v2590_v46, 6 }
  0x5d   :  { %5112 = vst [vmem:[#allocation61_spill] sm:$0xff] %v2824_v11  ;;  %463 = vrot.lane.b32.xlu1 %v2684_v0, %s2422_s1  ;;  %v750_v19 = vmul.f32 %v2824_v11, %v2567_v32  ;;  %v2852_v38 = vsel %vm1668_vm12, %v5114_v8, %v4825_v24  ;;  %v5120_v31 = vrot.slane %v2588_v45, 6  ;;  %v5122_v11 = vrot.slane %v2590_v46, 7 }
  0x5e   :  { %5115 = vst [vmem:[#allocation63_spill] sm:$0xff] %v2852_v38  ;;  %v2860_v6 = vsel %vm1941_vm13, %v5117_v14, %v5116_v10  ;;  %v1822_v24 = vadd.f32 %v1807_v13, %v1806_v23  ;;  %v2095_v16 = vadd.f32 %v2080_v5, %v2079_v47  ;;  %v597_v44 = vrot.slane %v2621_v1, 5 }
  0x5f   :  { %461 = vrot.lane.b32.xlu0 %v2691_v7, %s2422_s1  ;;  %5118 = vst [vmem:[#allocation64_spill] sm:$0xff] %v2860_v6  ;;  %v2868_v25 = vsel %vm882_vm10, %v5120_v31, %v5119_v52  ;;  %v2874_v8 = vsel %vm1155_vm11, %v1141_v9, %v5122_v11  ;;  %v4837_v14 = vrot.slane %v2616_v4, 5  ;;  %v763_v10 = vadd.f32 %v748_v17, %v747_v33 }
  0x60   :  { %5121 = vst [vmem:[#allocation65_spill] sm:$0xff] %v2868_v25  ;;  %5123 = vst [vmem:[#allocation66_spill] sm:$0xff] %v2874_v8  ;;  %v1036_v12 = vadd.f32 %v1021_v20, %v1020_v55  ;;  %v4836_v45 = vrot.slane %v2616_v4, 6  ;;  %v1809_v9 = vmul.f32 %v2852_v38, %v2567_v32  ;;  %v1023_v5 = vmul.f32 %v2868_v25, %v2567_v32 }
  0x61   :  { %467 = vrot.lane.b32.xlu1 %v2575_v37, %s2423_s17  ;;  %v1296_v13 = vmul.f32 %v2874_v8, %v2567_v32  ;;  %v1309_v23 = vadd.f32 %v1294_v21, %v1293_v53  ;;  %v1143_v55 = vrot.slane %v2621_v1, 7  ;;  %v1657_v33 = vrot.slane %v2616_v4, 1 }
  0x62   :  { %v2082_v11 = vmul.f32 %v2860_v6, %v2567_v32  ;;  %v1823_v17 = vadd.f32 %v1822_v24, %v1808_v43  ;;  %v2096_v20 = vadd.f32 %v2095_v16, %v2081_v54  ;;  %v2900_v52 = vsel %vm609_vm9, %v597_v44, %v4837_v14 }
  0x63   :  { %465 = vrot.lane.b32.xlu0 %v2557_v28, %s2423_s17  ;;  %5124 = vst [vmem:[#allocation67_spill] sm:$0xff] %v2900_v52  ;;  %v764_v53 = vadd.f32 %v763_v10, %v2712_v15  ;;  %v1037_v21 = vadd.f32 %v1036_v12, %v2739_v41  ;;  %v2908_v47 = vsel %vm882_vm10, %v870_v60, %v4836_v45  ;;  %v1930_v31 = vrot.slane %v2616_v4, 2 }
  0x64   :  { %5125 = vst [vmem:[#allocation68_spill] sm:$0xff] %v2908_v47  ;;  %v1310_v24 = vadd.f32 %v1309_v23, %v2743_v42  ;;  %v2916_v43 = vmul.f32 %v2900_v52, %v2596_v51  ;;  %v2920_v12 = vmul.f32 %v2908_v47, %v2596_v51  ;;  %v5126_v15 = vrot.slane %v2590_v46, 5 }
  0x65   :  { %471 = vrot.lane.b32.xlu1 %v2567_v32, %s2423_s17  ;;  %v5128_v16 = vrot.slane %v2616_v4, 7  ;;  %v5130_v54 = vrot.slane %v2633_v27, 1  ;;  %v1931_v23 = vrot.slane %v2633_v27, 2  ;;  %v5132_v45 = vrot.slane %v2590_v46, 6 }
  0x66   :  { %v2926_v41 = vsel %vm609_vm9, %v5126_v15, %v597_v44  ;;  %v5134_v14 = vrot.slane %v2590_v46, 7  ;;  %v5136_v47 = vrot.slane %v2621_v1, 1  ;;  %v599_v6 = vrot.slane %v2633_v27, 5 }
  0x67   :  { %5127 = vst [vmem:[#allocation69_spill] sm:$0xff] %v2926_v41  ;;  %469 = vrot.lane.b32.xlu0 %v2550_v22, %s2423_s17  ;;  %v2934_v42 = vsel %vm1155_vm11, %v1143_v55, %v5128_v16  ;;  %v2940_v10 = vsel %vm1668_vm12, %v1657_v33, %v5130_v54  ;;  %v751_v44 = vmul.f32 %v2926_v41, %v2607_v59  ;;  %v4863_v38 = vrot.slane %v2631_v26, 5 }
  0x68   :  { %5129 = vst [vmem:[#allocation70_spill] sm:$0xff] %v2934_v42  ;;  %5131 = vst [vmem:[#allocation71_spill] sm:$0xff] %v2940_v10  ;;  %v1298_v15 = vmul.f32 %v2934_v42, %v2596_v51  ;;  %v2951_v16 = vsel %vm882_vm10, %v5132_v45, %v870_v60  ;;  %v2957_v54 = vsel %vm1155_vm11, %v5134_v14, %v1143_v55  ;;  %v5138_v60 = vrot.slane %v2621_v1, 2 }
  0x69   :  { %5133 = vst [vmem:[#allocation72_spill] sm:$0xff] %v2951_v16  ;;  %5135 = vst [vmem:[#allocation73_spill] sm:$0xff] %v2957_v54  ;;  %v2963_v41 = vsel %vm1668_vm12, %v5136_v47, %v1657_v33  ;;  %v1024_v42 = vmul.f32 %v2951_v16, %v2607_v59  ;;  %v1297_v52 = vmul.f32 %v2957_v54, %v2607_v59  ;;  %475 = vrot.lane.b32.xlu1 %v2596_v51, %s2423_s17 }
  0x6a   :  { %5137 = vst [vmem:[#allocation74_spill] sm:$0xff] %v2963_v41  ;;  %v1810_v45 = vmul.f32 %v2963_v41, %v2607_v59  ;;  %v2975_v14 = vsel %vm1941_vm13, %v5138_v60, %v1930_v31  ;;  %v765_v33 = vadd.f32 %v764_v53, %v750_v19  ;;  %v1038_v47 = vadd.f32 %v1037_v21, %v1023_v5 }
  0x6b   :  { %5139 = vst [vmem:[#allocation75_spill] sm:$0xff] %v2975_v14  ;;  %v2083_v55 = vmul.f32 %v2975_v14, %v2607_v59  ;;  %v1311_v16 = vadd.f32 %v1310_v24, %v1296_v13  ;;  %473 = vrot.lane.b32.xlu0 %v2607_v59, %s2423_s17  ;;  %v1824_v54 = vadd.f32 %v1823_v17, %v1809_v9  ;;  %v872_v60 = vrot.slane %v2633_v27, 6 }
  0x6c   :  { %v2097_v41 = vadd.f32 %v2096_v20, %v2082_v11  ;;  %v4862_v8 = vrot.slane %v2631_v26, 6  ;;  %v1145_v25 = vrot.slane %v2633_v27, 7  ;;  %v1811_v19 = vmul.f32 %v2940_v10, %v2596_v51 }
  0x6d   :  { %v2993_v5 = vsel %vm1941_vm13, %v1930_v31, %v1931_v23  ;;  %v1659_v9 = vrot.slane %v2631_v26, 1  ;;  %479 = vrot.lane.b32.xlu1 %v2627_v18, %s2423_s17  ;;  %v766_v17 = vadd.f32 %v765_v33, %v751_v44  ;;  %v1039_v20 = vadd.f32 %v1038_v47, %v1024_v42 }
  0x6e   :  { %5140 = vst [vmem:[#allocation76_spill] sm:$0xff] %v2993_v5  ;;  %v2084_v11 = vmul.f32 %v2993_v5, %v2596_v51  ;;  %v1312_v53 = vadd.f32 %v1311_v16, %v1297_v52  ;;  %v1825_v21 = vadd.f32 %v1824_v54, %v1810_v45  ;;  %v2098_v24 = vadd.f32 %v2097_v41, %v2083_v55 }
  0x6f   :  { %477 = vrot.lane.b32.xlu0 %v2636_v29, %s2423_s17  ;;  %v3007_v31 = vsel %vm609_vm9, %v599_v6, %v4863_v38  ;;  %v1932_v13 = vrot.slane %v2631_v26, 2  ;;  %v3018_v52 = vsel %vm882_vm10, %v872_v60, %v4862_v8  ;;  %v5143_v41 = vrot.slane %v2631_v26, 7 }
  0x70   :  { %5141 = vst [vmem:[#allocation77_spill] sm:$0xff] %v3007_v31  ;;  %v3012_v14 = vmul.f32 %v3007_v31, %v2627_v18  ;;  %5142 = vst [vmem:[#allocation78_spill] sm:$0xff] %v3018_v52  ;;  %v1933_v44 = vrot.slane %v2645_v36, 2  ;;  %v3029_v16 = vmul.f32 %v3018_v52, %v2627_v18  ;;  %v5145_v45 = vrot.slane %v2645_v36, 1 }
  0x71   :  { %v3024_v42 = vsel %vm1155_vm11, %v1145_v25, %v5143_v41  ;;  %v5147_v33 = vrot.slane %v2616_v4, 5  ;;  %483 = vrot.lane.b32.xlu1 %v2643_v35, %s2423_s17  ;;  %v5149_v8 = vrot.slane %v2616_v4, 6  ;;  %v1313_v52 = vadd.f32 %v1312_v53, %v1298_v15 }
  0x72   :  { %5144 = vst [vmem:[#allocation79_spill] sm:$0xff] %v3024_v42  ;;  %v3033_v54 = vmul.f32 %v3024_v42, %v2627_v18  ;;  %v3039_v55 = vsel %vm1668_vm12, %v1659_v9, %v5145_v45  ;;  %v5151_v45 = vrot.slane %v2616_v4, 7  ;;  %v1826_v31 = vadd.f32 %v1825_v21, %v1811_v19 }
  0x73   :  { %5146 = vst [vmem:[#allocation80_spill] sm:$0xff] %v3039_v55  ;;  %v3045_v47 = vsel %vm609_vm9, %v5147_v33, %v599_v6  ;;  %v3055_v38 = vsel %vm882_vm10, %v5149_v8, %v872_v60  ;;  %v5153_v6 = vrot.slane %v2633_v27, 1  ;;  %481 = vrot.lane.b32.xlu0 %v2651_v39, %s2423_s17  ;;  %v601_v5 = vrot.slane %v2645_v36, 5 }
  0x74   :  { %5148 = vst [vmem:[#allocation81_spill] sm:$0xff] %v3045_v47  ;;  %v753_v41 = vmul.f32 %v3045_v47, %v2636_v29  ;;  %5150 = vst [vmem:[#allocation82_spill] sm:$0xff] %v3055_v38  ;;  %v3061_v42 = vsel %vm1155_vm11, %v5151_v45, %v1145_v25  ;;  %v1026_v47 = vmul.f32 %v3055_v38, %v2636_v29  ;;  %v1661_v19 = vrot.slane %v2638_v30, 1 }
  0x75   :  { %5152 = vst [vmem:[#allocation83_spill] sm:$0xff] %v3061_v42  ;;  %v3067_v33 = vsel %vm1668_vm12, %v5153_v6, %v1659_v9  ;;  %v1299_v8 = vmul.f32 %v3061_v42, %v2636_v29  ;;  %v3079_v25 = vsel %vm1941_vm13, %v1931_v23, %v1932_v13  ;;  %v767_v45 = vadd.f32 %v766_v17, %v2916_v43 }
  0x76   :  { %5154 = vst [vmem:[#allocation84_spill] sm:$0xff] %v3067_v33  ;;  %v1812_v60 = vmul.f32 %v3067_v33, %v2636_v29  ;;  %5155 = vst [vmem:[#allocation85_spill] sm:$0xff] %v3079_v25  ;;  %v2085_v9 = vmul.f32 %v3079_v25, %v2636_v29  ;;  %v1040_v6 = vadd.f32 %v1039_v20, %v2920_v12  ;;  %v4882_v42 = vrot.slane %v2638_v30, 5 }
  0x77   :  { %v2099_v38 = vadd.f32 %v2098_v24, %v2084_v11  ;;  %487 = vrot.lane.b32.xlu1 %v2658_v48, %s2423_s17  ;;  %v874_v23 = vrot.slane %v2645_v36, 6  ;;  %v1147_v25 = vrot.slane %v2645_v36, 7  ;;  %485 = vrot.lane.b32.xlu0 %v2661_v49, %s2423_s17  ;;  %v1813_v12 = vmul.f32 %v3039_v55, %v2627_v18 }
  0x78   :  { %v3099_v15 = vsel %vm1941_vm13, %v1932_v13, %v1933_v44  ;;  %v768_v20 = vadd.f32 %v767_v45, %v753_v41  ;;  %v1041_v53 = vadd.f32 %v1040_v6, %v1026_v47  ;;  %v1314_v21 = vadd.f32 %v1313_v52, %v1299_v8 }
  0x79   :  { %5156 = vst [vmem:[#allocation86_spill] sm:$0xff] %v3099_v15  ;;  %v2086_v17 = vmul.f32 %v3099_v15, %v2627_v18  ;;  %v1827_v24 = vadd.f32 %v1826_v31, %v1812_v60  ;;  %v2100_v43 = vadd.f32 %v2099_v38, %v2085_v9  ;;  %v3109_v33 = vsel %vm609_vm9, %v601_v5, %v4882_v42 }
  0x7a   :  { %5157 = vst [vmem:[#allocation87_spill] sm:$0xff] %v3109_v33  ;;  %v1934_v13 = vrot.slane %v2638_v30, 2  ;;  %v3116_v11 = vmul.f32 %v3109_v33, %v2643_v35  ;;  %v5158_v52 = vrot.slane %v2638_v30, 6  ;;  %v5160_v31 = vrot.slane %v2638_v30, 7 }
  0x7b   :  { %499 = vrot.lane.b32.xlu1 %v2575_v37, %s2424_s18  ;;  %v1935_v41 = vrot.slane %v2653_v40, 2  ;;  %497 = vrot.lane.b32.xlu0 %v2557_v28, %s2424_s18  ;;  %v5162_v9 = vrot.slane %v2653_v40, 1  ;;  %v5164_v6 = vrot.slane %v2631_v26, 5  ;;  %v5166_v42 = vrot.slane %v2631_v26, 6 }
  0x7c   :  { %v3122_v38 = vsel %vm882_vm10, %v874_v23, %v5158_v52  ;;  %v3128_v47 = vsel %vm1155_vm11, %v1147_v25, %v5160_v31  ;;  %v5170_v33 = vrot.slane %v2645_v36, 1  ;;  %v876_v15 = vrot.slane %v2653_v40, 6 }
  0x7d   :  { %5159 = vst [vmem:[#allocation88_spill] sm:$0xff] %v3122_v38  ;;  %5161 = vst [vmem:[#allocation89_spill] sm:$0xff] %v3128_v47  ;;  %v1029_v8 = vmul.f32 %v3122_v38, %v2643_v35  ;;  %v1302_v60 = vmul.f32 %v3128_v47, %v2643_v35  ;;  %v3141_v45 = vsel %vm1668_vm12, %v1661_v19, %v5162_v9  ;;  %v5168_v38 = vrot.slane %v2631_v26, 7 }
  0x7e   :  { %5163 = vst [vmem:[#allocation90_spill] sm:$0xff] %v3141_v45  ;;  %v3147_v52 = vsel %vm609_vm9, %v5164_v6, %v601_v5  ;;  %v3155_v47 = vsel %vm882_vm10, %v5166_v42, %v874_v23  ;;  %v3167_v5 = vsel %vm1668_vm12, %v5170_v33, %v1661_v19  ;;  %v3177_v23 = vsel %vm1941_vm13, %v1933_v44, %v1934_v13 }
  0x7f   :  { %5165 = vst [vmem:[#allocation91_spill] sm:$0xff] %v3147_v52  ;;  %v755_v31 = vmul.f32 %v3147_v52, %v2651_v39  ;;  %5167 = vst [vmem:[#allocation92_spill] sm:$0xff] %v3155_v47  ;;  %v3161_v9 = vsel %vm1155_vm11, %v5168_v38, %v1147_v25  ;;  %v1028_v6 = vmul.f32 %v3155_v47, %v2651_v39  ;;  %531 = vrot.lane.b32.xlu1 %v2575_v37, %s2425_s19 }
  0x80   :  { %5169 = vst [vmem:[#allocation93_spill] sm:$0xff] %v3161_v9  ;;  %5171 = vst [vmem:[#allocation94_spill] sm:$0xff] %v3167_v5  ;;  %v1301_v52 = vmul.f32 %v3161_v9, %v2651_v39  ;;  %v1814_v42 = vmul.f32 %v3167_v5, %v2651_v39  ;;  %v2087_v33 = vmul.f32 %v3177_v23, %v2651_v39  ;;  %529 = vrot.lane.b32.xlu0 %v2557_v28, %s2425_s19 }
  0x81   :  { %5172 = vst [vmem:[#allocation95_spill] sm:$0xff] %v3177_v23  ;;  %v769_v25 = vadd.f32 %v768_v20, %v3012_v14  ;;  %v1042_v19 = vadd.f32 %v1041_v53, %v3029_v16  ;;  %v1315_v38 = vadd.f32 %v1314_v21, %v3033_v54  ;;  %v1828_v5 = vadd.f32 %v1827_v24, %v1813_v12 }
  0x82   :  { %v2101_v9 = vadd.f32 %v2100_v43, %v2086_v17  ;;  %v603_v44 = vrot.slane %v2653_v40, 5  ;;  %v4903_v47 = vrot.slane %v2647_v34, 5  ;;  %v1149_v23 = vrot.slane %v2653_v40, 7 }
  0x83   :  { %v1815_v16 = vmul.f32 %v3141_v45, %v2643_v35  ;;  %v3198_v54 = vsel %vm1941_vm13, %v1934_v13, %v1935_v41  ;;  %v1663_v43 = vrot.slane %v2647_v34, 1  ;;  %563 = vrot.lane.b32.xlu1 %v2575_v37, %s2426_s20  ;;  %v770_v20 = vadd.f32 %v769_v25, %v755_v31 }
  0x84   :  { %5173 = vst [vmem:[#allocation96_spill] sm:$0xff] %v3198_v54  ;;  %v2088_v17 = vmul.f32 %v3198_v54, %v2643_v35  ;;  %v1936_v53 = vrot.slane %v2647_v34, 2  ;;  %561 = vrot.lane.b32.xlu0 %v2557_v28, %s2426_s20  ;;  %v1043_v24 = vadd.f32 %v1042_v19, %v1028_v6  ;;  %v1316_v13 = vadd.f32 %v1315_v38, %v1301_v52 }
  0x85   :  { %v1829_v14 = vadd.f32 %v1828_v5, %v1814_v42  ;;  %v3214_v12 = vsel %vm609_vm9, %v603_v44, %v4903_v47  ;;  %v2102_v55 = vadd.f32 %v2101_v9, %v2087_v33  ;;  %v5175_v25 = vrot.slane %v2647_v34, 6 }
  0x86   :  { %5174 = vst [vmem:[#allocation97_spill] sm:$0xff] %v3214_v12  ;;  %v758_v31 = vmul.f32 %v3214_v12, %v2658_v48  ;;  %v5177_v6 = vrot.slane %v2647_v34, 7  ;;  %v5179_v9 = vrot.slane %v2676_v61, 1  ;;  %v5181_v33 = vrot.slane %v2638_v30, 5 }
  0x87   :  { %v3222_v21 = vsel %vm882_vm10, %v876_v15, %v5175_v25  ;;  %v5183_v38 = vrot.slane %v2638_v30, 6  ;;  %533 = vrot.lane.b32.xlu1 %v2550_v22, %s2425_s19  ;;  %v605_v12 = vrot.slane %v2676_v61, 5  ;;  %v4922_v54 = vrot.slane %v2671_v56, 5 }
  0x88   :  { %5176 = vst [vmem:[#allocation98_spill] sm:$0xff] %v3222_v21  ;;  %v3228_v52 = vsel %vm1155_vm11, %v1149_v23, %v5177_v6  ;;  %v1031_v5 = vmul.f32 %v3222_v21, %v2658_v48  ;;  %v3236_v42 = vsel %vm1668_vm12, %v1663_v43, %v5179_v9  ;;  %v3242_v19 = vsel %vm609_vm9, %v5181_v33, %v603_v44 }
  0x89   :  { %5178 = vst [vmem:[#allocation99_spill] sm:$0xff] %v3228_v52  ;;  %5180 = vst [vmem:[#allocation100_spill] sm:$0xff] %v3236_v42  ;;  %v3248_v25 = vsel %vm882_vm10, %v5183_v38, %v876_v15  ;;  %v5185_v6 = vrot.slane %v2676_v61, 2  ;;  %v757_v47 = vmul.f32 %v3242_v19, %v2661_v49  ;;  %v5187_v33 = vrot.slane %v2638_v30, 7  ;;  %501 = vrot.lane.b32.xlu0 %v2550_v22, %s2424_s18 }
  0x8a   :  { %5182 = vst [vmem:[#allocation101_spill] sm:$0xff] %v3242_v19  ;;  %5184 = vst [vmem:[#allocation102_spill] sm:$0xff] %v3248_v25  ;;  %v1030_v44 = vmul.f32 %v3248_v25, %v2661_v49  ;;  %v3280_v25 = vsel %vm1941_vm13, %v1935_v41, %v1936_v53  ;;  %v771_v21 = vadd.f32 %v770_v20, %v3116_v11  ;;  %v878_v41 = vrot.slane %v2676_v61, 6 }
  0x8b   :  { %v3256_v9 = vsel %vm1941_vm13, %v1936_v53, %v5185_v6  ;;  %v3266_v15 = vsel %vm1155_vm11, %v5187_v33, %v1149_v23  ;;  %v5189_v6 = vrot.slane %v2653_v40, 1  ;;  %5191 = vst [vmem:[#allocation106_spill] sm:$0xff] %v3280_v25  ;;  %v1044_v23 = vadd.f32 %v1043_v24, %v1029_v8  ;;  %503 = vrot.lane.b32.xlu1 %v2567_v32, %s2424_s18 }
  0x8c   :  { %5186 = vst [vmem:[#allocation103_spill] sm:$0xff] %v3256_v9  ;;  %5188 = vst [vmem:[#allocation104_spill] sm:$0xff] %v3266_v15  ;;  %v1303_v38 = vmul.f32 %v3266_v15, %v2661_v49  ;;  %v1317_v33 = vadd.f32 %v1316_v13, %v1302_v60  ;;  %v2089_v45 = vmul.f32 %v3280_v25, %v2661_v49  ;;  %v1151_v8 = vrot.slane %v2676_v61, 7 }
  0x8d   :  { %v3276_v19 = vsel %vm1668_vm12, %v5189_v6, %v1663_v43  ;;  %v1830_v43 = vadd.f32 %v1829_v14, %v1815_v16  ;;  %v2103_v6 = vadd.f32 %v2102_v55, %v2088_v17  ;;  %565 = vrot.lane.b32.xlu0 %v2550_v22, %s2426_s20  ;;  %v1304_v20 = vmul.f32 %v3228_v52, %v2658_v48 }
  0x8e   :  { %5190 = vst [vmem:[#allocation105_spill] sm:$0xff] %v3276_v19  ;;  %v1816_v15 = vmul.f32 %v3276_v19, %v2661_v49  ;;  %v1817_v55 = vmul.f32 %v3236_v42, %v2658_v48  ;;  %v2090_v14 = vmul.f32 %v3256_v9, %v2658_v48  ;;  %v772_v16 = vadd.f32 %v771_v21, %v757_v47 }
  0x8f   :  { %v1045_v17 = vadd.f32 %v1044_v23, %v1030_v44  ;;  %v1318_v53 = vadd.f32 %v1317_v33, %v1303_v38  ;;  %v3307_v24 = vsel %vm609_vm9, %v605_v12, %v4922_v54  ;;  %v1665_v13 = vrot.slane %v2671_v56, 1  ;;  %567 = vrot.lane.b32.xlu1 %v2567_v32, %s2426_s20 }
  0x90   :  { %5192 = vst [vmem:[#allocation107_spill] sm:$0xff] %v3307_v24  ;;  %v1831_v60 = vadd.f32 %v1830_v43, %v1816_v15  ;;  %v2104_v11 = vadd.f32 %v2103_v6, %v2089_v45  ;;  %v3312_v25 = vmul.f32 %v3307_v24, %v2674_v57  ;;  %v1938_v19 = vrot.slane %v2671_v56, 2 }
  0x91   :  { %v5193_v47 = vrot.slane %v2671_v56, 6  ;;  %v5195_v44 = vrot.slane %v2671_v56, 7  ;;  %v1666_v15 = vrot.slane %v2678_v62, 1  ;;  %v1939_v38 = vrot.slane %v2678_v62, 2  ;;  %535 = vrot.lane.b32.xlu0 %v2567_v32, %s2425_s19 }
  0x92   :  { %v5197_v33 = vrot.slane %v2647_v34, 5  ;;  %v5199_v6 = vrot.slane %v2647_v34, 6  ;;  %v1832_v9 = vadd.f32 %v1831_v60, %v1817_v55  ;;  %v607_v42 = vrot.slane %v2678_v62, 5 }
  0x93   :  { %v3321_v21 = vsel %vm882_vm10, %v878_v41, %v5193_v47  ;;  %v3327_v45 = vsel %vm1155_vm11, %v1151_v8, %v5195_v44  ;;  %v5201_v44 = vrot.slane %v2647_v34, 7  ;;  %537 = vrot.lane.b32.xlu1 %v2607_v59, %s2425_s19  ;;  %v3390_v60 = vsel %vm1941_vm13, %v1938_v19, %v1939_v38 }
  0x94   :  { %5194 = vst [vmem:[#allocation108_spill] sm:$0xff] %v3321_v21  ;;  %5196 = vst [vmem:[#allocation109_spill] sm:$0xff] %v3327_v45  ;;  %v1033_v23 = vmul.f32 %v3321_v21, %v2674_v57  ;;  %v3339_v43 = vsel %vm609_vm9, %v5197_v33, %v605_v12  ;;  %v3345_v47 = vsel %vm882_vm10, %v5199_v6, %v878_v41  ;;  %v5203_v33 = vrot.slane %v2676_v61, 1 }
  0x95   :  { %5198 = vst [vmem:[#allocation110_spill] sm:$0xff] %v3339_v43  ;;  %5200 = vst [vmem:[#allocation111_spill] sm:$0xff] %v3345_v47  ;;  %v3351_v54 = vsel %vm1155_vm11, %v5201_v44, %v1151_v8  ;;  %v759_v21 = vmul.f32 %v3339_v43, %v2681_v63  ;;  %v1032_v24 = vmul.f32 %v3345_v47, %v2681_v63  ;;  %v5205_v8 = vrot.slane %v2676_v61, 2 }
  0x96   :  { %5202 = vst [vmem:[#allocation112_spill] sm:$0xff] %v3351_v54  ;;  %v1305_v12 = vmul.f32 %v3351_v54, %v2681_v63  ;;  %v3363_v41 = vsel %vm1668_vm12, %v5203_v33, %v1665_v13  ;;  %v773_v43 = vadd.f32 %v772_v16, %v758_v31  ;;  %v1046_v47 = vadd.f32 %v1045_v17, %v1031_v5 }
  0x97   :  { %5204 = vst [vmem:[#allocation113_spill] sm:$0xff] %v3363_v41  ;;  %v1818_v6 = vmul.f32 %v3363_v41, %v2681_v63  ;;  %v3371_v44 = vsel %vm1941_vm13, %v5205_v8, %v1938_v19  ;;  %v1319_v54 = vadd.f32 %v1318_v53, %v1304_v20  ;;  %v880_v33 = vrot.slane %v2678_v62, 6  ;;  %505 = vrot.lane.b32.xlu0 %v2607_v59, %s2424_s18 }
  0x98   :  { %5206 = vst [vmem:[#allocation114_spill] sm:$0xff] %v3371_v44  ;;  %v1306_v41 = vmul.f32 %v3327_v45, %v2674_v57  ;;  %v2091_v8 = vmul.f32 %v3371_v44, %v2681_v63  ;;  %v2105_v31 = vadd.f32 %v2104_v11, %v2090_v14  ;;  %v1153_v5 = vrot.slane %v2678_v62, 7  ;;  %5208 = vst [vmem:[#allocation116_spill] sm:$0xff] %v3390_v60 }
  0x99   :  { %v3386_v20 = vsel %vm1668_vm12, %v1665_v13, %v1666_v15  ;;  %v1667_v55 = vrot.slane %v2663_v50, 1  ;;  %v1940_v16 = vrot.slane %v2663_v50, 2  ;;  %v2092_v11 = vmul.f32 %v3390_v60, %v2674_v57  ;;  %507 = vrot.lane.b32.xlu1 %v2596_v51, %s2424_s18 }
  0x9a   :  { %5207 = vst [vmem:[#allocation115_spill] sm:$0xff] %v3386_v20  ;;  %v1819_v17 = vmul.f32 %v3386_v20, %v2674_v57  ;;  %v774_v14 = vadd.f32 %v773_v43, %v759_v21  ;;  %v1047_v53 = vadd.f32 %v1046_v47, %v1032_v24  ;;  %v1320_v13 = vadd.f32 %v1319_v54, %v1305_v12 }
  0x9b   :  { %v1833_v44 = vadd.f32 %v1832_v9, %v1818_v6  ;;  %v5209_v19 = vrot.slane %v2663_v50, 5  ;;  %v5211_v52 = vrot.slane %v2663_v50, 6  ;;  %569 = vrot.lane.b32.xlu0 %v2607_v59, %s2426_s20  ;;  %v2106_v24 = vadd.f32 %v2105_v31, %v2091_v8 }
  0x9c   :  { %v5213_v21 = vrot.slane %v2663_v50, 7  ;;  %v5215_v47 = vrot.slane %v2602_v58, 1  ;;  %v5217_v6 = vrot.slane %v2602_v58, 2  ;;  %v5219_v31 = vrot.slane %v2671_v56, 5 }
  0x9d   :  { %v3404_v45 = vsel %vm609_vm9, %v607_v42, %v5209_v19  ;;  %v3410_v20 = vsel %vm882_vm10, %v880_v33, %v5211_v52  ;;  %571 = vrot.lane.b32.xlu1 %v2596_v51, %s2426_s20  ;;  %v1321_v60 = vadd.f32 %v1320_v13, %v1306_v41  ;;  %v1536_v3 = vmul.f32 %v2567_v32, %v2590_v46  ;;  %v5242_v32 = vld [vmem:[#allocation63_spill] sm:$0xff] }
  0x9e   :  { %5210 = vst [vmem:[#allocation117_spill] sm:$0xff] %v3404_v45  ;;  %5212 = vst [vmem:[#allocation118_spill] sm:$0xff] %v3410_v20  ;;  %v762_v54 = vmul.f32 %v3404_v45, %v2684_v0  ;;  %v1035_v9 = vmul.f32 %v3410_v20, %v2684_v0  ;;  %v3422_v43 = vsel %vm1155_vm11, %v1153_v5, %v5213_v21 }
  0x9f   :  { %5214 = vst [vmem:[#allocation119_spill] sm:$0xff] %v3422_v43  ;;  %v1308_v52 = vmul.f32 %v3422_v43, %v2684_v0  ;;  %v3430_v12 = vsel %vm1668_vm12, %v1667_v55, %v5215_v47  ;;  %v3436_v8 = vsel %vm1941_vm13, %v1940_v16, %v5217_v6  ;;  %v3442_v19 = vsel %vm609_vm9, %v5219_v31, %v607_v42 }
  0xa0   :  { %5216 = vst [vmem:[#allocation120_spill] sm:$0xff] %v3430_v12  ;;  %5218 = vst [vmem:[#allocation121_spill] sm:$0xff] %v3436_v8  ;;  %v1821_v21 = vmul.f32 %v3430_v12, %v2684_v0  ;;  %v761_v43 = vmul.f32 %v3442_v19, %v2691_v7  ;;  %v5221_v47 = vrot.slane %v2671_v56, 6  ;;  %v5223_v6 = vrot.slane %v2671_v56, 7  ;;  %539 = vrot.lane.b32.xlu0 %v2596_v51, %s2425_s19 }
  0xa1   :  { %5220 = vst [vmem:[#allocation122_spill] sm:$0xff] %v3442_v19  ;;  %v2094_v42 = vmul.f32 %v3436_v8, %v2684_v0  ;;  %v3480_v8 = vsel %vm1941_vm13, %v1939_v38, %v1940_v16  ;;  %v1048_v12 = vadd.f32 %v1047_v53, %v1033_v23  ;;  %541 = vrot.lane.b32.xlu1 %v2636_v29, %s2425_s19 }
  0xa2   :  { %v3452_v20 = vsel %vm882_vm10, %v5221_v47, %v880_v33  ;;  %v3458_v45 = vsel %vm1155_vm11, %v5223_v6, %v1153_v5  ;;  %v1534_v33 = vmul.f32 %v2575_v37, %v2614_v2  ;;  %v5225_v5 = vld [vmem:[#allocation19_spill] sm:$0xff]  ;;  %v3476_v6 = vsel %vm1668_vm12, %v1666_v15, %v1667_v55  ;;  %5227 = vst [vmem:[#allocation126_spill] sm:$0xff] %v3480_v8 }
  0xa3   :  { %5222 = vst [vmem:[#allocation123_spill] sm:$0xff] %v3452_v20  ;;  %5224 = vst [vmem:[#allocation124_spill] sm:$0xff] %v3458_v45  ;;  %v1034_v31 = vmul.f32 %v3452_v20, %v2691_v7  ;;  %v1307_v19 = vmul.f32 %v3458_v45, %v2691_v7  ;;  %v1535_v47 = vmul.f32 %v2550_v22, %v5225_v5 }
  0xa4   :  { %5226 = vst [vmem:[#allocation125_spill] sm:$0xff] %v3476_v6  ;;  %v775_v20 = vadd.f32 %v774_v14, %v3312_v25  ;;  %v1820_v45 = vmul.f32 %v3476_v6, %v2691_v7  ;;  %v2093_v37 = vmul.f32 %v3480_v8, %v2691_v7  ;;  %v1533_v22 = vmul.f32 %v2557_v28, %v2602_v58 }
  0xa5   :  { %v1834_v15 = vadd.f32 %v1833_v44, %v1819_v17  ;;  %v2107_v55 = vadd.f32 %v2106_v24, %v2092_v11  ;;  %v1049_v25 = vadd.f32 %v1048_v12, %v1034_v31  ;;  %v1322_v38 = vadd.f32 %v1321_v60, %v1307_v19  ;;  %509 = vrot.lane.b32.xlu0 %v2636_v29, %s2424_s18 }
  0xa6   :  { %v776_v10 = vadd.f32 %v775_v20, %v761_v43  ;;  %v1549_v23 = vadd.f32 %v1534_v33, %v1533_v22  ;;  %v1537_v14 = vmul.f32 %v2607_v59, %v2621_v1  ;;  %511 = vrot.lane.b32.xlu1 %v2627_v18, %s2424_s18  ;;  %v1538_v60 = vmul.f32 %v2596_v51, %v2616_v4 }
  0xa7   :  { %v1835_v41 = vadd.f32 %v1834_v15, %v1820_v45  ;;  %v2108_v20 = vadd.f32 %v2107_v55, %v2093_v37  ;;  %v1050_v44 = vadd.f32 %v1049_v25, %v1035_v9  ;;  %v1323_v17 = vadd.f32 %v1322_v38, %v1308_v52 }
  0xa8   :  { %v777_v16 = vadd.f32 %v776_v10, %v762_v54  ;;  %v1550_v53 = vadd.f32 %v1549_v23, %v1535_v47  ;;  %v1539_v9 = vmul.f32 %v2636_v29, %v2633_v27  ;;  %v1540_v33 = vmul.f32 %v2627_v18, %v2631_v26 }
  0xa9   :  { %v1836_v13 = vadd.f32 %v1835_v41, %v1821_v21  ;;  %v2109_v24 = vadd.f32 %v2108_v20, %v2094_v42  ;;  %v1051_v43 = vrot.slane %v1050_v44, 4  ;;  %v1324_v10 = vrot.slane %v1323_v17, 4  ;;  %573 = vrot.lane.b32.xlu0 %v2636_v29, %s2426_s20 }
  0xaa   :  { %v778_v11 = vrot.slane %v777_v16, 4  ;;  %v1551_v37 = vadd.f32 %v1550_v53, %v1536_v3  ;;  %575 = vrot.lane.b32.xlu1 %v2627_v18, %s2426_s20  ;;  %v1542_v53 = vmul.f32 %v2643_v35, %v2638_v30 }
  0xab   :  { %v1837_v45 = vrot.slane %v1836_v13, 4  ;;  %v2110_v54 = vrot.slane %v2109_v24, 4  ;;  %v1052_v52 = vadd.f32 %v1051_v43, %v1050_v44  ;;  %v1325_v12 = vadd.f32 %v1324_v10, %v1323_v17  ;;  %v1292_v43 = vld [vmem:[%s4791_s3 + $0xf] sm:$0x1] }
  0xac   :  { %v779_v22 = vadd.f32 %v778_v11, %v777_v16  ;;  %v1552_v21 = vadd.f32 %v1551_v37, %v1537_v14  ;;  %v1541_v16 = vmul.f32 %v2651_v39, %v2645_v36  ;;  %v746_v11 = vld [vmem:[%s4791_s3 + $0x3] sm:$0x1] }
  0xad   :  { %v1838_v42 = vadd.f32 %v1837_v45, %v1836_v13  ;;  %v2111_v31 = vadd.f32 %v2110_v54, %v2109_v24  ;;  %v1053_v47 = vrot.slane %v1052_v52, 2  ;;  %v1326_v15 = vrot.slane %v1325_v12, 2  ;;  %543 = vrot.lane.b32.xlu0 %v2627_v18, %s2425_s19  ;;  %v5241_v18 = vld [vmem:[#allocation66_spill] sm:$0xff] }
  0xae   :  { %v780_v19 = vrot.slane %v779_v22, 2  ;;  %v1553_v3 = vadd.f32 %v1552_v21, %v1538_v60  ;;  %545 = vrot.lane.b32.xlu1 %v2651_v39, %s2425_s19  ;;  %v1019_v60 = vld [vmem:[%s4791_s3 + $0x9] sm:$0x1]  ;;  %v1543_v54 = vmul.f32 %v2661_v49, %v2653_v40 }
  0xaf   :  { %v1839_v25 = vrot.slane %v1838_v42, 2  ;;  %v2112_v38 = vrot.slane %v2111_v31, 2  ;;  %v1054_v23 = vadd.f32 %v1053_v47, %v1052_v52  ;;  %v1327_v41 = vadd.f32 %v1326_v15, %v1325_v12  ;;  %v2078_v52 = vld [vmem:[%s4791_s3 + $0x21] sm:$0x1] }
  0xb0   :  { %v781_v55 = vadd.f32 %v780_v19, %v779_v22  ;;  %v1554_v14 = vadd.f32 %v1553_v3, %v1539_v9  ;;  %v1805_v9 = vld [vmem:[%s4791_s3 + $0x1b] sm:$0x1] }
  0xb1   :  { %v1840_v44 = vadd.f32 %v1839_v25, %v1838_v42  ;;  %v2113_v17 = vadd.f32 %v2112_v38, %v2111_v31  ;;  %v1055_v13 = vrot.slane %v1054_v23, 1  ;;  %v1328_v24 = vrot.slane %v1327_v41, 1  ;;  %513 = vrot.lane.b32.xlu0 %v2651_v39, %s2424_s18 }
  0xb2   :  { %v782_v20 = vrot.slane %v781_v55, 1  ;;  %v1555_v22 = vadd.f32 %v1554_v14, %v1540_v33  ;;  %515 = vrot.lane.b32.xlu1 %v2643_v35, %s2424_s18  ;;  %v1544_v38 = vmul.f32 %v2658_v48, %v2647_v34 }
  0xb3   :  { %v1841_v37 = vrot.slane %v1840_v44, 1  ;;  %v2114_v45 = vrot.slane %v2113_v17, 1  ;;  %v1056_v12 = vadd.f32 %v1055_v13, %v1054_v23  ;;  %v1329_v19 = vadd.f32 %v1328_v24, %v1327_v41  ;;  %v438_v23 = vpop.permute.xlu1 %437  ;;  %v5230_v24 = vld [vmem:[#allocation48_spill] sm:$0xff] }
  0xb4   :  { %v783_v10 = vadd.f32 %v782_v20, %v781_v55  ;;  %v1556_v42 = vadd.f32 %v1555_v22, %v1541_v16  ;;  %v1545_v41 = vmul.f32 %v2681_v63, %v2676_v61  ;;  %v1415_v22 = vmul.f32 %v438_v23, %v5225_v5  ;;  %v5244_v5 = vld [vmem:[#allocation60_spill] sm:$0xff] }
  0xb5   :  { %v1842_v31 = vadd.f32 %v1841_v37, %v1840_v44  ;;  %v2115_v47 = vadd.f32 %v2114_v45, %v2113_v17  ;;  %v1057_v33 = vadd.f32 %v1056_v12, %v1019_v60  ;;  %v1330_v15 = vadd.f32 %v1329_v19, %v1292_v43  ;;  %577 = vrot.lane.b32.xlu0 %v2651_v39, %s2426_s20  ;;  %v434_v14 = vpop.permute.xlu0 %433  ;;  %v5231_v43 = vld [vmem:[#allocation49_spill] sm:$0xff]  ;;  %v5232_v37 = vld [vmem:[#allocation50_spill] sm:$0xff] }
  0xb6   :  { %v784_v21 = vadd.f32 %v783_v10, %v746_v11  ;;  %v1557_v55 = vadd.f32 %v1556_v42, %v1542_v53  ;;  %579 = vrot.lane.b32.xlu1 %v2643_v35, %s2426_s20  ;;  %v1546_v44 = vmul.f32 %v2674_v57, %v2671_v56  ;;  %v3567_v17 = vmul.f32 %v2691_v7, %v2678_v62  ;;  %v5229_v53 = vld [vmem:[#allocation47_spill] sm:$0xff]  ;;  %v5235_v19 = vld [vmem:[#allocation53_spill] sm:$0xff]  ;;  %v5236_v42 = vld [vmem:[#allocation56_spill] sm:$0xff] }
  0xb7   :  { %v1843_v3 = vadd.f32 %v1842_v31, %v1805_v9  ;;  %v2116_v25 = vadd.f32 %v2115_v47, %v2078_v52  ;;  %1058 = vst [vmem:[%s4791_s3 + $0x9] sm:$0x1] %v1057_v33  ;;  %1331 = vst [vmem:[%s4791_s3 + $0xf] sm:$0x1] %v1330_v15  ;;  %v3571_v11 = vmul.f32 %v2684_v0, %v2663_v50  ;;  %v5234_v52 = vld [vmem:[#allocation52_spill] sm:$0xff]  ;;  %v5237_v33 = vld [vmem:[#allocation54_spill] sm:$0xff] }
  0xb8   :  { %785 = vst [vmem:[%s4791_s3 + $0x3] sm:$0x1] %v784_v21  ;;  %v1558_v16 = vadd.f32 %v1557_v55, %v1543_v54  ;;  %v629_v13 = vmul.f32 %v5229_v53, %v438_v23  ;;  %v902_v60 = vmul.f32 %v5230_v24, %v438_v23  ;;  %v1175_v10 = vmul.f32 %v5231_v43, %v438_v23  ;;  %v5233_v54 = vld [vmem:[#allocation51_spill] sm:$0xff]  ;;  %v440_v55 = vpop.permute.xlu1 %439  ;;  %v5246_v24 = vld [vmem:[#allocation57_spill] sm:$0xff] }
  0xb9   :  { %1844 = vst [vmem:[%s4791_s3 + $0x1b] sm:$0x1] %v1843_v3  ;;  %2117 = vst [vmem:[%s4791_s3 + $0x21] sm:$0x1] %v2116_v25  ;;  %547 = vrot.lane.b32.xlu0 %v2643_v35, %s2425_s19  ;;  %v1688_v45 = vmul.f32 %v5232_v37, %v438_v23  ;;  %v1961_v9 = vmul.f32 %v5233_v54, %v438_v23  ;;  %v627_v12 = vmul.f32 %v5234_v52, %v434_v14  ;;  %v5238_v25 = vld [vmem:[#allocation55_spill] sm:$0xff]  ;;  %v5240_v23 = vld [vmem:[#allocation65_spill] sm:$0xff]  ;;  %v436_v51 = vpop.permute.xlu0 %435 }
  0xba   :  { %v1559_v20 = vadd.f32 %v1558_v16, %v1544_v38  ;;  %5228 = vst [vmem:[#allocation127_spill] sm:$0xff] %v3571_v11  ;;  %549 = vrot.lane.b32.xlu1 %v2661_v49, %s2425_s19  ;;  %v900_v21 = vmul.f32 %v5235_v19, %v434_v14  ;;  %v1173_v31 = vmul.f32 %v5236_v42, %v434_v14  ;;  %v5239_v16 = vld [vmem:[#allocation61_spill] sm:$0xff]  ;;  %v5243_v54 = vld [vmem:[#allocation59_spill] sm:$0xff]  ;;  %v5250_v11 = vld [vmem:[#allocation68_spill] sm:$0xff] }
  0xbb   :  { %v1413_v47 = vmul.f32 %v434_v14, %v2602_v58  ;;  %v1686_v15 = vmul.f32 %v5237_v33, %v434_v14  ;;  %v1959_v38 = vmul.f32 %v5238_v25, %v434_v14  ;;  %v630_v35 = vmul.f32 %v5239_v16, %v440_v55 }
  0xbc   :  { %v1560_v3 = vadd.f32 %v1559_v20, %v1545_v41  ;;  %v903_v39 = vmul.f32 %v5240_v23, %v440_v55  ;;  %v1176_v29 = vmul.f32 %v5241_v18, %v440_v55  ;;  %v1416_v59 = vmul.f32 %v440_v55, %v2590_v46  ;;  %v5245_v41 = vld [vmem:[#allocation62_spill] sm:$0xff]  ;;  %v5248_v46 = vld [vmem:[#allocation64_spill] sm:$0xff]  ;;  %v444_v33 = vpop.permute.xlu1 %443 }
  0xbd   :  { %517 = vrot.lane.b32.xlu0 %v2661_v49, %s2424_s18  ;;  %v1689_v28 = vmul.f32 %v5242_v32, %v440_v55  ;;  %v628_v37 = vmul.f32 %v5243_v54, %v436_v51  ;;  %v901_v43 = vmul.f32 %v5244_v5, %v436_v51  ;;  %v1174_v20 = vmul.f32 %v5245_v41, %v436_v51  ;;  %v5247_v23 = vld [vmem:[#allocation58_spill] sm:$0xff]  ;;  %v5249_v54 = vld [vmem:[#allocation67_spill] sm:$0xff] }
  0xbe   :  { %519 = vrot.lane.b32.xlu1 %v2658_v48, %s2424_s18  ;;  %v1414_v14 = vmul.f32 %v436_v51, %v2614_v2  ;;  %v1687_v53 = vmul.f32 %v5246_v24, %v436_v51  ;;  %v1960_v18 = vmul.f32 %v5247_v23, %v436_v51  ;;  %v1962_v32 = vmul.f32 %v5248_v46, %v440_v55  ;;  %v442_v23 = vpop.permute.xlu0 %441 }
  0xbf   :  { %v643_v16 = vadd.f32 %v628_v37, %v627_v12  ;;  %v916_v25 = vadd.f32 %v901_v43, %v900_v21  ;;  %v3605_v58 = vadd.f32 %v1560_v3, %v1546_v44  ;;  %v1189_v42 = vadd.f32 %v1174_v20, %v1173_v31  ;;  %v5251_v44 = vld [vmem:[#allocation70_spill] sm:$0xff]  ;;  %v5253_v21 = vld [vmem:[#allocation76_spill] sm:$0xff] }
  0xc0   :  { %v1429_v19 = vadd.f32 %v1414_v14, %v1413_v47  ;;  %v1702_v52 = vadd.f32 %v1687_v53, %v1686_v15  ;;  %v1975_v41 = vadd.f32 %v1960_v18, %v1959_v38  ;;  %v632_v24 = vmul.f32 %v5249_v54, %v444_v33  ;;  %v5254_v47 = vld [vmem:[#allocation69_spill] sm:$0xff]  ;;  %v5257_v20 = vld [vmem:[#allocation74_spill] sm:$0xff] }
  0xc1   :  { %581 = vrot.lane.b32.xlu0 %v2661_v49, %s2426_s20  ;;  %v644_v5 = vadd.f32 %v643_v16, %v629_v13  ;;  %v917_v2 = vadd.f32 %v916_v25, %v902_v60  ;;  %v905_v51 = vmul.f32 %v5250_v11, %v444_v33  ;;  %v1190_v55 = vadd.f32 %v1189_v42, %v1175_v10  ;;  %v5252_v13 = vld [vmem:[#allocation71_spill] sm:$0xff]  ;;  %v5255_v25 = vld [vmem:[#allocation72_spill] sm:$0xff]  ;;  %v448_v42 = vpop.permute.xlu1 %447  ;;  %v5260_v49 = vld [vmem:[#allocation78_spill] sm:$0xff] }
  0xc2   :  { %583 = vrot.lane.b32.xlu1 %v2658_v48, %s2426_s20  ;;  %v1430_v37 = vadd.f32 %v1429_v19, %v1415_v22  ;;  %v1703_v43 = vadd.f32 %v1702_v52, %v1688_v45  ;;  %v1976_v12 = vadd.f32 %v1975_v41, %v1961_v9  ;;  %v1178_v53 = vmul.f32 %v5251_v44, %v444_v33  ;;  %v5256_v22 = vld [vmem:[#allocation73_spill] sm:$0xff] }
  0xc3   :  { %v1418_v18 = vmul.f32 %v444_v33, %v2616_v4  ;;  %v1691_v60 = vmul.f32 %v5252_v13, %v444_v33  ;;  %v1964_v31 = vmul.f32 %v5253_v21, %v444_v33  ;;  %v631_v15 = vmul.f32 %v5254_v47, %v442_v23 }
  0xc4   :  { %v645_v3 = vadd.f32 %v644_v5, %v630_v35  ;;  %v904_v38 = vmul.f32 %v5255_v25, %v442_v23  ;;  %v918_v10 = vadd.f32 %v917_v2, %v903_v39  ;;  %v1177_v45 = vmul.f32 %v5256_v22, %v442_v23  ;;  %v5258_v39 = vld [vmem:[#allocation75_spill] sm:$0xff] }
  0xc5   :  { %551 = vrot.lane.b32.xlu0 %v2658_v48, %s2425_s19  ;;  %v1191_v9 = vadd.f32 %v1190_v55, %v1176_v29  ;;  %v1417_v52 = vmul.f32 %v442_v23, %v2621_v1  ;;  %v1431_v19 = vadd.f32 %v1430_v37, %v1416_v59  ;;  %v1690_v33 = vmul.f32 %v5257_v20, %v442_v23  ;;  %v446_v55 = vpop.permute.xlu0 %445  ;;  %v5259_v59 = vld [vmem:[#allocation77_spill] sm:$0xff]  ;;  %v5261_v22 = vld [vmem:[#allocation79_spill] sm:$0xff] }
  0xc6   :  { %521 = vrot.lane.b32.xlu1 %v2681_v63, %s2424_s18  ;;  %v646_v16 = vadd.f32 %v645_v3, %v631_v15  ;;  %v919_v41 = vadd.f32 %v918_v10, %v904_v38  ;;  %v1704_v14 = vadd.f32 %v1703_v43, %v1689_v28  ;;  %v1963_v5 = vmul.f32 %v5258_v39, %v442_v23  ;;  %v5262_v28 = vld [vmem:[#allocation80_spill] sm:$0xff]  ;;  %v5263_v10 = vld [vmem:[#allocation86_spill] sm:$0xff]  ;;  %v5264_v23 = vld [vmem:[#allocation81_spill] sm:$0xff] }
  0xc7   :  { %v1192_v35 = vadd.f32 %v1191_v9, %v1177_v45  ;;  %v1432_v2 = vadd.f32 %v1431_v19, %v1417_v52  ;;  %v1977_v29 = vadd.f32 %v1976_v12, %v1962_v32  ;;  %v634_v37 = vmul.f32 %v5259_v59, %v448_v42  ;;  %v5265_v45 = vld [vmem:[#allocation82_spill] sm:$0xff]  ;;  %v5266_v19 = vld [vmem:[#allocation83_spill] sm:$0xff] }
  0xc8   :  { %v1705_v48 = vadd.f32 %v1704_v14, %v1690_v33  ;;  %v907_v1 = vmul.f32 %v5260_v49, %v448_v42  ;;  %v1180_v15 = vmul.f32 %v5261_v22, %v448_v42  ;;  %v1420_v38 = vmul.f32 %v448_v42, %v2631_v26  ;;  %v5267_v26 = vld [vmem:[#allocation84_spill] sm:$0xff] }
  0xc9   :  { %489 = vrot.lane.b32.xlu0 %v2681_v63, %s2423_s17  ;;  %v1978_v3 = vadd.f32 %v1977_v29, %v1963_v5  ;;  %v1693_v43 = vmul.f32 %v5262_v28, %v448_v42  ;;  %v1966_v20 = vmul.f32 %v5263_v10, %v448_v42  ;;  %v633_v32 = vmul.f32 %v5264_v23, %v446_v55  ;;  %v452_v28 = vpop.permute.xlu1 %451 }
  0xca   :  { %585 = vrot.lane.b32.xlu1 %v2681_v63, %s2426_s20  ;;  %v647_v12 = vadd.f32 %v646_v16, %v632_v24  ;;  %v906_v9 = vmul.f32 %v5265_v45, %v446_v55  ;;  %v920_v52 = vadd.f32 %v919_v41, %v905_v51  ;;  %v1179_v33 = vmul.f32 %v5266_v19, %v446_v55  ;;  %v5268_v16 = vld [vmem:[#allocation85_spill] sm:$0xff]  ;;  %v450_v41 = vpop.permute.xlu0 %449 }
  0xcb   :  { %v1193_v14 = vadd.f32 %v1192_v35, %v1178_v53  ;;  %v1419_v5 = vmul.f32 %v446_v55, %v2633_v27  ;;  %v1433_v29 = vadd.f32 %v1432_v2, %v1418_v18  ;;  %v1692_v22 = vmul.f32 %v5267_v26, %v446_v55  ;;  %v5269_v53 = vld [vmem:[#allocation87_spill] sm:$0xff]  ;;  %v5270_v27 = vld [vmem:[#allocation88_spill] sm:$0xff]  ;;  %v5271_v2 = vld [vmem:[#allocation89_spill] sm:$0xff] }
  0xcc   :  { %v648_v42 = vadd.f32 %v647_v12, %v633_v32  ;;  %v921_v10 = vadd.f32 %v920_v52, %v906_v9  ;;  %v1706_v49 = vadd.f32 %v1705_v48, %v1691_v60  ;;  %v1965_v45 = vmul.f32 %v5268_v16, %v446_v55  ;;  %v5272_v12 = vld [vmem:[#allocation90_spill] sm:$0xff]  ;;  %v5274_v9 = vld [vmem:[#allocation91_spill] sm:$0xff] }
  0xcd   :  { %553 = vrot.lane.b32.xlu0 %v2681_v63, %s2425_s19  ;;  %v1194_v23 = vadd.f32 %v1193_v14, %v1179_v33  ;;  %v1434_v24 = vadd.f32 %v1433_v29, %v1419_v5  ;;  %v1979_v51 = vadd.f32 %v1978_v3, %v1964_v31  ;;  %v636_v35 = vmul.f32 %v5269_v53, %v452_v28  ;;  %v5273_v31 = vld [vmem:[#allocation96_spill] sm:$0xff]  ;;  %v5276_v5 = vld [vmem:[#allocation93_spill] sm:$0xff]  ;;  %v456_v16 = vpop.permute.xlu1 %455 }
  0xce   :  { %523 = vrot.lane.b32.xlu1 %v2674_v57, %s2424_s18  ;;  %v1707_v63 = vadd.f32 %v1706_v49, %v1692_v22  ;;  %v909_v18 = vmul.f32 %v5270_v27, %v452_v28  ;;  %v1182_v32 = vmul.f32 %v5271_v2, %v452_v28  ;;  %v1422_v60 = vmul.f32 %v452_v28, %v2638_v30  ;;  %v5275_v49 = vld [vmem:[#allocation92_spill] sm:$0xff] }
  0xcf   :  { %v1980_v48 = vadd.f32 %v1979_v51, %v1965_v45  ;;  %v1695_v55 = vmul.f32 %v5272_v12, %v452_v28  ;;  %v1968_v3 = vmul.f32 %v5273_v31, %v452_v28  ;;  %v635_v52 = vmul.f32 %v5274_v9, %v450_v41  ;;  %v5277_v12 = vld [vmem:[#allocation94_spill] sm:$0xff]  ;;  %v5281_v9 = vld [vmem:[#allocation99_spill] sm:$0xff] }
  0xd0   :  { %v649_v33 = vadd.f32 %v648_v42, %v634_v37  ;;  %v908_v22 = vmul.f32 %v5275_v49, %v450_v41  ;;  %v922_v14 = vadd.f32 %v921_v10, %v907_v1  ;;  %v1181_v29 = vmul.f32 %v5276_v5, %v450_v41  ;;  %v5278_v10 = vld [vmem:[#allocation95_spill] sm:$0xff]  ;;  %v5280_v5 = vld [vmem:[#allocation98_spill] sm:$0xff] }
  0xd1   :  { %491 = vrot.lane.b32.xlu0 %v2674_v57, %s2423_s17  ;;  %v1195_v27 = vadd.f32 %v1194_v23, %v1180_v15  ;;  %v1421_v2 = vmul.f32 %v450_v41, %v2645_v36  ;;  %v1435_v53 = vadd.f32 %v1434_v24, %v1420_v38  ;;  %v1694_v28 = vmul.f32 %v5277_v12, %v450_v41  ;;  %v454_v23 = vpop.permute.xlu0 %453  ;;  %v5279_v38 = vld [vmem:[#allocation97_spill] sm:$0xff] }
  0xd2   :  { %587 = vrot.lane.b32.xlu1 %v2674_v57, %s2426_s20  ;;  %v650_v45 = vadd.f32 %v649_v33, %v635_v52  ;;  %v923_v51 = vadd.f32 %v922_v14, %v908_v22  ;;  %v1708_v31 = vadd.f32 %v1707_v63, %v1693_v43  ;;  %v1967_v42 = vmul.f32 %v5278_v10, %v450_v41  ;;  %v5282_v63 = vld [vmem:[#allocation100_spill] sm:$0xff]  ;;  %v5283_v14 = vld [vmem:[#allocation103_spill] sm:$0xff] }
  0xd3   :  { %v1196_v37 = vadd.f32 %v1195_v27, %v1181_v29  ;;  %v1436_v1 = vadd.f32 %v1435_v53, %v1421_v2  ;;  %v1981_v15 = vadd.f32 %v1980_v48, %v1966_v20  ;;  %v638_v24 = vmul.f32 %v5279_v38, %v456_v16  ;;  %v5284_v27 = vld [vmem:[#allocation101_spill] sm:$0xff]  ;;  %v5285_v53 = vld [vmem:[#allocation102_spill] sm:$0xff] }
  0xd4   :  { %v1709_v36 = vadd.f32 %v1708_v31, %v1694_v28  ;;  %v911_v49 = vmul.f32 %v5280_v5, %v456_v16  ;;  %v1184_v52 = vmul.f32 %v5281_v9, %v456_v16  ;;  %v1424_v22 = vmul.f32 %v456_v16, %v2647_v34  ;;  %v5286_v31 = vld [vmem:[#allocation104_spill] sm:$0xff]  ;;  %v5287_v34 = vld [vmem:[#allocation105_spill] sm:$0xff] }
  0xd5   :  { %555 = vrot.lane.b32.xlu0 %v2674_v57, %s2425_s19  ;;  %v1982_v33 = vadd.f32 %v1981_v15, %v1967_v42  ;;  %v1697_v43 = vmul.f32 %v5282_v63, %v456_v16  ;;  %v1970_v57 = vmul.f32 %v5283_v14, %v456_v16  ;;  %v637_v20 = vmul.f32 %v5284_v27, %v454_v23  ;;  %v460_v63 = vpop.permute.xlu1 %459 }
  0xd6   :  { %525 = vrot.lane.b32.xlu1 %v2691_v7, %s2424_s18  ;;  %v651_v41 = vadd.f32 %v650_v45, %v636_v35  ;;  %v910_v2 = vmul.f32 %v5285_v53, %v454_v23  ;;  %v924_v48 = vadd.f32 %v923_v51, %v909_v18  ;;  %v1183_v29 = vmul.f32 %v5286_v31, %v454_v23  ;;  %v5288_v45 = vld [vmem:[#allocation106_spill] sm:$0xff]  ;;  %v458_v51 = vpop.permute.xlu0 %457 }
  0xd7   :  { %v1197_v28 = vadd.f32 %v1196_v37, %v1182_v32  ;;  %v1423_v42 = vmul.f32 %v454_v23, %v2653_v40  ;;  %v1437_v15 = vadd.f32 %v1436_v1, %v1422_v60  ;;  %v1696_v9 = vmul.f32 %v5287_v34, %v454_v23  ;;  %v5289_v32 = vld [vmem:[#allocation107_spill] sm:$0xff]  ;;  %v5290_v40 = vld [vmem:[#allocation108_spill] sm:$0xff]  ;;  %v5291_v1 = vld [vmem:[#allocation109_spill] sm:$0xff] }
  0xd8   :  { %v652_v16 = vadd.f32 %v651_v41, %v637_v20  ;;  %v925_v14 = vadd.f32 %v924_v48, %v910_v2  ;;  %v1710_v5 = vadd.f32 %v1709_v36, %v1695_v55  ;;  %v1969_v53 = vmul.f32 %v5288_v45, %v454_v23  ;;  %v5292_v41 = vld [vmem:[#allocation115_spill] sm:$0xff]  ;;  %v5294_v2 = vld [vmem:[#allocation110_spill] sm:$0xff] }
  0xd9   :  { %493 = vrot.lane.b32.xlu0 %v2691_v7, %s2423_s17  ;;  %v1198_v27 = vadd.f32 %v1197_v28, %v1183_v29  ;;  %v1438_v35 = vadd.f32 %v1437_v15, %v1423_v42  ;;  %v1983_v18 = vadd.f32 %v1982_v33, %v1968_v3  ;;  %v640_v37 = vmul.f32 %v5289_v32, %v460_v63  ;;  %v5293_v3 = vld [vmem:[#allocation116_spill] sm:$0xff] }
  0xda   :  { %589 = vrot.lane.b32.xlu1 %v2691_v7, %s2426_s20  ;;  %v1711_v31 = vadd.f32 %v1710_v5, %v1696_v9  ;;  %v913_v60 = vmul.f32 %v5290_v40, %v460_v63  ;;  %v1186_v20 = vmul.f32 %v5291_v1, %v460_v63  ;;  %v1426_v55 = vmul.f32 %v460_v63, %v2671_v56  ;;  %v5295_v9 = vld [vmem:[#allocation111_spill] sm:$0xff]  ;;  %v5296_v42 = vld [vmem:[#allocation112_spill] sm:$0xff] }
  0xdb   :  { %v1984_v36 = vadd.f32 %v1983_v18, %v1969_v53  ;;  %v1699_v23 = vmul.f32 %v5292_v41, %v460_v63  ;;  %v1972_v33 = vmul.f32 %v5293_v3, %v460_v63  ;;  %v639_v48 = vmul.f32 %v5294_v2, %v458_v51  ;;  %v5297_v41 = vld [vmem:[#allocation113_spill] sm:$0xff] }
  0xdc   :  { %v653_v29 = vadd.f32 %v652_v16, %v638_v24  ;;  %v912_v5 = vmul.f32 %v5295_v9, %v458_v51  ;;  %v926_v28 = vadd.f32 %v925_v14, %v911_v49  ;;  %v1185_v15 = vmul.f32 %v5296_v42, %v458_v51  ;;  %v5298_v14 = vld [vmem:[#allocation114_spill] sm:$0xff]  ;;  %v5301_v9 = vld [vmem:[#allocation119_spill] sm:$0xff] }
  0xdd   :  { %557 = vrot.lane.b32.xlu0 %v2691_v7, %s2425_s19  ;;  %v1199_v40 = vadd.f32 %v1198_v27, %v1184_v52  ;;  %v1425_v1 = vmul.f32 %v458_v51, %v2676_v61  ;;  %v1439_v32 = vadd.f32 %v1438_v35, %v1424_v22  ;;  %v464_v7 = vpop.permute.xlu1 %463  ;;  %v1698_v63 = vmul.f32 %v5297_v41, %v458_v51  ;;  %v462_v27 = vpop.permute.xlu0 %461  ;;  %v5299_v22 = vld [vmem:[#allocation117_spill] sm:$0xff]  ;;  %v5300_v61 = vld [vmem:[#allocation118_spill] sm:$0xff] }
  0xde   :  { %527 = vrot.lane.b32.xlu1 %v2684_v0, %s2424_s18  ;;  %v654_v53 = vadd.f32 %v653_v29, %v639_v48  ;;  %v927_v18 = vadd.f32 %v926_v28, %v912_v5  ;;  %v1712_v3 = vadd.f32 %v1711_v31, %v1697_v43  ;;  %v1971_v16 = vmul.f32 %v5298_v14, %v458_v51  ;;  %v5302_v43 = vld [vmem:[#allocation120_spill] sm:$0xff]  ;;  %v5303_v28 = vld [vmem:[#allocation121_spill] sm:$0xff] }
  0xdf   :  { %v1200_v24 = vadd.f32 %v1199_v40, %v1185_v15  ;;  %v1440_v49 = vadd.f32 %v1439_v32, %v1425_v1  ;;  %v1985_v52 = vadd.f32 %v1984_v36, %v1970_v57  ;;  %v642_v35 = vmul.f32 %v5299_v22, %v464_v7  ;;  %v5304_v40 = vld [vmem:[#allocation122_spill] sm:$0xff]  ;;  %v5305_v32 = vld [vmem:[#allocation123_spill] sm:$0xff]  ;;  %v5314_v14 = vld [vmem:[#allocation52_spill] sm:$0xff] }
  0xe0   :  { %v1713_v56 = vadd.f32 %v1712_v3, %v1698_v63  ;;  %v915_v42 = vmul.f32 %v5300_v61, %v464_v7  ;;  %v1188_v48 = vmul.f32 %v5301_v9, %v464_v7  ;;  %v1428_v5 = vmul.f32 %v464_v7, %v2663_v50  ;;  %v5306_v3 = vld [vmem:[#allocation124_spill] sm:$0xff]  ;;  %v5307_v22 = vld [vmem:[#allocation127_spill] sm:$0xff] }
  0xe1   :  { %495 = vrot.lane.b32.xlu0 %v2684_v0, %s2423_s17  ;;  %v1986_v29 = vadd.f32 %v1985_v52, %v1971_v16  ;;  %v1701_v31 = vmul.f32 %v5302_v43, %v464_v7  ;;  %v1974_v41 = vmul.f32 %v5303_v28, %v464_v7  ;;  %v641_v57 = vmul.f32 %v5304_v40, %v462_v27 }
  0xe2   :  { %591 = vrot.lane.b32.xlu1 %v2684_v0, %s2426_s20  ;;  %v655_v51 = vadd.f32 %v654_v53, %v640_v37  ;;  %v914_v1 = vmul.f32 %v5305_v32, %v462_v27  ;;  %v928_v36 = vadd.f32 %v927_v18, %v913_v60  ;;  %v1187_v15 = vmul.f32 %v5306_v3, %v462_v27  ;;  %v468_v37 = vpop.permute.xlu1 %467 }
  0xe3   :  { %v1201_v63 = vadd.f32 %v1200_v24, %v1186_v20  ;;  %v1427_v16 = vmul.f32 %v462_v27, %v2678_v62  ;;  %v1441_v52 = vadd.f32 %v1440_v49, %v1426_v55  ;;  %v1562_v28 = vadd.f32 %v3605_v58, %v3567_v17 }
  0xe4   :  { %v656_v43 = vadd.f32 %v655_v51, %v641_v57  ;;  %v929_v7 = vadd.f32 %v928_v36, %v914_v1  ;;  %v1700_v50 = vmul.f32 %v3476_v6, %v462_v27  ;;  %v1714_v60 = vadd.f32 %v1713_v56, %v1699_v23  ;;  %v5308_v57 = vld [vmem:[#allocation59_spill] sm:$0xff]  ;;  %v5309_v23 = vld [vmem:[#allocation60_spill] sm:$0xff] }
  0xe5   :  { %559 = vrot.lane.b32.xlu0 %v2684_v0, %s2425_s19  ;;  %v1202_v53 = vadd.f32 %v1201_v63, %v1187_v15  ;;  %v1442_v9 = vadd.f32 %v1441_v52, %v1427_v16  ;;  %v1973_v18 = vmul.f32 %v3480_v8, %v462_v27  ;;  %v1563_v20 = vadd.f32 %v1562_v28, %v5307_v22 }
  0xe6   :  { %v657_v0 = vadd.f32 %v656_v43, %v642_v35  ;;  %v930_v61 = vadd.f32 %v929_v7, %v915_v42  ;;  %v1987_v24 = vadd.f32 %v1986_v29, %v1972_v33  ;;  %v1715_v49 = vadd.f32 %v1714_v60, %v1700_v50 }
  0xe7   :  { %v1203_v62 = vadd.f32 %v1202_v53, %v1188_v48  ;;  %v1443_v55 = vadd.f32 %v1442_v9, %v1428_v5  ;;  %v3719_v51 = vmul.f32 %v5308_v57, %v468_v37  ;;  %v1564_v1 = vrot.slane %v1563_v20, 4  ;;  %v3724_v48 = vpop.permute.xlu0 %465  ;;  %v5310_v5 = vld [vmem:[#allocation62_spill] sm:$0xff] }
  0xe8   :  { %v658_v58 = vrot.slane %v657_v0, 4  ;;  %v931_v17 = vrot.slane %v930_v61, 4  ;;  %v1988_v36 = vadd.f32 %v1987_v24, %v1973_v18  ;;  %v1716_v56 = vadd.f32 %v1715_v49, %v1701_v31  ;;  %v5311_v18 = vld [vmem:[#allocation24_spill] sm:$0xff]  ;;  %v3730_v49 = vpop.permute.xlu1 %471 }
  0xe9   :  { %v1204_v15 = vrot.slane %v1203_v62, 4  ;;  %v1444_v63 = vrot.slane %v1443_v55, 4  ;;  %v3722_v27 = vmul.f32 %v5309_v23, %v468_v37  ;;  %v1565_v22 = vadd.f32 %v1564_v1, %v1563_v20 }
  0xea   :  { %v659_v42 = vadd.f32 %v658_v58, %v657_v0  ;;  %v932_v35 = vadd.f32 %v931_v17, %v930_v61  ;;  %v1989_v33 = vadd.f32 %v1988_v36, %v1974_v41  ;;  %v1717_v29 = vrot.slane %v1716_v56, 4  ;;  %v5312_v17 = vld [vmem:[#allocation57_spill] sm:$0xff]  ;;  %v626_v36 = vld [vmem:[%s4791_s3] sm:$0x1] }
  0xeb   :  { %v1205_v50 = vadd.f32 %v1204_v15, %v1203_v62  ;;  %v1445_v9 = vadd.f32 %v1444_v63, %v1443_v55  ;;  %v3727_v43 = vmul.f32 %v5310_v5, %v468_v37  ;;  %v1566_v52 = vrot.slane %v1565_v22, 2  ;;  %v470_v8 = vpop.permute.xlu0 %469 }
  0xec   :  { %v660_v28 = vrot.slane %v659_v42, 2  ;;  %v933_v16 = vrot.slane %v932_v35, 2  ;;  %v1990_v7 = vrot.slane %v1989_v33, 4  ;;  %v1718_v60 = vadd.f32 %v1717_v29, %v1716_v56 }
  0xed   :  { %v1206_v31 = vrot.slane %v1205_v50, 2  ;;  %v1446_v53 = vrot.slane %v1445_v9, 2  ;;  %v1454_v0 = vmul.f32 %v468_v37, %v5311_v18  ;;  %v1567_v41 = vadd.f32 %v1566_v52, %v1565_v22  ;;  %v1412_v52 = vld [vmem:[%s4791_s3 + $0x12] sm:$0x1]  ;;  %v476_v18 = vpop.permute.xlu1 %475 }
  0xee   :  { %v661_v61 = vadd.f32 %v660_v28, %v659_v42  ;;  %v934_v20 = vadd.f32 %v933_v16, %v932_v35  ;;  %v1991_v24 = vadd.f32 %v1990_v7, %v1989_v33  ;;  %v1719_v58 = vrot.slane %v1718_v60, 2  ;;  %v899_v42 = vld [vmem:[%s4791_s3 + $0x6] sm:$0x1]  ;;  %v1532_v35 = vld [vmem:[%s4791_s3 + $0x15] sm:$0x1] }
  0xef   :  { %v1207_v62 = vadd.f32 %v1206_v31, %v1205_v50  ;;  %v1447_v55 = vadd.f32 %v1446_v53, %v1445_v9  ;;  %v1727_v1 = vmul.f32 %v5312_v17, %v468_v37  ;;  %v1568_v56 = vrot.slane %v1567_v41, 1  ;;  %v5313_v9 = vld [vmem:[#allocation58_spill] sm:$0xff]  ;;  %v1172_v16 = vld [vmem:[%s4791_s3 + $0xc] sm:$0x1] }
  0xf0   :  { %v662_v15 = vrot.slane %v661_v61, 1  ;;  %v935_v63 = vrot.slane %v934_v20, 1  ;;  %v1992_v29 = vrot.slane %v1991_v24, 2  ;;  %v1720_v50 = vadd.f32 %v1719_v58, %v1718_v60 }
  0xf1   :  { %v1208_v22 = vrot.slane %v1207_v62, 1  ;;  %v1448_v33 = vrot.slane %v1447_v55, 1  ;;  %v2000_v28 = vmul.f32 %v5313_v9, %v468_v37  ;;  %v1569_v53 = vadd.f32 %v1568_v56, %v1567_v41  ;;  %v1685_v37 = vld [vmem:[%s4791_s3 + $0x18] sm:$0x1]  ;;  %v5319_v56 = vld [vmem:[#allocation55_spill] sm:$0xff] }
  0xf2   :  { %v663_v7 = vadd.f32 %v662_v15, %v661_v61  ;;  %v936_v31 = vadd.f32 %v935_v63, %v934_v20  ;;  %v1993_v6 = vadd.f32 %v1992_v29, %v1991_v24  ;;  %v1721_v40 = vrot.slane %v1720_v50, 1  ;;  %v1958_v61 = vld [vmem:[%s4791_s3 + $0x1e] sm:$0x1]  ;;  %v474_v63 = vpop.permute.xlu0 %473 }
  0xf3   :  { %v1209_v3 = vadd.f32 %v1208_v22, %v1207_v62  ;;  %v1449_v32 = vadd.f32 %v1448_v33, %v1447_v55  ;;  %v667_v60 = vmul.f32 %v5314_v14, %v3724_v48  ;;  %v1570_v9 = vadd.f32 %v1569_v53, %v1532_v35 }
  0xf4   :  { %v664_v58 = vadd.f32 %v663_v7, %v626_v36  ;;  %v937_v2 = vadd.f32 %v936_v31, %v899_v42  ;;  %v1994_v17 = vrot.slane %v1993_v6, 1  ;;  %v1722_v24 = vadd.f32 %v1721_v40, %v1720_v50  ;;  %v5315_v36 = vld [vmem:[#allocation53_spill] sm:$0xff]  ;;  %v5316_v40 = vld [vmem:[#allocation56_spill] sm:$0xff] }
  0xf5   :  { %v1210_v20 = vadd.f32 %v1209_v3, %v1172_v16  ;;  %v1450_v41 = vadd.f32 %v1449_v32, %v1412_v52  ;;  %v683_v62 = vadd.f32 %v3719_v51, %v667_v60  ;;  %1571 = vst [vmem:[%s4791_s3 + $0x15] sm:$0x1] %v1570_v9  ;;  %v940_v3 = vmul.f32 %v5315_v36, %v3724_v48  ;;  %v5317_v51 = vld [vmem:[#allocation22_spill] sm:$0xff]  ;;  %v5320_v42 = vld [vmem:[#allocation61_spill] sm:$0xff] }
  0xf6   :  { %665 = vst [vmem:[%s4791_s3] sm:$0x1] %v664_v58  ;;  %938 = vst [vmem:[%s4791_s3 + $0x6] sm:$0x1] %v937_v2  ;;  %v1995_v55 = vadd.f32 %v1994_v17, %v1993_v6  ;;  %v1213_v32 = vmul.f32 %v5316_v40, %v3724_v48  ;;  %v1453_v15 = vmul.f32 %v3724_v48, %v5317_v51  ;;  %v5318_v6 = vld [vmem:[#allocation54_spill] sm:$0xff]  ;;  %v5321_v7 = vld [vmem:[#allocation65_spill] sm:$0xff]  ;;  %v480_v58 = vpop.permute.xlu1 %479 }
  0xf7   :  { %1211 = vst [vmem:[%s4791_s3 + $0xc] sm:$0x1] %v1210_v20  ;;  %1451 = vst [vmem:[%s4791_s3 + $0x12] sm:$0x1] %v1450_v41  ;;  %v1723_v2 = vadd.f32 %v1722_v24, %v1685_v37  ;;  %v1726_v17 = vmul.f32 %v5318_v6, %v3724_v48  ;;  %v1999_v29 = vmul.f32 %v5319_v56, %v3724_v48  ;;  %v5322_v48 = vld [vmem:[#allocation66_spill] sm:$0xff]  ;;  %v5327_v41 = vld [vmem:[#allocation49_spill] sm:$0xff] }
  0xf8   :  { %v670_v35 = vmul.f32 %v5320_v42, %v3730_v49  ;;  %v1996_v22 = vadd.f32 %v1995_v55, %v1958_v61  ;;  %v956_v33 = vadd.f32 %v3722_v27, %v940_v3  ;;  %v1229_v50 = vadd.f32 %v3727_v43, %v1213_v32  ;;  %v5323_v27 = vld [vmem:[#allocation20_spill] sm:$0xff]  ;;  %v5328_v55 = vld [vmem:[#allocation19_spill] sm:$0xff]  ;;  %v5329_v32 = vld [vmem:[#allocation50_spill] sm:$0xff] }
  0xf9   :  { %v1469_v9 = vadd.f32 %v1454_v0, %v1453_v15  ;;  %1724 = vst [vmem:[%s4791_s3 + $0x18] sm:$0x1] %v1723_v2  ;;  %v1742_v16 = vadd.f32 %v1727_v1, %v1726_v17  ;;  %v2015_v52 = vadd.f32 %v2000_v28, %v1999_v29  ;;  %v943_v31 = vmul.f32 %v5321_v7, %v3730_v49  ;;  %v5324_v0 = vld [vmem:[#allocation63_spill] sm:$0xff]  ;;  %v5326_v61 = vld [vmem:[#allocation48_spill] sm:$0xff] }
  0xfa   :  { %v1216_v53 = vmul.f32 %v5322_v48, %v3730_v49  ;;  %1997 = vst [vmem:[%s4791_s3 + $0x1e] sm:$0x1] %v1996_v22  ;;  %v1456_v43 = vmul.f32 %v3730_v49, %v5323_v27  ;;  %v1729_v60 = vmul.f32 %v5324_v0, %v3730_v49  ;;  %v2002_v1 = vmul.f32 %v5248_v46, %v3730_v49  ;;  %v5325_v28 = vld [vmem:[#allocation47_spill] sm:$0xff]  ;;  %v478_v27 = vpop.permute.xlu0 %477 }
  0xfb   :  { %v669_v37 = vmul.f32 %v5325_v28, %v470_v8  ;;  %v942_v20 = vmul.f32 %v5326_v61, %v470_v8  ;;  %v1215_v24 = vmul.f32 %v5327_v41, %v470_v8  ;;  %v1455_v3 = vmul.f32 %v470_v8, %v5328_v55  ;;  %v5330_v17 = vld [vmem:[#allocation51_spill] sm:$0xff] }
  0xfc   :  { %v1728_v15 = vmul.f32 %v5329_v32, %v470_v8  ;;  %v2001_v29 = vmul.f32 %v5330_v17, %v470_v8  ;;  %v672_v22 = vmul.f32 %v5249_v54, %v476_v18  ;;  %v945_v0 = vmul.f32 %v5250_v11, %v476_v18  ;;  %v5331_v17 = vld [vmem:[#allocation73_spill] sm:$0xff] }
  0xfd   :  { %v684_v2 = vadd.f32 %v683_v62, %v669_v37  ;;  %v957_v49 = vadd.f32 %v956_v33, %v942_v20  ;;  %v1230_v46 = vadd.f32 %v1229_v50, %v1215_v24  ;;  %v1470_v48 = vadd.f32 %v1469_v9, %v1455_v3  ;;  %v5332_v9 = vld [vmem:[#allocation26_spill] sm:$0xff] }
  0xfe   :  { %v1743_v7 = vadd.f32 %v1742_v16, %v1728_v15  ;;  %v2016_v42 = vadd.f32 %v2015_v52, %v2001_v29  ;;  %v1218_v61 = vmul.f32 %v5251_v44, %v476_v18  ;;  %v1458_v41 = vmul.f32 %v476_v18, %v2616_v4  ;;  %v484_v52 = vpop.permute.xlu1 %483  ;;  %v5333_v3 = vld [vmem:[#allocation74_spill] sm:$0xff] }
  0xff   :  { %v1731_v55 = vmul.f32 %v5252_v13, %v476_v18  ;;  %v2004_v62 = vmul.f32 %v5253_v21, %v476_v18  ;;  %v671_v8 = vmul.f32 %v5254_v47, %v474_v63  ;;  %v685_v37 = vadd.f32 %v684_v2, %v670_v35  ;;  %v482_v35 = vpop.permute.xlu0 %481 }
 0x100   :  { %v944_v54 = vmul.f32 %v5255_v25, %v474_v63  ;;  %v958_v11 = vadd.f32 %v957_v49, %v943_v31  ;;  %v1217_v33 = vmul.f32 %v5331_v17, %v474_v63  ;;  %v1231_v50 = vadd.f32 %v1230_v46, %v1216_v53  ;;  %v5334_v49 = vld [vmem:[#allocation78_spill] sm:$0xff] }
 0x101   :  { %v1457_v16 = vmul.f32 %v474_v63, %v5332_v9  ;;  %v686_v20 = vadd.f32 %v685_v37, %v671_v8  ;;  %v1471_v24 = vadd.f32 %v1470_v48, %v1456_v43  ;;  %v1730_v15 = vmul.f32 %v5333_v3, %v474_v63  ;;  %v5335_v9 = vld [vmem:[#allocation79_spill] sm:$0xff]  ;;  %v5336_v8 = vld [vmem:[#allocation28_spill] sm:$0xff] }
 0x102   :  { %v1744_v29 = vadd.f32 %v1743_v7, %v1729_v60  ;;  %v959_v13 = vadd.f32 %v958_v11, %v944_v54  ;;  %v1232_v4 = vadd.f32 %v1231_v50, %v1217_v33  ;;  %v2003_v18 = vmul.f32 %v5258_v39, %v474_v63  ;;  %v5337_v43 = vld [vmem:[#allocation80_spill] sm:$0xff]  ;;  %v5338_v7 = vld [vmem:[#allocation86_spill] sm:$0xff]  ;;  %v5339_v54 = vld [vmem:[#allocation81_spill] sm:$0xff] }
 0x103   :  { %v2017_v21 = vadd.f32 %v2016_v42, %v2002_v1  ;;  %v1472_v2 = vadd.f32 %v1471_v24, %v1457_v16  ;;  %v674_v31 = vmul.f32 %v5259_v59, %v480_v58  ;;  %v947_v46 = vmul.f32 %v5334_v49, %v480_v58  ;;  %v5340_v42 = vld [vmem:[#allocation82_spill] sm:$0xff]  ;;  %v5341_v24 = vld [vmem:[#allocation29_spill] sm:$0xff] }
 0x104   :  { %v1745_v44 = vadd.f32 %v1744_v29, %v1730_v15  ;;  %v1220_v17 = vmul.f32 %v5335_v9, %v480_v58  ;;  %v1460_v48 = vmul.f32 %v480_v58, %v5336_v8  ;;  %v1733_v37 = vmul.f32 %v5337_v43, %v480_v58 }
 0x105   :  { %v2018_v53 = vadd.f32 %v2017_v21, %v2003_v18  ;;  %v2006_v11 = vmul.f32 %v5338_v7, %v480_v58  ;;  %v673_v60 = vmul.f32 %v5339_v54, %v478_v27  ;;  %v687_v63 = vadd.f32 %v686_v20, %v672_v22  ;;  %v488_v21 = vpop.permute.xlu1 %487  ;;  %v5342_v58 = vld [vmem:[#allocation85_spill] sm:$0xff]  ;;  %v486_v22 = vpop.permute.xlu0 %485 }
 0x106   :  { %v946_v1 = vmul.f32 %v5340_v42, %v478_v27  ;;  %v960_v33 = vadd.f32 %v959_v13, %v945_v0  ;;  %v1219_v50 = vmul.f32 %v5266_v19, %v478_v27  ;;  %v1233_v16 = vadd.f32 %v1232_v4, %v1218_v61  ;;  %v5343_v13 = vld [vmem:[#allocation87_spill] sm:$0xff]  ;;  %v5344_v19 = vld [vmem:[#allocation88_spill] sm:$0xff] }
 0x107   :  { %v1459_v15 = vmul.f32 %v478_v27, %v5341_v24  ;;  %v688_v29 = vadd.f32 %v687_v63, %v673_v60  ;;  %v1473_v18 = vadd.f32 %v1472_v2, %v1458_v41  ;;  %v1732_v8 = vmul.f32 %v5267_v26, %v478_v27  ;;  %v5345_v24 = vld [vmem:[#allocation89_spill] sm:$0xff]  ;;  %v5346_v2 = vld [vmem:[#allocation90_spill] sm:$0xff]  ;;  %v5348_v63 = vld [vmem:[#allocation91_spill] sm:$0xff] }
 0x108   :  { %v1746_v9 = vadd.f32 %v1745_v44, %v1731_v55  ;;  %v961_v43 = vadd.f32 %v960_v33, %v946_v1  ;;  %v1234_v49 = vadd.f32 %v1233_v16, %v1219_v50  ;;  %v2005_v7 = vmul.f32 %v5342_v58, %v478_v27  ;;  %v5347_v44 = vld [vmem:[#allocation96_spill] sm:$0xff]  ;;  %v5351_v16 = vld [vmem:[#allocation33_spill] sm:$0xff] }
 0x109   :  { %v2019_v59 = vadd.f32 %v2018_v53, %v2004_v62  ;;  %v1474_v20 = vadd.f32 %v1473_v18, %v1459_v15  ;;  %v676_v0 = vmul.f32 %v5343_v13, %v484_v52  ;;  %v949_v4 = vmul.f32 %v5344_v19, %v484_v52  ;;  %v5349_v62 = vld [vmem:[#allocation92_spill] sm:$0xff] }
 0x10a   :  { %v1747_v42 = vadd.f32 %v1746_v9, %v1732_v8  ;;  %v1222_v54 = vmul.f32 %v5345_v24, %v484_v52  ;;  %v1462_v41 = vmul.f32 %v484_v52, %v2638_v30  ;;  %v1735_v60 = vmul.f32 %v5346_v2, %v484_v52  ;;  %v5350_v9 = vld [vmem:[#allocation93_spill] sm:$0xff] }
 0x10b   :  { %v2020_v61 = vadd.f32 %v2019_v59, %v2005_v7  ;;  %v2008_v55 = vmul.f32 %v5347_v44, %v484_v52  ;;  %v675_v1 = vmul.f32 %v5348_v63, %v482_v35  ;;  %v689_v27 = vadd.f32 %v688_v29, %v674_v31  ;;  %v500_v59 = vpop.permute.xlu1 %499  ;;  %v498_v31 = vpop.permute.xlu0 %497 }
 0x10c   :  { %v948_v53 = vmul.f32 %v5349_v62, %v482_v35  ;;  %v962_v33 = vadd.f32 %v961_v43, %v947_v46  ;;  %v1221_v8 = vmul.f32 %v5350_v9, %v482_v35  ;;  %v1235_v50 = vadd.f32 %v1234_v49, %v1220_v17  ;;  %v5353_v17 = vld [vmem:[#allocation98_spill] sm:$0xff] }
 0x10d   :  { %v1461_v15 = vmul.f32 %v482_v35, %v5351_v16  ;;  %v690_v7 = vadd.f32 %v689_v27, %v675_v1  ;;  %v1475_v18 = vadd.f32 %v1474_v20, %v1460_v48  ;;  %v1734_v30 = vmul.f32 %v5277_v12, %v482_v35  ;;  %v5355_v1 = vld [vmem:[#allocation99_spill] sm:$0xff]  ;;  %v5357_v20 = vld [vmem:[#allocation34_spill] sm:$0xff] }
 0x10e   :  { %v1748_v24 = vadd.f32 %v1747_v42, %v1733_v37  ;;  %v963_v2 = vadd.f32 %v962_v33, %v948_v53  ;;  %v1236_v19 = vadd.f32 %v1235_v50, %v1221_v8  ;;  %v2007_v52 = vmul.f32 %v5278_v10, %v482_v35  ;;  %v5359_v42 = vld [vmem:[#allocation100_spill] sm:$0xff]  ;;  %v5361_v35 = vld [vmem:[#allocation103_spill] sm:$0xff]  ;;  %v5364_v53 = vld [vmem:[#allocation102_spill] sm:$0xff] }
 0x10f   :  { %v2021_v44 = vadd.f32 %v2020_v61, %v2006_v11  ;;  %v1476_v29 = vadd.f32 %v1475_v18, %v1461_v15  ;;  %v3846_v46 = vmul.f32 %v5279_v38, %v488_v21  ;;  %v3849_v49 = vmul.f32 %v5353_v17, %v488_v21  ;;  %v5365_v50 = vld [vmem:[#allocation104_spill] sm:$0xff] }
 0x110   :  { %v1749_v13 = vadd.f32 %v1748_v24, %v1734_v30  ;;  %v3852_v48 = vmul.f32 %v5355_v1, %v488_v21  ;;  %v3855_v37 = vmul.f32 %v488_v21, %v5357_v20  ;;  %v3858_v27 = vmul.f32 %v5359_v42, %v488_v21  ;;  %v5363_v30 = vld [vmem:[#allocation101_spill] sm:$0xff]  ;;  %v5366_v18 = vld [vmem:[#allocation36_spill] sm:$0xff] }
 0x111   :  { %5352 = vst [vmem:[#allocation69_spill] sm:$0xff] %v3846_v46  ;;  %5354 = vst [vmem:[#allocation72_spill] sm:$0xff] %v3849_v49  ;;  %v2022_v43 = vadd.f32 %v2021_v44, %v2007_v52  ;;  %v3861_v11 = vmul.f32 %v5361_v35, %v488_v21  ;;  %v677_v24 = vmul.f32 %v5363_v30, %v486_v22 }
 0x112   :  { %5356 = vst [vmem:[#allocation75_spill] sm:$0xff] %v3852_v48  ;;  %5358 = vst [vmem:[#allocation84_spill] sm:$0xff] %v3855_v37  ;;  %v691_v61 = vadd.f32 %v690_v7, %v676_v0  ;;  %v950_v33 = vmul.f32 %v5364_v53, %v486_v22  ;;  %v964_v8 = vadd.f32 %v963_v2, %v949_v4  ;;  %v532_v48 = vpop.permute.xlu1 %531  ;;  %v530_v4 = vpop.permute.xlu0 %529 }
 0x113   :  { %5360 = vst [vmem:[#allocation94_spill] sm:$0xff] %v3858_v27  ;;  %5362 = vst [vmem:[#allocation95_spill] sm:$0xff] %v3861_v11  ;;  %v1223_v44 = vmul.f32 %v5365_v50, %v486_v22  ;;  %v1237_v15 = vadd.f32 %v1236_v19, %v1222_v54  ;;  %v1463_v52 = vmul.f32 %v486_v22, %v5366_v18 }
 0x114   :  { %v3867_v49 = vadd.f32 %v691_v61, %v677_v24  ;;  %v1477_v37 = vadd.f32 %v1476_v29, %v1462_v41  ;;  %v1736_v27 = vmul.f32 %v5287_v34, %v486_v22  ;;  %v1750_v46 = vadd.f32 %v1749_v13, %v1735_v60  ;;  %v5373_v60 = vld [vmem:[#allocation24_spill] sm:$0xff]  ;;  %v5374_v61 = vld [vmem:[#allocation57_spill] sm:$0xff] }
 0x115   :  { %v3870_v21 = vadd.f32 %v964_v8, %v950_v33  ;;  %v3872_v11 = vadd.f32 %v1237_v15, %v1223_v44  ;;  %v2009_v0 = vmul.f32 %v5288_v45, %v486_v22  ;;  %v2023_v7 = vadd.f32 %v2022_v43, %v2008_v55  ;;  %v5375_v8 = vld [vmem:[#allocation58_spill] sm:$0xff]  ;;  %v5381_v34 = vld [vmem:[#allocation65_spill] sm:$0xff] }
 0x116   :  { %5367 = vst [vmem:[#allocation127_spill] sm:$0xff] %v3867_v49  ;;  %v3875_v2 = vadd.f32 %v1477_v37, %v1463_v52  ;;  %v3877_v19 = vadd.f32 %v1750_v46, %v1736_v27  ;;  %v708_v54 = vmul.f32 %v5308_v57, %v500_v59  ;;  %v981_v24 = vmul.f32 %v5309_v23, %v500_v59  ;;  %v564_v52 = vpop.permute.xlu1 %563  ;;  %v562_v49 = vpop.permute.xlu0 %561 }
 0x117   :  { %5368 = vst [vmem:[#allocation59_spill] sm:$0xff] %v3870_v21  ;;  %5369 = vst [vmem:[#allocation60_spill] sm:$0xff] %v3872_v11  ;;  %v3881_v41 = vadd.f32 %v2023_v7, %v2009_v0  ;;  %v1254_v13 = vmul.f32 %v5310_v5, %v500_v59  ;;  %v1494_v29 = vmul.f32 %v500_v59, %v5373_v60 }
 0x118   :  { %5370 = vst [vmem:[#allocation62_spill] sm:$0xff] %v3875_v2  ;;  %5371 = vst [vmem:[#allocation52_spill] sm:$0xff] %v3877_v19  ;;  %v1767_v33 = vmul.f32 %v5374_v61, %v500_v59  ;;  %v2040_v22 = vmul.f32 %v5375_v8, %v500_v59  ;;  %v707_v55 = vmul.f32 %v5314_v14, %v498_v31 }
 0x119   :  { %5372 = vst [vmem:[#allocation53_spill] sm:$0xff] %v3881_v41  ;;  %v980_v43 = vmul.f32 %v5315_v36, %v498_v31  ;;  %v1253_v46 = vmul.f32 %v5316_v40, %v498_v31  ;;  %v1493_v37 = vmul.f32 %v498_v31, %v5317_v51  ;;  %v1766_v27 = vmul.f32 %v5318_v6, %v498_v31 }
 0x11a   :  { %v2039_v44 = vmul.f32 %v5319_v56, %v498_v31  ;;  %v788_v15 = vmul.f32 %v5308_v57, %v532_v48  ;;  %v723_v0 = vadd.f32 %v708_v54, %v707_v55  ;;  %v1061_v59 = vmul.f32 %v5309_v23, %v532_v48  ;;  %v534_v20 = vpop.permute.xlu1 %533 }
 0x11b   :  { %v996_v7 = vadd.f32 %v981_v24, %v980_v43  ;;  %v1269_v41 = vadd.f32 %v1254_v13, %v1253_v46  ;;  %v1509_v19 = vadd.f32 %v1494_v29, %v1493_v37  ;;  %v3895_v2 = vadd.f32 %v1767_v33, %v1766_v27 }
 0x11c   :  { %v3897_v11 = vadd.f32 %v2040_v22, %v2039_v44  ;;  %v1334_v21 = vmul.f32 %v5310_v5, %v532_v48  ;;  %v1574_v35 = vmul.f32 %v532_v48, %v5373_v60  ;;  %v1847_v31 = vmul.f32 %v5374_v61, %v532_v48 }
 0x11d   :  { %v2120_v42 = vmul.f32 %v5375_v8, %v532_v48  ;;  %v787_v54 = vmul.f32 %v5314_v14, %v530_v4  ;;  %v1060_v24 = vmul.f32 %v5315_v36, %v530_v4  ;;  %v1333_v13 = vmul.f32 %v5316_v40, %v530_v4 }
 0x11e   :  { %v1573_v29 = vmul.f32 %v530_v4, %v5317_v51  ;;  %v1846_v33 = vmul.f32 %v5318_v6, %v530_v4  ;;  %v2119_v55 = vmul.f32 %v5319_v56, %v530_v4  ;;  %v828_v43 = vmul.f32 %v5308_v57, %v564_v52 }
 0x11f   :  { %v803_v22 = vadd.f32 %v788_v15, %v787_v54  ;;  %v1101_v46 = vmul.f32 %v5309_v23, %v564_v52  ;;  %v1076_v37 = vadd.f32 %v1061_v59, %v1060_v24  ;;  %v1349_v27 = vadd.f32 %v1334_v21, %v1333_v13  ;;  %v502_v59 = vpop.permute.xlu0 %501  ;;  %v5376_v24 = vld [vmem:[#allocation48_spill] sm:$0xff] }
 0x120   :  { %v1589_v48 = vadd.f32 %v1574_v35, %v1573_v29  ;;  %v1862_v44 = vadd.f32 %v1847_v31, %v1846_v33  ;;  %v2135_v1 = vadd.f32 %v2120_v42, %v2119_v55  ;;  %v1374_v17 = vmul.f32 %v5310_v5, %v564_v52  ;;  %v5377_v29 = vld [vmem:[#allocation49_spill] sm:$0xff]  ;;  %v5378_v55 = vld [vmem:[#allocation19_spill] sm:$0xff] }
 0x121   :  { %v1614_v38 = vmul.f32 %v564_v52, %v5373_v60  ;;  %v1887_v45 = vmul.f32 %v5374_v61, %v564_v52  ;;  %v2160_v15 = vmul.f32 %v5375_v8, %v564_v52  ;;  %v827_v4 = vmul.f32 %v5314_v14, %v562_v49  ;;  %v5379_v60 = vld [vmem:[#allocation51_spill] sm:$0xff] }
 0x122   :  { %v1100_v57 = vmul.f32 %v5315_v36, %v562_v49  ;;  %v1373_v23 = vmul.f32 %v5316_v40, %v562_v49  ;;  %v1613_v35 = vmul.f32 %v562_v49, %v5317_v51  ;;  %v1886_v21 = vmul.f32 %v5318_v6, %v562_v49 }
 0x123   :  { %v2159_v42 = vmul.f32 %v5319_v56, %v562_v49  ;;  %v789_v5 = vmul.f32 %v5325_v28, %v534_v20  ;;  %v843_v31 = vadd.f32 %v828_v43, %v827_v4  ;;  %v1062_v8 = vmul.f32 %v5376_v24, %v534_v20  ;;  %v504_v49 = vpop.permute.xlu1 %503  ;;  %v566_v4 = vpop.permute.xlu0 %565 }
 0x124   :  { %v1116_v54 = vadd.f32 %v1101_v46, %v1100_v57  ;;  %v1389_v61 = vadd.f32 %v1374_v17, %v1373_v23  ;;  %v1629_v52 = vadd.f32 %v1614_v38, %v1613_v35  ;;  %v1902_v14 = vadd.f32 %v1887_v45, %v1886_v21 }
 0x125   :  { %v2175_v13 = vadd.f32 %v2160_v15, %v2159_v42  ;;  %v3923_v36 = vadd.f32 %v803_v22, %v789_v5  ;;  %v3925_v40 = vadd.f32 %v1076_v37, %v1062_v8  ;;  %v1335_v33 = vmul.f32 %v5377_v29, %v534_v20  ;;  %v5380_v8 = vld [vmem:[#allocation61_spill] sm:$0xff] }
 0x126   :  { %v1575_v6 = vmul.f32 %v534_v20, %v5378_v55  ;;  %v1848_v56 = vmul.f32 %v5329_v32, %v534_v20  ;;  %v2121_v43 = vmul.f32 %v5379_v60, %v534_v20  ;;  %v709_v17 = vmul.f32 %v5325_v28, %v502_v59 }
 0x127   :  { %v982_v46 = vmul.f32 %v5376_v24, %v502_v59  ;;  %v1255_v38 = vmul.f32 %v5377_v29, %v502_v59  ;;  %v1350_v45 = vadd.f32 %v1349_v27, %v1335_v33  ;;  %v1495_v37 = vmul.f32 %v502_v59, %v5378_v55  ;;  %v5383_v33 = vld [vmem:[#allocation20_spill] sm:$0xff] }
 0x128   :  { %v1590_v22 = vadd.f32 %v1589_v48, %v1575_v6  ;;  %v3934_v15 = vadd.f32 %v1862_v44, %v1848_v56  ;;  %v3937_v57 = vadd.f32 %v2135_v1, %v2121_v43  ;;  %v724_v23 = vadd.f32 %v723_v0, %v709_v17  ;;  %v5382_v48 = vld [vmem:[#allocation66_spill] sm:$0xff]  ;;  %v5384_v56 = vld [vmem:[#allocation63_spill] sm:$0xff]  ;;  %v568_v43 = vpop.permute.xlu1 %567 }
 0x129   :  { %v997_v35 = vadd.f32 %v996_v7, %v982_v46  ;;  %v1270_v21 = vadd.f32 %v1269_v41, %v1255_v38  ;;  %v1510_v42 = vadd.f32 %v1509_v19, %v1495_v37  ;;  %v1768_v20 = vmul.f32 %v5329_v32, %v502_v59  ;;  %v5385_v19 = vld [vmem:[#allocation64_spill] sm:$0xff] }
 0x12a   :  { %v2041_v5 = vmul.f32 %v5379_v60, %v502_v59  ;;  %v710_v51 = vmul.f32 %v5380_v8, %v504_v49  ;;  %v983_v27 = vmul.f32 %v5381_v34, %v504_v49  ;;  %v1256_v44 = vmul.f32 %v5382_v48, %v504_v49 }
 0x12b   :  { %v1496_v6 = vmul.f32 %v504_v49, %v5383_v33  ;;  %v1769_v18 = vmul.f32 %v5384_v56, %v504_v49  ;;  %v1783_v1 = vadd.f32 %v3895_v2, %v1768_v20  ;;  %v2042_v7 = vmul.f32 %v5385_v19, %v504_v49 }
 0x12c   :  { %v2056_v0 = vadd.f32 %v3897_v11, %v2041_v5  ;;  %v3948_v41 = vadd.f32 %v724_v23, %v710_v51  ;;  %v3951_v59 = vadd.f32 %v997_v35, %v983_v27  ;;  %v3953_v17 = vadd.f32 %v1270_v21, %v1256_v44  ;;  %v536_v11 = vpop.permute.xlu0 %535 }
 0x12d   :  { %v3955_v46 = vadd.f32 %v1510_v42, %v1496_v6  ;;  %v829_v38 = vmul.f32 %v5325_v28, %v566_v4  ;;  %v3958_v37 = vadd.f32 %v1783_v1, %v1769_v18  ;;  %v1102_v2 = vmul.f32 %v5376_v24, %v566_v4 }
 0x12e   :  { %v3960_v50 = vadd.f32 %v2056_v0, %v2042_v7  ;;  %v1375_v51 = vmul.f32 %v5377_v29, %v566_v4  ;;  %v1615_v49 = vmul.f32 %v566_v4, %v5378_v55  ;;  %v1888_v35 = vmul.f32 %v5329_v32, %v566_v4 }
 0x12f   :  { %v844_v23 = vadd.f32 %v843_v31, %v829_v38  ;;  %v2161_v21 = vmul.f32 %v5379_v60, %v566_v4  ;;  %v1117_v42 = vadd.f32 %v1116_v54, %v1102_v2  ;;  %v830_v28 = vmul.f32 %v5380_v8, %v568_v43  ;;  %v538_v60 = vpop.permute.xlu1 %537 }
 0x130   :  { %v1390_v20 = vadd.f32 %v1389_v61, %v1375_v51  ;;  %v1103_v18 = vmul.f32 %v5381_v34, %v568_v43  ;;  %v1630_v5 = vadd.f32 %v1629_v52, %v1615_v49  ;;  %v1903_v27 = vadd.f32 %v1902_v14, %v1888_v35  ;;  %v506_v7 = vpop.permute.xlu0 %505 }
 0x131   :  { %v2176_v44 = vadd.f32 %v2175_v13, %v2161_v21  ;;  %v1376_v24 = vmul.f32 %v5382_v48, %v568_v43  ;;  %v3970_v29 = vadd.f32 %v844_v23, %v830_v28  ;;  %v1616_v6 = vmul.f32 %v568_v43, %v5383_v33  ;;  %v5386_v21 = vld [vmem:[#allocation73_spill] sm:$0xff] }
 0x132   :  { %v3972_v31 = vadd.f32 %v1117_v42, %v1103_v18  ;;  %v1889_v32 = vmul.f32 %v5384_v56, %v568_v43  ;;  %v2162_v61 = vmul.f32 %v5385_v19, %v568_v43  ;;  %v790_v4 = vmul.f32 %v5380_v8, %v536_v11 }
 0x133   :  { %v3976_v54 = vadd.f32 %v1390_v20, %v1376_v24  ;;  %v1063_v52 = vmul.f32 %v5381_v34, %v536_v11  ;;  %v1631_v14 = vadd.f32 %v1630_v5, %v1616_v6  ;;  %v1336_v1 = vmul.f32 %v5382_v48, %v536_v11  ;;  %v5387_v20 = vld [vmem:[#allocation26_spill] sm:$0xff] }
 0x134   :  { %v3981_v13 = vadd.f32 %v1903_v27, %v1889_v32  ;;  %v1576_v0 = vmul.f32 %v536_v11, %v5383_v33  ;;  %v3985_v38 = vadd.f32 %v2176_v44, %v2162_v61  ;;  %v805_v2 = vadd.f32 %v3923_v36, %v790_v4  ;;  %v570_v24 = vpop.permute.xlu0 %569 }
 0x135   :  { %v1078_v51 = vadd.f32 %v3925_v40, %v1063_v52  ;;  %v1849_v43 = vmul.f32 %v5384_v56, %v536_v11  ;;  %v1351_v23 = vadd.f32 %v1350_v45, %v1336_v1  ;;  %v2122_v34 = vmul.f32 %v5385_v19, %v536_v11  ;;  %v5388_v1 = vld [vmem:[#allocation67_spill] sm:$0xff] }
 0x136   :  { %v1591_v8 = vadd.f32 %v1590_v22, %v1576_v0  ;;  %v791_v49 = vmul.f32 %v5254_v47, %v538_v60  ;;  %v1064_v48 = vmul.f32 %v5255_v25, %v538_v60  ;;  %v1337_v42 = vmul.f32 %v5386_v21, %v538_v60  ;;  %v508_v22 = vpop.permute.xlu1 %507 }
 0x137   :  { %v1864_v35 = vadd.f32 %v3934_v15, %v1849_v43  ;;  %v1577_v28 = vmul.f32 %v538_v60, %v5387_v20  ;;  %v2137_v36 = vadd.f32 %v3937_v57, %v2122_v34  ;;  %v1850_v40 = vmul.f32 %v5333_v3, %v538_v60 }
 0x138   :  { %v3997_v18 = vadd.f32 %v805_v2, %v791_v49  ;;  %v2123_v45 = vmul.f32 %v5258_v39, %v538_v60  ;;  %v4001_v56 = vadd.f32 %v1078_v51, %v1064_v48  ;;  %v4003_v19 = vadd.f32 %v1351_v23, %v1337_v42  ;;  %v5389_v2 = vld [vmem:[#allocation68_spill] sm:$0xff]  ;;  %v5392_v48 = vld [vmem:[#allocation71_spill] sm:$0xff] }
 0x139   :  { %v4005_v15 = vadd.f32 %v1591_v8, %v1577_v28  ;;  %v711_v11 = vmul.f32 %v5254_v47, %v506_v7  ;;  %v4008_v5 = vadd.f32 %v1864_v35, %v1850_v40  ;;  %v984_v57 = vmul.f32 %v5255_v25, %v506_v7  ;;  %v5390_v8 = vld [vmem:[#allocation70_spill] sm:$0xff] }
 0x13a   :  { %v4010_v27 = vadd.f32 %v2137_v36, %v2123_v45  ;;  %v1257_v44 = vmul.f32 %v5386_v21, %v506_v7  ;;  %v1497_v32 = vmul.f32 %v506_v7, %v5387_v20  ;;  %v1770_v60 = vmul.f32 %v5333_v3, %v506_v7  ;;  %v572_v42 = vpop.permute.xlu1 %571  ;;  %v5393_v36 = vld [vmem:[#allocation76_spill] sm:$0xff] }
 0x13b   :  { %v726_v6 = vadd.f32 %v3948_v41, %v711_v11  ;;  %v2043_v61 = vmul.f32 %v5258_v39, %v506_v7  ;;  %v999_v4 = vadd.f32 %v3951_v59, %v984_v57  ;;  %v712_v0 = vmul.f32 %v5388_v1, %v508_v22  ;;  %v5391_v7 = vld [vmem:[#allocation25_spill] sm:$0xff] }
 0x13c   :  { %v1272_v52 = vadd.f32 %v3953_v17, %v1257_v44  ;;  %v985_v51 = vmul.f32 %v5389_v2, %v508_v22  ;;  %v1512_v43 = vadd.f32 %v3955_v46, %v1497_v32  ;;  %v1785_v23 = vadd.f32 %v3958_v37, %v1770_v60  ;;  %v540_v44 = vpop.permute.xlu0 %539 }
 0x13d   :  { %v2058_v41 = vadd.f32 %v3960_v50, %v2043_v61  ;;  %v1258_v34 = vmul.f32 %v5390_v8, %v508_v22  ;;  %v4026_v49 = vadd.f32 %v726_v6, %v712_v0  ;;  %v1498_v59 = vmul.f32 %v508_v22, %v5391_v7 }
 0x13e   :  { %v4028_v35 = vadd.f32 %v999_v4, %v985_v51  ;;  %v1771_v17 = vmul.f32 %v5392_v48, %v508_v22  ;;  %v2044_v40 = vmul.f32 %v5393_v36, %v508_v22  ;;  %v831_v46 = vmul.f32 %v5254_v47, %v570_v24 }
 0x13f   :  { %v4032_v28 = vadd.f32 %v1272_v52, %v1258_v34  ;;  %v1104_v37 = vmul.f32 %v5255_v25, %v570_v24  ;;  %v1513_v50 = vadd.f32 %v1512_v43, %v1498_v59  ;;  %v1377_v11 = vmul.f32 %v5386_v21, %v570_v24 }
 0x140   :  { %v4037_v45 = vadd.f32 %v1785_v23, %v1771_v17  ;;  %v1617_v57 = vmul.f32 %v570_v24, %v5387_v20  ;;  %v4041_v6 = vadd.f32 %v2058_v41, %v2044_v40  ;;  %v846_v32 = vadd.f32 %v3970_v29, %v831_v46  ;;  %v510_v59 = vpop.permute.xlu0 %509 }
 0x141   :  { %v1119_v60 = vadd.f32 %v3972_v31, %v1104_v37  ;;  %v1890_v22 = vmul.f32 %v5333_v3, %v570_v24  ;;  %v1392_v47 = vadd.f32 %v3976_v54, %v1377_v11  ;;  %v2163_v25 = vmul.f32 %v5258_v39, %v570_v24  ;;  %v5394_v11 = vld [vmem:[#allocation81_spill] sm:$0xff] }
 0x142   :  { %v1632_v61 = vadd.f32 %v1631_v14, %v1617_v57  ;;  %v832_v4 = vmul.f32 %v5388_v1, %v572_v42  ;;  %v1105_v52 = vmul.f32 %v5389_v2, %v572_v42  ;;  %v1378_v0 = vmul.f32 %v5390_v8, %v572_v42  ;;  %v542_v14 = vpop.permute.xlu1 %541 }
 0x143   :  { %v1905_v21 = vadd.f32 %v3981_v13, %v1890_v22  ;;  %v1618_v51 = vmul.f32 %v572_v42, %v5391_v7  ;;  %v2178_v29 = vadd.f32 %v3985_v38, %v2163_v25  ;;  %v1891_v3 = vmul.f32 %v5392_v48, %v572_v42  ;;  %v5396_v22 = vld [vmem:[#allocation83_spill] sm:$0xff] }
 0x144   :  { %v4054_v31 = vadd.f32 %v846_v32, %v832_v4  ;;  %v2164_v54 = vmul.f32 %v5393_v36, %v572_v42  ;;  %v4058_v39 = vadd.f32 %v1119_v60, %v1105_v52  ;;  %v4060_v24 = vadd.f32 %v1392_v47, %v1378_v0  ;;  %v5395_v32 = vld [vmem:[#allocation82_spill] sm:$0xff] }
 0x145   :  { %v4062_v13 = vadd.f32 %v1632_v61, %v1618_v51  ;;  %v792_v43 = vmul.f32 %v5388_v1, %v540_v44  ;;  %v4065_v23 = vadd.f32 %v1905_v21, %v1891_v3  ;;  %v1065_v38 = vmul.f32 %v5389_v2, %v540_v44  ;;  %v574_v51 = vpop.permute.xlu0 %573 }
 0x146   :  { %v4067_v41 = vadd.f32 %v2178_v29, %v2164_v54  ;;  %v1338_v34 = vmul.f32 %v5390_v8, %v540_v44  ;;  %v1578_v42 = vmul.f32 %v540_v44, %v5391_v7  ;;  %v1851_v40 = vmul.f32 %v5392_v48, %v540_v44 }
 0x147   :  { %v807_v17 = vadd.f32 %v3997_v18, %v792_v43  ;;  %v2124_v46 = vmul.f32 %v5393_v36, %v540_v44  ;;  %v1080_v37 = vadd.f32 %v4001_v56, %v1065_v38  ;;  %v793_v57 = vmul.f32 %v5394_v11, %v542_v14  ;;  %v5397_v36 = vld [vmem:[#allocation29_spill] sm:$0xff]  ;;  %v512_v44 = vpop.permute.xlu1 %511 }
 0x148   :  { %v1353_v1 = vadd.f32 %v4003_v19, %v1338_v34  ;;  %v1066_v60 = vmul.f32 %v5395_v32, %v542_v14  ;;  %v1593_v2 = vadd.f32 %v4005_v15, %v1578_v42  ;;  %v1866_v8 = vadd.f32 %v4008_v5, %v1851_v40 }
 0x149   :  { %v2139_v18 = vadd.f32 %v4010_v27, %v2124_v46  ;;  %v1339_v47 = vmul.f32 %v5396_v22, %v542_v14  ;;  %v4083_v61 = vadd.f32 %v807_v17, %v793_v57  ;;  %v1579_v56 = vmul.f32 %v542_v14, %v5397_v36  ;;  %v5398_v17 = vld [vmem:[#allocation77_spill] sm:$0xff]  ;;  %v5399_v46 = vld [vmem:[#allocation78_spill] sm:$0xff] }
 0x14a   :  { %v4085_v48 = vadd.f32 %v1080_v37, %v1066_v60  ;;  %v1852_v19 = vmul.f32 %v5267_v26, %v542_v14  ;;  %v2125_v4 = vmul.f32 %v5342_v58, %v542_v14  ;;  %v713_v15 = vmul.f32 %v5394_v11, %v510_v59  ;;  %v5401_v60 = vld [vmem:[#allocation28_spill] sm:$0xff] }
 0x14b   :  { %v4089_v25 = vadd.f32 %v1353_v1, %v1339_v47  ;;  %v986_v5 = vmul.f32 %v5395_v32, %v510_v59  ;;  %v1594_v27 = vadd.f32 %v1593_v2, %v1579_v56  ;;  %v1259_v52 = vmul.f32 %v5396_v22, %v510_v59  ;;  %v5400_v1 = vld [vmem:[#allocation79_spill] sm:$0xff]  ;;  %v576_v47 = vpop.permute.xlu1 %575 }
 0x14c   :  { %v4094_v21 = vadd.f32 %v1866_v8, %v1852_v19  ;;  %v1499_v0 = vmul.f32 %v510_v59, %v5397_v36  ;;  %v4098_v29 = vadd.f32 %v2139_v18, %v2125_v4  ;;  %v728_v3 = vadd.f32 %v4026_v49, %v713_v15  ;;  %v5402_v8 = vld [vmem:[#allocation80_spill] sm:$0xff] }
 0x14d   :  { %v1001_v54 = vadd.f32 %v4028_v35, %v986_v5  ;;  %v1772_v14 = vmul.f32 %v5267_v26, %v510_v59  ;;  %v1274_v43 = vadd.f32 %v4032_v28, %v1259_v52  ;;  %v2045_v34 = vmul.f32 %v5342_v58, %v510_v59  ;;  %v5403_v28 = vld [vmem:[#allocation86_spill] sm:$0xff]  ;;  %v544_v52 = vpop.permute.xlu0 %543 }
 0x14e   :  { %v1514_v38 = vadd.f32 %v1513_v50, %v1499_v0  ;;  %v714_v42 = vmul.f32 %v5398_v17, %v512_v44  ;;  %v987_v37 = vmul.f32 %v5399_v46, %v512_v44  ;;  %v1260_v57 = vmul.f32 %v5400_v1, %v512_v44 }
 0x14f   :  { %v1787_v40 = vadd.f32 %v4037_v45, %v1772_v14  ;;  %v1500_v2 = vmul.f32 %v512_v44, %v5401_v60  ;;  %v2060_v49 = vadd.f32 %v4041_v6, %v2045_v34  ;;  %v1773_v18 = vmul.f32 %v5402_v8, %v512_v44 }
 0x150   :  { %v4111_v35 = vadd.f32 %v728_v3, %v714_v42  ;;  %v2046_v50 = vmul.f32 %v5403_v28, %v512_v44  ;;  %v4115_v59 = vadd.f32 %v1001_v54, %v987_v37  ;;  %v4117_v56 = vadd.f32 %v1274_v43, %v1260_v57 }
 0x151   :  { %v4119_v45 = vadd.f32 %v1514_v38, %v1500_v2  ;;  %v833_v19 = vmul.f32 %v5394_v11, %v574_v51  ;;  %v4122_v4 = vadd.f32 %v1787_v40, %v1773_v18  ;;  %v1106_v6 = vmul.f32 %v5395_v32, %v574_v51 }
 0x152   :  { %v4124_v15 = vadd.f32 %v2060_v49, %v2046_v50  ;;  %v1379_v5 = vmul.f32 %v5396_v22, %v574_v51  ;;  %v1619_v0 = vmul.f32 %v574_v51, %v5397_v36  ;;  %v1892_v3 = vmul.f32 %v5267_v26, %v574_v51  ;;  %v514_v49 = vpop.permute.xlu0 %513  ;;  %v5461_v36 = vld [vmem:[#allocation121_spill] sm:$0xff] }
 0x153   :  { %v848_v44 = vadd.f32 %v4054_v31, %v833_v19  ;;  %v2165_v54 = vmul.f32 %v5342_v58, %v574_v51  ;;  %v1121_v14 = vadd.f32 %v4058_v39, %v1106_v6  ;;  %v834_v43 = vmul.f32 %v5398_v17, %v576_v47 }
 0x154   :  { %v1394_v11 = vadd.f32 %v4060_v24, %v1379_v5  ;;  %v1107_v38 = vmul.f32 %v5399_v46, %v576_v47  ;;  %v1634_v32 = vadd.f32 %v4062_v13, %v1619_v0  ;;  %v1907_v22 = vadd.f32 %v4065_v23, %v1892_v3  ;;  %v546_v24 = vpop.permute.xlu1 %545 }
 0x155   :  { %v2180_v31 = vadd.f32 %v4067_v41, %v2165_v54  ;;  %v1380_v34 = vmul.f32 %v5400_v1, %v576_v47  ;;  %v4140_v42 = vadd.f32 %v848_v44, %v834_v43  ;;  %v1620_v58 = vmul.f32 %v576_v47, %v5401_v60 }
 0x156   :  { %v4142_v26 = vadd.f32 %v1121_v14, %v1107_v38  ;;  %v1893_v39 = vmul.f32 %v5402_v8, %v576_v47  ;;  %v2166_v40 = vmul.f32 %v5403_v28, %v576_v47  ;;  %v794_v13 = vmul.f32 %v5398_v17, %v544_v52  ;;  %v578_v38 = vpop.permute.xlu0 %577 }
 0x157   :  { %v4146_v51 = vadd.f32 %v1394_v11, %v1380_v34  ;;  %v1067_v23 = vmul.f32 %v5399_v46, %v544_v52  ;;  %v1635_v41 = vadd.f32 %v1634_v32, %v1620_v58  ;;  %v1340_v57 = vmul.f32 %v5400_v1, %v544_v52 }
 0x158   :  { %v4151_v37 = vadd.f32 %v1907_v22, %v1893_v39  ;;  %v1580_v2 = vmul.f32 %v544_v52, %v5401_v60  ;;  %v4155_v18 = vadd.f32 %v2180_v31, %v2166_v40  ;;  %v809_v50 = vadd.f32 %v4083_v61, %v794_v13  ;;  %v5405_v13 = vld [vmem:[#allocation88_spill] sm:$0xff] }
 0x159   :  { %v1082_v19 = vadd.f32 %v4085_v48, %v1067_v23  ;;  %v1853_v47 = vmul.f32 %v5402_v8, %v544_v52  ;;  %v1355_v17 = vadd.f32 %v4089_v25, %v1340_v57  ;;  %v2126_v46 = vmul.f32 %v5403_v28, %v544_v52 }
 0x15a   :  { %v1595_v6 = vadd.f32 %v1594_v27, %v1580_v2  ;;  %v795_v5 = vmul.f32 %v5348_v63, %v546_v24  ;;  %v1068_v44 = vmul.f32 %v5349_v62, %v546_v24  ;;  %v1341_v0 = vmul.f32 %v5350_v9, %v546_v24  ;;  %v516_v27 = vpop.permute.xlu1 %515 }
 0x15b   :  { %v1868_v1 = vadd.f32 %v4094_v21, %v1853_v47  ;;  %v1581_v3 = vmul.f32 %v546_v24, %v5351_v16  ;;  %v2141_v61 = vadd.f32 %v4098_v29, %v2126_v46  ;;  %v1854_v8 = vmul.f32 %v5277_v12, %v546_v24 }
 0x15c   :  { %v4168_v48 = vadd.f32 %v809_v50, %v795_v5  ;;  %v2127_v25 = vmul.f32 %v5278_v10, %v546_v24  ;;  %v4172_v28 = vadd.f32 %v1082_v19, %v1068_v44  ;;  %v4174_v52 = vadd.f32 %v1355_v17, %v1341_v0  ;;  %v5404_v24 = vld [vmem:[#allocation87_spill] sm:$0xff]  ;;  %v5406_v50 = vld [vmem:[#allocation89_spill] sm:$0xff] }
 0x15d   :  { %v4176_v21 = vadd.f32 %v1595_v6, %v1581_v3  ;;  %v715_v54 = vmul.f32 %v5348_v63, %v514_v49  ;;  %v4179_v14 = vadd.f32 %v1868_v1, %v1854_v8  ;;  %v988_v29 = vmul.f32 %v5349_v62, %v514_v49  ;;  %v5408_v6 = vld [vmem:[#allocation90_spill] sm:$0xff]  ;;  %v5409_v1 = vld [vmem:[#allocation96_spill] sm:$0xff]  ;;  %v548_v8 = vpop.permute.xlu0 %547 }
 0x15e   :  { %v4181_v11 = vadd.f32 %v2141_v61, %v2127_v25  ;;  %v1261_v43 = vmul.f32 %v5350_v9, %v514_v49  ;;  %v1501_v22 = vmul.f32 %v514_v49, %v5351_v16  ;;  %v1774_v31 = vmul.f32 %v5277_v12, %v514_v49  ;;  %v580_v46 = vpop.permute.xlu1 %579 }
 0x15f   :  { %v730_v32 = vadd.f32 %v4111_v35, %v715_v54  ;;  %v2047_v34 = vmul.f32 %v5278_v10, %v514_v49  ;;  %v1003_v58 = vadd.f32 %v4115_v59, %v988_v29  ;;  %v716_v40 = vmul.f32 %v5404_v24, %v516_v27  ;;  %v5407_v49 = vld [vmem:[#allocation31_spill] sm:$0xff] }
 0x160   :  { %v1276_v39 = vadd.f32 %v4117_v56, %v1261_v43  ;;  %v989_v23 = vmul.f32 %v5405_v13, %v516_v27  ;;  %v1516_v57 = vadd.f32 %v4119_v45, %v1501_v22  ;;  %v1789_v2 = vadd.f32 %v4122_v4, %v1774_v31 }
 0x161   :  { %v2062_v35 = vadd.f32 %v4124_v15, %v2047_v34  ;;  %v1262_v19 = vmul.f32 %v5406_v50, %v516_v27  ;;  %v4197_v47 = vadd.f32 %v730_v32, %v716_v40  ;;  %v1502_v59 = vmul.f32 %v516_v27, %v5407_v49 }
 0x162   :  { %v4199_v17 = vadd.f32 %v1003_v58, %v989_v23  ;;  %v1775_v56 = vmul.f32 %v5408_v6, %v516_v27  ;;  %v2048_v44 = vmul.f32 %v5409_v1, %v516_v27  ;;  %v835_v45 = vmul.f32 %v5348_v63, %v578_v38 }
 0x163   :  { %v4203_v5 = vadd.f32 %v1276_v39, %v1262_v19  ;;  %v1108_v4 = vmul.f32 %v5349_v62, %v578_v38  ;;  %v1517_v15 = vadd.f32 %v1516_v57, %v1502_v59  ;;  %v1381_v3 = vmul.f32 %v5350_v9, %v578_v38  ;;  %v518_v57 = vpop.permute.xlu0 %517 }
 0x164   :  { %v4208_v0 = vadd.f32 %v1789_v2, %v1775_v56  ;;  %v1621_v61 = vmul.f32 %v578_v38, %v5351_v16  ;;  %v4212_v25 = vadd.f32 %v2062_v35, %v2048_v44  ;;  %v850_v54 = vadd.f32 %v4140_v42, %v835_v45  ;;  %v5410_v45 = vld [vmem:[#allocation104_spill] sm:$0xff] }
 0x165   :  { %v1123_v29 = vadd.f32 %v4142_v26, %v1108_v4  ;;  %v1894_v27 = vmul.f32 %v5277_v12, %v578_v38  ;;  %v1396_v63 = vadd.f32 %v4146_v51, %v1381_v3  ;;  %v2167_v62 = vmul.f32 %v5278_v10, %v578_v38 }
 0x166   :  { %v1636_v43 = vadd.f32 %v1635_v41, %v1621_v61  ;;  %v836_v32 = vmul.f32 %v5404_v24, %v580_v46  ;;  %v1109_v22 = vmul.f32 %v5405_v13, %v580_v46  ;;  %v1382_v31 = vmul.f32 %v5406_v50, %v580_v46  ;;  %v550_v41 = vpop.permute.xlu1 %549  ;;  %v5412_v61 = vld [vmem:[#allocation105_spill] sm:$0xff] }
 0x167   :  { %v1909_v9 = vadd.f32 %v4151_v37, %v1894_v27  ;;  %v1622_v34 = vmul.f32 %v580_v46, %v5407_v49  ;;  %v2182_v42 = vadd.f32 %v4155_v18, %v2167_v62  ;;  %v1895_v12 = vmul.f32 %v5408_v6, %v580_v46 }
 0x168   :  { %v4225_v26 = vadd.f32 %v850_v54, %v836_v32  ;;  %v2168_v51 = vmul.f32 %v5409_v1, %v580_v46  ;;  %v4229_v10 = vadd.f32 %v1123_v29, %v1109_v22  ;;  %v4231_v38 = vadd.f32 %v1396_v63, %v1382_v31  ;;  %v5413_v29 = vld [vmem:[#allocation106_spill] sm:$0xff]  ;;  %v582_v32 = vpop.permute.xlu0 %581 }
 0x169   :  { %v4233_v37 = vadd.f32 %v1636_v43, %v1622_v34  ;;  %v796_v58 = vmul.f32 %v5404_v24, %v548_v8  ;;  %v4236_v39 = vadd.f32 %v1909_v9, %v1895_v12  ;;  %v1069_v18 = vmul.f32 %v5405_v13, %v548_v8 }
 0x16a   :  { %v4238_v40 = vadd.f32 %v2182_v42, %v2168_v51  ;;  %v1342_v23 = vmul.f32 %v5406_v50, %v548_v8  ;;  %v1582_v35 = vmul.f32 %v548_v8, %v5407_v49  ;;  %v1855_v19 = vmul.f32 %v5408_v6, %v548_v8 }
 0x16b   :  { %v811_v2 = vadd.f32 %v4168_v48, %v796_v58  ;;  %v2128_v59 = vmul.f32 %v5409_v1, %v548_v8  ;;  %v1084_v56 = vadd.f32 %v4172_v28, %v1069_v18  ;;  %v797_v46 = vmul.f32 %v5363_v30, %v550_v41  ;;  %v5411_v1 = vld [vmem:[#allocation36_spill] sm:$0xff]  ;;  %v520_v8 = vpop.permute.xlu1 %519 }
 0x16c   :  { %v1357_v24 = vadd.f32 %v4174_v52, %v1342_v23  ;;  %v1070_v44 = vmul.f32 %v5364_v53, %v550_v41  ;;  %v1597_v13 = vadd.f32 %v4176_v21, %v1582_v35  ;;  %v1870_v50 = vadd.f32 %v4179_v14, %v1855_v19  ;;  %v5415_v23 = vld [vmem:[#allocation98_spill] sm:$0xff]  ;;  %v5416_v35 = vld [vmem:[#allocation99_spill] sm:$0xff] }
 0x16d   :  { %v2143_v48 = vadd.f32 %v4181_v11, %v2128_v59  ;;  %v1343_v4 = vmul.f32 %v5410_v45, %v550_v41  ;;  %v4254_v3 = vadd.f32 %v811_v2, %v797_v46  ;;  %v1583_v28 = vmul.f32 %v550_v41, %v5411_v1  ;;  %v5417_v59 = vld [vmem:[#allocation34_spill] sm:$0xff] }
 0x16e   :  { %v4256_v6 = vadd.f32 %v1084_v56, %v1070_v44  ;;  %v1856_v52 = vmul.f32 %v5412_v61, %v550_v41  ;;  %v2129_v27 = vmul.f32 %v5413_v29, %v550_v41  ;;  %v717_v21 = vmul.f32 %v5363_v30, %v518_v57  ;;  %v5414_v41 = vld [vmem:[#allocation97_spill] sm:$0xff]  ;;  %v5419_v44 = vld [vmem:[#allocation103_spill] sm:$0xff] }
 0x16f   :  { %v4260_v54 = vadd.f32 %v1357_v24, %v1343_v4  ;;  %v990_v14 = vmul.f32 %v5364_v53, %v518_v57  ;;  %v1598_v11 = vadd.f32 %v1597_v13, %v1583_v28  ;;  %v1263_v43 = vmul.f32 %v5410_v45, %v518_v57  ;;  %v5418_v24 = vld [vmem:[#allocation100_spill] sm:$0xff] }
 0x170   :  { %v4265_v63 = vadd.f32 %v1870_v50, %v1856_v52  ;;  %v1503_v62 = vmul.f32 %v518_v57, %v5411_v1  ;;  %v4269_v9 = vadd.f32 %v2143_v48, %v2129_v27  ;;  %v732_v22 = vadd.f32 %v4197_v47, %v717_v21  ;;  %v552_v27 = vpop.permute.xlu0 %551 }
 0x171   :  { %v1005_v31 = vadd.f32 %v4199_v17, %v990_v14  ;;  %v1776_v34 = vmul.f32 %v5412_v61, %v518_v57  ;;  %v1278_v42 = vadd.f32 %v4203_v5, %v1263_v43  ;;  %v2049_v51 = vmul.f32 %v5413_v29, %v518_v57 }
 0x172   :  { %v1518_v12 = vadd.f32 %v1517_v15, %v1503_v62  ;;  %v718_v58 = vmul.f32 %v5414_v41, %v520_v8  ;;  %v991_v2 = vmul.f32 %v5415_v23, %v520_v8  ;;  %v1264_v19 = vmul.f32 %v5416_v35, %v520_v8  ;;  %v584_v15 = vpop.permute.xlu1 %583 }
 0x173   :  { %v1791_v18 = vadd.f32 %v4208_v0, %v1776_v34  ;;  %v1504_v56 = vmul.f32 %v520_v8, %v5417_v59  ;;  %v2064_v47 = vadd.f32 %v4212_v25, %v2049_v51  ;;  %v1777_v46 = vmul.f32 %v5418_v24, %v520_v8 }
 0x174   :  { %v733_v17 = vadd.f32 %v732_v22, %v718_v58  ;;  %v2050_v5 = vmul.f32 %v5419_v44, %v520_v8  ;;  %v1006_v13 = vadd.f32 %v1005_v31, %v991_v2  ;;  %v1279_v57 = vadd.f32 %v1278_v42, %v1264_v19 }
 0x175   :  { %v1519_v50 = vadd.f32 %v1518_v12, %v1504_v56  ;;  %v837_v48 = vmul.f32 %v5363_v30, %v582_v32  ;;  %v1792_v0 = vadd.f32 %v1791_v18, %v1777_v46  ;;  %v1110_v28 = vmul.f32 %v5364_v53, %v582_v32  ;;  %v490_v18 = vpop.permute.xlu0 %489 }
 0x176   :  { %v2065_v4 = vadd.f32 %v2064_v47, %v2050_v5  ;;  %v1383_v52 = vmul.f32 %v5410_v45, %v582_v32  ;;  %v1623_v21 = vmul.f32 %v582_v32, %v5411_v1  ;;  %v1896_v14 = vmul.f32 %v5412_v61, %v582_v32 }
 0x177   :  { %v852_v25 = vadd.f32 %v4225_v26, %v837_v48  ;;  %v2169_v8 = vmul.f32 %v5413_v29, %v582_v32  ;;  %v1125_v43 = vadd.f32 %v4229_v10, %v1110_v28  ;;  %v838_v30 = vmul.f32 %v5414_v41, %v584_v15  ;;  %v522_v32 = vpop.permute.xlu1 %521 }
 0x178   :  { %v1398_v62 = vadd.f32 %v4231_v38, %v1383_v52  ;;  %v1111_v22 = vmul.f32 %v5415_v23, %v584_v15  ;;  %v1638_v53 = vadd.f32 %v4233_v37, %v1623_v21  ;;  %v1911_v45 = vadd.f32 %v4236_v39, %v1896_v14  ;;  %v5422_v52 = vld [vmem:[#allocation112_spill] sm:$0xff]  ;;  %v5423_v21 = vld [vmem:[#allocation42_spill] sm:$0xff] }
 0x179   :  { %v2184_v26 = vadd.f32 %v4238_v40, %v2169_v8  ;;  %v1384_v31 = vmul.f32 %v5416_v35, %v584_v15  ;;  %v853_v34 = vadd.f32 %v852_v25, %v838_v30  ;;  %v1624_v29 = vmul.f32 %v584_v15, %v5417_v59  ;;  %v5424_v8 = vld [vmem:[#allocation113_spill] sm:$0xff] }
 0x17a   :  { %v1126_v61 = vadd.f32 %v1125_v43, %v1111_v22  ;;  %v1897_v10 = vmul.f32 %v5418_v24, %v584_v15  ;;  %v2170_v42 = vmul.f32 %v5419_v44, %v584_v15  ;;  %v798_v12 = vmul.f32 %v5414_v41, %v552_v27  ;;  %v5425_v43 = vld [vmem:[#allocation114_spill] sm:$0xff] }
 0x17b   :  { %v1399_v38 = vadd.f32 %v1398_v62, %v1384_v31  ;;  %v1071_v37 = vmul.f32 %v5415_v23, %v552_v27  ;;  %v1639_v51 = vadd.f32 %v1638_v53, %v1624_v29  ;;  %v1344_v40 = vmul.f32 %v5416_v35, %v552_v27  ;;  %v5420_v23 = vld [vmem:[#allocation110_spill] sm:$0xff]  ;;  %v5421_v35 = vld [vmem:[#allocation111_spill] sm:$0xff]  ;;  %v5426_v53 = vld [vmem:[#allocation69_spill] sm:$0xff]  ;;  %v554_v29 = vpop.permute.xlu0 %553 }
 0x17c   :  { %v1912_v39 = vadd.f32 %v1911_v45, %v1897_v10  ;;  %v1584_v58 = vmul.f32 %v552_v27, %v5417_v59  ;;  %v2185_v2 = vadd.f32 %v2184_v26, %v2170_v42  ;;  %v813_v19 = vadd.f32 %v4254_v3, %v798_v12  ;;  %v5427_v45 = vld [vmem:[#allocation127_spill] sm:$0xff]  ;;  %v5431_v12 = vld [vmem:[#allocation60_spill] sm:$0xff] }
 0x17d   :  { %v1086_v56 = vadd.f32 %v4256_v6, %v1071_v37  ;;  %v1857_v47 = vmul.f32 %v5418_v24, %v552_v27  ;;  %v1359_v46 = vadd.f32 %v4260_v54, %v1344_v40  ;;  %v2130_v41 = vmul.f32 %v5419_v44, %v552_v27  ;;  %v5432_v37 = vld [vmem:[#allocation84_spill] sm:$0xff] }
 0x17e   :  { %v1599_v5 = vadd.f32 %v1598_v11, %v1584_v58  ;;  %v719_v15 = vmul.f32 %v5420_v23, %v522_v32  ;;  %v992_v28 = vmul.f32 %v5421_v35, %v522_v32  ;;  %v1265_v25 = vmul.f32 %v5422_v52, %v522_v32  ;;  %v586_v11 = vpop.permute.xlu1 %585  ;;  %v5434_v58 = vld [vmem:[#allocation94_spill] sm:$0xff] }
 0x17f   :  { %v1872_v48 = vadd.f32 %v4265_v63, %v1857_v47  ;;  %v1505_v14 = vmul.f32 %v522_v32, %v5423_v21  ;;  %v2145_v3 = vadd.f32 %v4269_v9, %v2130_v41  ;;  %v1778_v24 = vmul.f32 %v5424_v8, %v522_v32  ;;  %v5428_v9 = vld [vmem:[#allocation72_spill] sm:$0xff] }
 0x180   :  { %v734_v6 = vadd.f32 %v733_v17, %v719_v15  ;;  %v2051_v54 = vmul.f32 %v5425_v43, %v522_v32  ;;  %v1007_v62 = vadd.f32 %v1006_v13, %v992_v28  ;;  %v1280_v44 = vadd.f32 %v1279_v57, %v1265_v25  ;;  %v5429_v17 = vld [vmem:[#allocation59_spill] sm:$0xff]  ;;  %v5435_v47 = vld [vmem:[#allocation52_spill] sm:$0xff] }
 0x181   :  { %v1520_v27 = vadd.f32 %v1519_v50, %v1505_v14  ;;  %v679_v30 = vmul.f32 %v5420_v23, %v490_v18  ;;  %v1793_v63 = vadd.f32 %v1792_v0, %v1778_v24  ;;  %v693_v26 = vadd.f32 %v5427_v45, %v5426_v53  ;;  %v5430_v32 = vld [vmem:[#allocation75_spill] sm:$0xff]  ;;  %v5433_v0 = vld [vmem:[#allocation62_spill] sm:$0xff]  ;;  %v5437_v24 = vld [vmem:[#allocation53_spill] sm:$0xff] }
 0x182   :  { %v2066_v22 = vadd.f32 %v2065_v4, %v2051_v54  ;;  %v952_v31 = vmul.f32 %v5421_v35, %v490_v18  ;;  %v966_v10 = vadd.f32 %v5429_v17, %v5428_v9  ;;  %v1225_v42 = vmul.f32 %v5422_v52, %v490_v18  ;;  %v5436_v14 = vld [vmem:[#allocation95_spill] sm:$0xff] }
 0x183   :  { %v1239_v13 = vadd.f32 %v5431_v12, %v5430_v32  ;;  %v1465_v57 = vmul.f32 %v490_v18, %v5423_v21  ;;  %v694_v50 = vadd.f32 %v693_v26, %v679_v30  ;;  %v1479_v4 = vadd.f32 %v5433_v0, %v5432_v37  ;;  %v524_v26 = vpop.permute.xlu1 %523 }
 0x184   :  { %v1738_v40 = vmul.f32 %v5424_v8, %v490_v18  ;;  %v1752_v41 = vadd.f32 %v5435_v47, %v5434_v58  ;;  %v967_v15 = vadd.f32 %v966_v10, %v952_v31  ;;  %v2011_v25 = vmul.f32 %v5425_v43, %v490_v18 }
 0x185   :  { %v1240_v28 = vadd.f32 %v1239_v13, %v1225_v42  ;;  %v2025_v54 = vadd.f32 %v5437_v24, %v5436_v14  ;;  %v1480_v53 = vadd.f32 %v1479_v4, %v1465_v57  ;;  %v839_v9 = vmul.f32 %v5420_v23, %v586_v11  ;;  %v492_v57 = vpop.permute.xlu0 %491 }
 0x186   :  { %v1753_v45 = vadd.f32 %v1752_v41, %v1738_v40  ;;  %v1112_v30 = vmul.f32 %v5421_v35, %v586_v11  ;;  %v1385_v32 = vmul.f32 %v5422_v52, %v586_v11  ;;  %v1625_v12 = vmul.f32 %v586_v11, %v5423_v21 }
 0x187   :  { %v2026_v17 = vadd.f32 %v2025_v54, %v2011_v25  ;;  %v1898_v31 = vmul.f32 %v5424_v8, %v586_v11  ;;  %v854_v10 = vadd.f32 %v853_v34, %v839_v9  ;;  %v2171_v18 = vmul.f32 %v5425_v43, %v586_v11  ;;  %v5438_v11 = vld [vmem:[#allocation107_spill] sm:$0xff] }
 0x188   :  { %v1127_v42 = vadd.f32 %v1126_v61, %v1112_v30  ;;  %v799_v13 = vmul.f32 %v5420_v23, %v554_v29  ;;  %v1400_v37 = vadd.f32 %v1399_v38, %v1385_v32  ;;  %v1640_v0 = vadd.f32 %v1639_v51, %v1625_v12  ;;  %v5439_v38 = vld [vmem:[#allocation108_spill] sm:$0xff] }
 0x189   :  { %v1913_v4 = vadd.f32 %v1912_v39, %v1898_v31  ;;  %v1072_v40 = vmul.f32 %v5421_v35, %v554_v29  ;;  %v2186_v58 = vadd.f32 %v2185_v2, %v2171_v18  ;;  %v1345_v41 = vmul.f32 %v5422_v52, %v554_v29  ;;  %v5440_v39 = vld [vmem:[#allocation109_spill] sm:$0xff]  ;;  %v588_v35 = vpop.permute.xlu1 %587  ;;  %v5441_v52 = vld [vmem:[#allocation40_spill] sm:$0xff]  ;;  %v5442_v31 = vld [vmem:[#allocation115_spill] sm:$0xff] }
 0x18a   :  { %v814_v47 = vadd.f32 %v813_v19, %v799_v13  ;;  %v1585_v25 = vmul.f32 %v554_v29, %v5423_v21  ;;  %v1858_v34 = vmul.f32 %v5424_v8, %v554_v29  ;;  %v2131_v61 = vmul.f32 %v5425_v43, %v554_v29  ;;  %v5443_v18 = vld [vmem:[#allocation116_spill] sm:$0xff]  ;;  %v556_v29 = vpop.permute.xlu0 %555 }
 0x18b   :  { %v1087_v14 = vadd.f32 %v1086_v56, %v1072_v40  ;;  %v720_v24 = vmul.f32 %v5438_v11, %v524_v26  ;;  %v1360_v23 = vadd.f32 %v1359_v46, %v1345_v41  ;;  %v993_v51 = vmul.f32 %v5439_v38, %v524_v26 }
 0x18c   :  { %v1600_v54 = vadd.f32 %v1599_v5, %v1585_v25  ;;  %v1266_v9 = vmul.f32 %v5440_v39, %v524_v26  ;;  %v1873_v2 = vadd.f32 %v1872_v48, %v1858_v34  ;;  %v2146_v19 = vadd.f32 %v2145_v3, %v2131_v61 }
 0x18d   :  { %v735_v30 = vadd.f32 %v734_v6, %v720_v24  ;;  %v1506_v32 = vmul.f32 %v524_v26, %v5441_v52  ;;  %v1008_v12 = vadd.f32 %v1007_v62, %v993_v51  ;;  %v1779_v8 = vmul.f32 %v5442_v31, %v524_v26  ;;  %v526_v51 = vpop.permute.xlu1 %525 }
 0x18e   :  { %v1281_v56 = vadd.f32 %v1280_v44, %v1266_v9  ;;  %v2052_v43 = vmul.f32 %v5443_v18, %v524_v26  ;;  %v680_v46 = vmul.f32 %v5438_v11, %v492_v57  ;;  %v953_v5 = vmul.f32 %v5439_v38, %v492_v57 }
 0x18f   :  { %v1521_v13 = vadd.f32 %v1520_v27, %v1506_v32  ;;  %v1226_v40 = vmul.f32 %v5440_v39, %v492_v57  ;;  %v1794_v41 = vadd.f32 %v1793_v63, %v1779_v8  ;;  %v1466_v3 = vmul.f32 %v492_v57, %v5441_v52 }
 0x190   :  { %v2067_v48 = vadd.f32 %v2066_v22, %v2052_v43  ;;  %v1739_v6 = vmul.f32 %v5442_v31, %v492_v57  ;;  %v695_v62 = vadd.f32 %v694_v50, %v680_v46  ;;  %v968_v44 = vadd.f32 %v967_v15, %v953_v5 }
 0x191   :  { %v1241_v25 = vadd.f32 %v1240_v28, %v1226_v40  ;;  %v2012_v34 = vmul.f32 %v5443_v18, %v492_v57  ;;  %v1481_v26 = vadd.f32 %v1480_v53, %v1466_v3  ;;  %v840_v27 = vmul.f32 %v5438_v11, %v588_v35  ;;  %v494_v53 = vpop.permute.xlu0 %493 }
 0x192   :  { %v1754_v61 = vadd.f32 %v1753_v45, %v1739_v6  ;;  %v1113_v24 = vmul.f32 %v5439_v38, %v588_v35  ;;  %v1386_v63 = vmul.f32 %v5440_v39, %v588_v35  ;;  %v1626_v22 = vmul.f32 %v588_v35, %v5441_v52 }
 0x193   :  { %v2027_v9 = vadd.f32 %v2026_v17, %v2012_v34  ;;  %v1899_v32 = vmul.f32 %v5442_v31, %v588_v35  ;;  %v4366_v8 = vadd.f32 %v854_v10, %v840_v27  ;;  %v2172_v15 = vmul.f32 %v5443_v18, %v588_v35  ;;  %v590_v34 = vpop.permute.xlu1 %589 }
 0x194   :  { %v4368_v50 = vadd.f32 %v1127_v42, %v1113_v24  ;;  %v800_v28 = vmul.f32 %v5438_v11, %v556_v29  ;;  %v4372_v45 = vadd.f32 %v1400_v37, %v1386_v63  ;;  %v4374_v57 = vadd.f32 %v1640_v0, %v1626_v22  ;;  %v5444_v0 = vld [vmem:[#allocation122_spill] sm:$0xff]  ;;  %v5450_v24 = vld [vmem:[#allocation43_spill] sm:$0xff] }
 0x195   :  { %v4376_v17 = vadd.f32 %v1913_v4, %v1899_v32  ;;  %v1073_v43 = vmul.f32 %v5439_v38, %v556_v29  ;;  %v4379_v46 = vadd.f32 %v2186_v58, %v2172_v15  ;;  %v1346_v10 = vmul.f32 %v5440_v39, %v556_v29  ;;  %v5446_v58 = vld [vmem:[#allocation123_spill] sm:$0xff] }
 0x196   :  { %v4381_v5 = vadd.f32 %v814_v47, %v800_v28  ;;  %v1586_v42 = vmul.f32 %v556_v29, %v5441_v52  ;;  %v1859_v11 = vmul.f32 %v5442_v31, %v556_v29  ;;  %v2132_v37 = vmul.f32 %v5443_v18, %v556_v29  ;;  %v5447_v47 = vld [vmem:[#allocation124_spill] sm:$0xff]  ;;  %v5451_v29 = vld [vmem:[#allocation125_spill] sm:$0xff] }
 0x197   :  { %v4385_v35 = vadd.f32 %v1087_v14, %v1073_v43  ;;  %v721_v40 = vmul.f32 %v5444_v0, %v526_v51  ;;  %v4390_v4 = vadd.f32 %v1360_v23, %v1346_v10  ;;  %v994_v38 = vmul.f32 %v5446_v58, %v526_v51  ;;  %v5452_v23 = vld [vmem:[#allocation126_spill] sm:$0xff] }
 0x198   :  { %v4392_v3 = vadd.f32 %v1600_v54, %v1586_v42  ;;  %v1267_v6 = vmul.f32 %v5447_v47, %v526_v51  ;;  %v4396_v39 = vadd.f32 %v1873_v2, %v1859_v11  ;;  %v4398_v27 = vadd.f32 %v2146_v19, %v2132_v37  ;;  %v558_v54 = vpop.permute.xlu0 %557 }
 0x199   :  { %v736_v14 = vadd.f32 %v735_v30, %v721_v40  ;;  %v1507_v31 = vmul.f32 %v526_v51, %v5450_v24  ;;  %v1009_v63 = vadd.f32 %v1008_v12, %v994_v38  ;;  %v1780_v22 = vmul.f32 %v5451_v29, %v526_v51 }
 0x19a   :  { %5445 = vst [vmem:[#allocation56_spill] sm:$0xff] %v4392_v3  ;;  %5448 = vst [vmem:[#allocation54_spill] sm:$0xff] %v4396_v39  ;;  %v1282_v18 = vadd.f32 %v1281_v56, %v1267_v6  ;;  %v2053_v32 = vmul.f32 %v5452_v23, %v526_v51  ;;  %v681_v28 = vmul.f32 %v5444_v0, %v494_v53 }
 0x19b   :  { %5449 = vst [vmem:[#allocation55_spill] sm:$0xff] %v4398_v27  ;;  %v1522_v15 = vadd.f32 %v1521_v13, %v1507_v31  ;;  %v954_v43 = vmul.f32 %v5446_v58, %v494_v53  ;;  %v1227_v2 = vmul.f32 %v5447_v47, %v494_v53  ;;  %v1795_v10 = vadd.f32 %v1794_v41, %v1780_v22 }
 0x19c   :  { %v2068_v19 = vadd.f32 %v2067_v48, %v2053_v32  ;;  %v1467_v30 = vmul.f32 %v494_v53, %v5450_v24  ;;  %v1740_v42 = vmul.f32 %v5451_v29, %v494_v53  ;;  %v696_v12 = vadd.f32 %v695_v62, %v681_v28  ;;  %v528_v48 = vpop.permute.xlu1 %527  ;;  %v4444_v6 = vpop.permute.xlu0 %495  ;;  %v5456_v32 = vld [vmem:[#allocation117_spill] sm:$0xff]  ;;  %v5457_v28 = vld [vmem:[#allocation118_spill] sm:$0xff] }
 0x19d   :  { %v969_v56 = vadd.f32 %v968_v44, %v954_v43  ;;  %v4408_v11 = vadd.f32 %v1241_v25, %v1227_v2  ;;  %v2013_v51 = vmul.f32 %v5452_v23, %v494_v53  ;;  %v4416_v40 = vmul.f32 %v5444_v0, %v590_v34 }
 0x19e   :  { %v4411_v37 = vadd.f32 %v1481_v26, %v1467_v30  ;;  %v4413_v13 = vadd.f32 %v1754_v61, %v1740_v42  ;;  %v4419_v41 = vmul.f32 %v5446_v58, %v590_v34  ;;  %v4424_v62 = vmul.f32 %v5447_v47, %v590_v34  ;;  %v5459_v30 = vld [vmem:[#allocation39_spill] sm:$0xff]  ;;  %v5460_v42 = vld [vmem:[#allocation120_spill] sm:$0xff] }
 0x19f   :  { %v4421_v38 = vadd.f32 %v2027_v9, %v2013_v51  ;;  %v4427_v44 = vmul.f32 %v590_v34, %v5450_v24  ;;  %v4430_v25 = vmul.f32 %v5451_v29, %v590_v34  ;;  %v4433_v26 = vmul.f32 %v5452_v23, %v590_v34 }
 0x1a0   :  { %v4436_v61 = vmul.f32 %v5444_v0, %v558_v54  ;;  %v4439_v53 = vmul.f32 %v5446_v58, %v558_v54  ;;  %v4442_v9 = vmul.f32 %v5447_v47, %v558_v54  ;;  %v4447_v31 = vmul.f32 %v558_v54, %v5450_v24  ;;  %v5458_v58 = vld [vmem:[#allocation119_spill] sm:$0xff] }
 0x1a1   :  { %v4450_v22 = vmul.f32 %v5451_v29, %v558_v54  ;;  %v4453_v34 = vmul.f32 %v5452_v23, %v558_v54  ;;  %v722_v0 = vmul.f32 %v5456_v32, %v528_v48  ;;  %v995_v43 = vmul.f32 %v5457_v28, %v528_v48 }
 0x1a2   :  { %5453 = vst [vmem:[#allocation47_spill] sm:$0xff] %v4447_v31  ;;  %v1268_v2 = vmul.f32 %v5458_v58, %v528_v48  ;;  %v1508_v47 = vmul.f32 %v528_v48, %v5459_v30  ;;  %v1781_v51 = vmul.f32 %v5460_v42, %v528_v48  ;;  %v2054_v24 = vmul.f32 %v5461_v36, %v528_v48 }
 0x1a3   :  { %5454 = vst [vmem:[#allocation50_spill] sm:$0xff] %v4450_v22  ;;  %5455 = vst [vmem:[#allocation74_spill] sm:$0xff] %v4453_v34  ;;  %v737_v60 = vadd.f32 %v736_v14, %v722_v0  ;;  %v682_v29 = vmul.f32 %v5456_v32, %v4444_v6  ;;  %v955_v23 = vmul.f32 %v5457_v28, %v4444_v6 }
 0x1a4   :  { %v1010_v54 = vadd.f32 %v1009_v63, %v995_v43  ;;  %v1283_v52 = vadd.f32 %v1282_v18, %v1268_v2  ;;  %v1523_v7 = vadd.f32 %v1522_v15, %v1508_v47  ;;  %v1796_v21 = vadd.f32 %v1795_v10, %v1781_v51 }
 0x1a5   :  { %v738_v20 = vrot.slane %v737_v60, 4  ;;  %v2069_v59 = vadd.f32 %v2068_v19, %v2054_v24  ;;  %v697_v33 = vadd.f32 %v696_v12, %v682_v29  ;;  %v970_v1 = vadd.f32 %v969_v56, %v955_v23 }
 0x1a6   :  { %v1011_v55 = vrot.slane %v1010_v54, 4  ;;  %v1284_v49 = vrot.slane %v1283_v52, 4  ;;  %v1524_v16 = vrot.slane %v1523_v7, 4  ;;  %v1797_v14 = vrot.slane %v1796_v21, 4 }
 0x1a7   :  { %v739_v0 = vadd.f32 %v738_v20, %v737_v60  ;;  %v2070_v48 = vrot.slane %v2069_v59, 4  ;;  %v698_v27 = vrot.slane %v697_v33, 4  ;;  %v971_v34 = vrot.slane %v970_v1, 4  ;;  %v706_v20 = vld [vmem:[%s4791_s3 + $0x2] sm:$0x1] }
 0x1a8   :  { %v1012_v39 = vadd.f32 %v1011_v55, %v1010_v54  ;;  %v1285_v22 = vadd.f32 %v1284_v49, %v1283_v52  ;;  %v1525_v3 = vadd.f32 %v1524_v16, %v1523_v7  ;;  %v1798_v31 = vadd.f32 %v1797_v14, %v1796_v21  ;;  %v1252_v49 = vld [vmem:[%s4791_s3 + $0xe] sm:$0x1] }
 0x1a9   :  { %v740_v63 = vrot.slane %v739_v0, 2  ;;  %v2071_v18 = vadd.f32 %v2070_v48, %v2069_v59  ;;  %v699_v15 = vadd.f32 %v698_v27, %v697_v33  ;;  %v972_v10 = vadd.f32 %v971_v34, %v970_v1  ;;  %v979_v33 = vld [vmem:[%s4791_s3 + $0x8] sm:$0x1]  ;;  %v1492_v27 = vld [vmem:[%s4791_s3 + $0x14] sm:$0x1] }
 0x1aa   :  { %v1013_v43 = vrot.slane %v1012_v39, 2  ;;  %v1286_v24 = vrot.slane %v1285_v22, 2  ;;  %v1526_v19 = vrot.slane %v1525_v3, 2  ;;  %v1799_v12 = vrot.slane %v1798_v31, 2  ;;  %v1765_v34 = vld [vmem:[%s4791_s3 + $0x1a] sm:$0x1] }
 0x1ab   :  { %v741_v56 = vadd.f32 %v740_v63, %v739_v0  ;;  %v2072_v2 = vrot.slane %v2071_v18, 2  ;;  %v700_v47 = vrot.slane %v699_v15, 2  ;;  %v973_v51 = vrot.slane %v972_v10, 2  ;;  %v2038_v0 = vld [vmem:[%s4791_s3 + $0x20] sm:$0x1] }
 0x1ac   :  { %v1014_v55 = vadd.f32 %v1013_v43, %v1012_v39  ;;  %v1287_v60 = vadd.f32 %v1286_v24, %v1285_v22  ;;  %v1527_v16 = vadd.f32 %v1526_v19, %v1525_v3  ;;  %v1800_v7 = vadd.f32 %v1799_v12, %v1798_v31  ;;  %v939_v43 = vld [vmem:[%s4791_s3 + $0x7] sm:$0x1] }
 0x1ad   :  { %v742_v1 = vrot.slane %v741_v56, 1  ;;  %v2073_v59 = vadd.f32 %v2072_v2, %v2071_v18  ;;  %v701_v21 = vadd.f32 %v700_v47, %v699_v15  ;;  %v974_v52 = vadd.f32 %v973_v51, %v972_v10  ;;  %v666_v10 = vld [vmem:[%s4791_s3 + $0x1] sm:$0x1]  ;;  %v4489_v2 = vpop.permute.xlu1 %591 }
 0x1ae   :  { %v1015_v39 = vrot.slane %v1014_v55, 1  ;;  %v1288_v22 = vrot.slane %v1287_v60, 1  ;;  %v1528_v3 = vrot.slane %v1527_v16, 1  ;;  %v1801_v31 = vrot.slane %v1800_v7, 1 }
 0x1af   :  { %v743_v29 = vadd.f32 %v742_v1, %v741_v56  ;;  %v2074_v23 = vrot.slane %v2073_v59, 1  ;;  %v702_v54 = vrot.slane %v701_v21, 1  ;;  %v975_v14 = vrot.slane %v974_v52, 1 }
 0x1b0   :  { %v1016_v48 = vadd.f32 %v1015_v39, %v1014_v55  ;;  %v1289_v63 = vadd.f32 %v1288_v22, %v1287_v60  ;;  %v1529_v18 = vadd.f32 %v1528_v3, %v1527_v16  ;;  %v1802_v15 = vadd.f32 %v1801_v31, %v1800_v7 }
 0x1b1   :  { %v744_v24 = vadd.f32 %v743_v29, %v706_v20  ;;  %v2075_v19 = vadd.f32 %v2074_v23, %v2073_v59  ;;  %v703_v12 = vadd.f32 %v702_v54, %v701_v21  ;;  %v976_v56 = vadd.f32 %v975_v14, %v974_v52 }
 0x1b2   :  { %v1017_v47 = vadd.f32 %v1016_v48, %v979_v33  ;;  %v1290_v51 = vadd.f32 %v1289_v63, %v1252_v49  ;;  %v1530_v55 = vadd.f32 %v1529_v18, %v1492_v27  ;;  %v1803_v60 = vadd.f32 %v1802_v15, %v1765_v34 }
 0x1b3   :  { %745 = vst [vmem:[%s4791_s3 + $0x2] sm:$0x1] %v744_v24  ;;  %v2076_v16 = vadd.f32 %v2075_v19, %v2038_v0  ;;  %v704_v7 = vadd.f32 %v703_v12, %v666_v10  ;;  %v977_v1 = vadd.f32 %v976_v56, %v939_v43  ;;  %v1228_v39 = vmul.f32 %v5458_v58, %v4444_v6 }
 0x1b4   :  { %1018 = vst [vmem:[%s4791_s3 + $0x8] sm:$0x1] %v1017_v47  ;;  %1291 = vst [vmem:[%s4791_s3 + $0xe] sm:$0x1] %v1290_v51  ;;  %v1468_v20 = vmul.f32 %v4444_v6, %v5459_v30  ;;  %v1741_v33 = vmul.f32 %v5460_v42, %v4444_v6  ;;  %v2014_v49 = vmul.f32 %v5461_v36, %v4444_v6 }
 0x1b5   :  { %1531 = vst [vmem:[%s4791_s3 + $0x14] sm:$0x1] %v1530_v55  ;;  %1804 = vst [vmem:[%s4791_s3 + $0x1a] sm:$0x1] %v1803_v60  ;;  %v842_v59 = vmul.f32 %v5456_v32, %v4489_v2  ;;  %v1243_v21 = vadd.f32 %v4408_v11, %v1228_v39  ;;  %v856_v6 = vadd.f32 %v4366_v8, %v4416_v40 }
 0x1b6   :  { %2077 = vst [vmem:[%s4791_s3 + $0x20] sm:$0x1] %v2076_v16  ;;  %705 = vst [vmem:[%s4791_s3 + $0x1] sm:$0x1] %v704_v7  ;;  %v1115_v52 = vmul.f32 %v5457_v28, %v4489_v2  ;;  %v1129_v27 = vadd.f32 %v4368_v50, %v4419_v41  ;;  %v1483_v22 = vadd.f32 %v4411_v37, %v1468_v20 }
 0x1b7   :  { %978 = vst [vmem:[%s4791_s3 + $0x7] sm:$0x1] %v977_v1  ;;  %v1756_v3 = vadd.f32 %v4413_v13, %v1741_v33  ;;  %v2029_v31 = vadd.f32 %v4421_v38, %v2014_v49  ;;  %v1388_v34 = vmul.f32 %v5458_v58, %v4489_v2  ;;  %v1244_v29 = vrot.slane %v1243_v21, 4  ;;  %v1452_v49 = vld [vmem:[%s4791_s3 + $0x13] sm:$0x1] }
 0x1b8   :  { %v857_v11 = vadd.f32 %v856_v6, %v842_v59  ;;  %v1130_v23 = vadd.f32 %v1129_v27, %v1115_v52  ;;  %v1402_v8 = vadd.f32 %v4372_v45, %v4424_v62  ;;  %v1484_v40 = vrot.slane %v1483_v22, 4  ;;  %v1725_v27 = vld [vmem:[%s4791_s3 + $0x19] sm:$0x1] }
 0x1b9   :  { %v1757_v54 = vrot.slane %v1756_v3, 4  ;;  %v2030_v14 = vrot.slane %v2029_v31, 4  ;;  %v1628_v50 = vmul.f32 %v4489_v2, %v5459_v30  ;;  %v1245_v37 = vadd.f32 %v1244_v29, %v1243_v21 }
 0x1ba   :  { %v858_v41 = vrot.slane %v857_v11, 4  ;;  %v1131_v13 = vrot.slane %v1130_v23, 4  ;;  %v1403_v0 = vadd.f32 %v1402_v8, %v1388_v34  ;;  %v1485_v38 = vadd.f32 %v1484_v40, %v1483_v22  ;;  %v1998_v22 = vld [vmem:[%s4791_s3 + $0x1f] sm:$0x1]  ;;  %v826_v40 = vld [vmem:[%s4791_s3 + $0x5] sm:$0x1] }
 0x1bb   :  { %v1758_v48 = vadd.f32 %v1757_v54, %v1756_v3  ;;  %v2031_v63 = vadd.f32 %v2030_v14, %v2029_v31  ;;  %v1642_v18 = vadd.f32 %v4374_v57, %v4427_v44  ;;  %v1246_v15 = vrot.slane %v1245_v37, 2  ;;  %v1212_v57 = vld [vmem:[%s4791_s3 + $0xd] sm:$0x1]  ;;  %v1099_v54 = vld [vmem:[%s4791_s3 + $0xb] sm:$0x1] }
 0x1bc   :  { %v859_v10 = vadd.f32 %v858_v41, %v857_v11  ;;  %v1132_v43 = vadd.f32 %v1131_v13, %v1130_v23  ;;  %v1404_v45 = vrot.slane %v1403_v0, 4  ;;  %v1486_v62 = vrot.slane %v1485_v38, 2 }
 0x1bd   :  { %v1759_v24 = vrot.slane %v1758_v48, 2  ;;  %v2032_v19 = vrot.slane %v2031_v63, 2  ;;  %v1643_v12 = vadd.f32 %v1642_v18, %v1628_v50  ;;  %v1247_v56 = vadd.f32 %v1246_v15, %v1245_v37  ;;  %v560_v15 = vpop.permute.xlu0 %559 }
 0x1be   :  { %v860_v47 = vrot.slane %v859_v10, 2  ;;  %v1133_v51 = vrot.slane %v1132_v43, 2  ;;  %v1405_v55 = vadd.f32 %v1404_v45, %v1403_v0  ;;  %v1487_v60 = vadd.f32 %v1486_v62, %v1485_v38 }
 0x1bf   :  { %v1760_v16 = vadd.f32 %v1759_v24, %v1758_v48  ;;  %v2033_v7 = vadd.f32 %v2032_v19, %v2031_v63  ;;  %v1644_v1 = vrot.slane %v1643_v12, 4  ;;  %v1248_v44 = vrot.slane %v1247_v56, 1  ;;  %v1372_v63 = vld [vmem:[%s4791_s3 + $0x11] sm:$0x1] }
 0x1c0   :  { %v861_v39 = vadd.f32 %v860_v47, %v859_v10  ;;  %v1134_v20 = vadd.f32 %v1133_v51, %v1132_v43  ;;  %v1406_v33 = vrot.slane %v1405_v55, 2  ;;  %v1488_v59 = vrot.slane %v1487_v60, 1  ;;  %v1612_v47 = vld [vmem:[%s4791_s3 + $0x17] sm:$0x1] }
 0x1c1   :  { %v1761_v21 = vrot.slane %v1760_v16, 1  ;;  %v2034_v6 = vrot.slane %v2033_v7, 1  ;;  %v1645_v52 = vadd.f32 %v1644_v1, %v1643_v12  ;;  %v1249_v3 = vadd.f32 %v1248_v44, %v1247_v56 }
 0x1c2   :  { %v862_v31 = vrot.slane %v861_v39, 1  ;;  %v1135_v34 = vrot.slane %v1134_v20, 1  ;;  %v1407_v29 = vadd.f32 %v1406_v33, %v1405_v55  ;;  %v1489_v11 = vadd.f32 %v1488_v59, %v1487_v60  ;;  %v5465_v59 = vld [vmem:[#allocation54_spill] sm:$0xff] }
 0x1c3   :  { %v1762_v23 = vadd.f32 %v1761_v21, %v1760_v16  ;;  %v2035_v8 = vadd.f32 %v2034_v6, %v2033_v7  ;;  %v1646_v14 = vrot.slane %v1645_v52, 2  ;;  %v1250_v50 = vadd.f32 %v1249_v3, %v1212_v57 }
 0x1c4   :  { %v863_v37 = vadd.f32 %v862_v31, %v861_v39  ;;  %v1136_v41 = vadd.f32 %v1135_v34, %v1134_v20  ;;  %v1408_v13 = vrot.slane %v1407_v29, 1  ;;  %v1490_v0 = vadd.f32 %v1489_v11, %v1452_v49  ;;  %v5462_v20 = vld [vmem:[#allocation47_spill] sm:$0xff] }
 0x1c5   :  { %v1763_v38 = vadd.f32 %v1762_v23, %v1725_v27  ;;  %v2036_v48 = vadd.f32 %v2035_v8, %v1998_v22  ;;  %v1647_v18 = vadd.f32 %v1646_v14, %v1645_v52  ;;  %1251 = vst [vmem:[%s4791_s3 + $0xd] sm:$0x1] %v1250_v50  ;;  %v1901_v62 = vmul.f32 %v5460_v42, %v4489_v2  ;;  %v5466_v8 = vld [vmem:[#allocation74_spill] sm:$0xff] }
 0x1c6   :  { %v864_v10 = vadd.f32 %v863_v37, %v826_v40  ;;  %v1137_v43 = vadd.f32 %v1136_v41, %v1099_v54  ;;  %v1409_v45 = vadd.f32 %v1408_v13, %v1407_v29  ;;  %1491 = vst [vmem:[%s4791_s3 + $0x13] sm:$0x1] %v1490_v0  ;;  %v1915_v19 = vadd.f32 %v4376_v17, %v4430_v25  ;;  %v5467_v40 = vld [vmem:[#allocation55_spill] sm:$0xff] }
 0x1c7   :  { %1764 = vst [vmem:[%s4791_s3 + $0x19] sm:$0x1] %v1763_v38  ;;  %2037 = vst [vmem:[%s4791_s3 + $0x1f] sm:$0x1] %v2036_v48  ;;  %v1648_v24 = vrot.slane %v1647_v18, 1  ;;  %v2174_v12 = vmul.f32 %v5461_v36, %v4489_v2  ;;  %v2188_v56 = vadd.f32 %v4379_v46, %v4433_v26  ;;  %v802_v17 = vmul.f32 %v5456_v32, %v560_v15 }
 0x1c8   :  { %865 = vst [vmem:[%s4791_s3 + $0x5] sm:$0x1] %v864_v10  ;;  %1138 = vst [vmem:[%s4791_s3 + $0xb] sm:$0x1] %v1137_v43  ;;  %v1410_v51 = vadd.f32 %v1409_v45, %v1372_v63  ;;  %v816_v25 = vadd.f32 %v4381_v5, %v4436_v61  ;;  %v1075_v46 = vmul.f32 %v5457_v28, %v560_v15  ;;  %v2158_v43 = vld [vmem:[%s4791_s3 + $0x23] sm:$0x1] }
 0x1c9   :  { %v1649_v26 = vadd.f32 %v1648_v24, %v1647_v18  ;;  %v1916_v2 = vadd.f32 %v1915_v19, %v1901_v62  ;;  %v2189_v55 = vadd.f32 %v2188_v56, %v2174_v12  ;;  %v1089_v60 = vadd.f32 %v4385_v35, %v4439_v53  ;;  %v5463_v35 = vld [vmem:[#allocation56_spill] sm:$0xff] }
 0x1ca   :  { %1411 = vst [vmem:[%s4791_s3 + $0x11] sm:$0x1] %v1410_v51  ;;  %v817_v16 = vadd.f32 %v816_v25, %v802_v17  ;;  %v1348_v7 = vmul.f32 %v5458_v58, %v560_v15  ;;  %v1362_v32 = vadd.f32 %v4390_v4, %v4442_v9  ;;  %v1588_v5 = vmul.f32 %v560_v15, %v5459_v30  ;;  %v5464_v9 = vld [vmem:[#allocation50_spill] sm:$0xff]  ;;  %v1059_v25 = vld [vmem:[%s4791_s3 + $0xa] sm:$0x1] }
 0x1cb   :  { %v1650_v61 = vadd.f32 %v1649_v26, %v1612_v47  ;;  %v1917_v28 = vrot.slane %v1916_v2, 4  ;;  %v2190_v1 = vrot.slane %v2189_v55, 4  ;;  %v1090_v57 = vadd.f32 %v1089_v60, %v1075_v46  ;;  %v786_v47 = vld [vmem:[%s4791_s3 + $0x4] sm:$0x1] }
 0x1cc   :  { %v818_v44 = vrot.slane %v817_v16, 4  ;;  %v1363_v39 = vadd.f32 %v1362_v32, %v1348_v7  ;;  %v1602_v53 = vadd.f32 %v5463_v35, %v5462_v20  ;;  %v1861_v33 = vmul.f32 %v5460_v42, %v560_v15  ;;  %v1332_v7 = vld [vmem:[%s4791_s3 + $0x10] sm:$0x1]  ;;  %v5468_v35 = vld [vmem:[#allocation22_spill] sm:$0xff] }
 0x1cd   :  { %1651 = vst [vmem:[%s4791_s3 + $0x17] sm:$0x1] %v1650_v61  ;;  %v1918_v58 = vadd.f32 %v1917_v28, %v1916_v2  ;;  %v2191_v49 = vadd.f32 %v2190_v1, %v2189_v55  ;;  %v1091_v4 = vrot.slane %v1090_v57, 4  ;;  %v1875_v21 = vadd.f32 %v5465_v59, %v5464_v9  ;;  %v1845_v9 = vld [vmem:[%s4791_s3 + $0x1c] sm:$0x1] }
 0x1ce   :  { %v819_v6 = vadd.f32 %v818_v44, %v817_v16  ;;  %v1364_v52 = vrot.slane %v1363_v39, 4  ;;  %v1603_v27 = vadd.f32 %v1602_v53, %v1588_v5  ;;  %v2134_v22 = vmul.f32 %v5461_v36, %v560_v15  ;;  %v1885_v36 = vld [vmem:[%s4791_s3 + $0x1d] sm:$0x1]  ;;  %v1572_v44 = vld [vmem:[%s4791_s3 + $0x16] sm:$0x1] }
 0x1cf   :  { %v1919_v3 = vrot.slane %v1918_v58, 2  ;;  %v2192_v31 = vrot.slane %v2191_v49, 2  ;;  %v1092_v34 = vadd.f32 %v1091_v4, %v1090_v57  ;;  %v1876_v29 = vadd.f32 %v1875_v21, %v1861_v33  ;;  %v5469_v53 = vld [vmem:[#allocation33_spill] sm:$0xff] }
 0x1d0   :  { %v820_v42 = vrot.slane %v819_v6, 2  ;;  %v1365_v11 = vadd.f32 %v1364_v52, %v1363_v39  ;;  %v1604_v23 = vrot.slane %v1603_v27, 4  ;;  %v2148_v54 = vadd.f32 %v5467_v40, %v5466_v8  ;;  %v5472_v52 = vld [vmem:[#allocation19_spill] sm:$0xff]  ;;  %v5478_v8 = vld [vmem:[#allocation25_spill] sm:$0xff]  ;;  %v5479_v40 = vld [vmem:[#allocation40_spill] sm:$0xff] }
 0x1d1   :  { %v1920_v14 = vadd.f32 %v1919_v3, %v1918_v58  ;;  %v2193_v50 = vadd.f32 %v2192_v31, %v2191_v49  ;;  %v1093_v37 = vrot.slane %v1092_v34, 2  ;;  %v1877_v41 = vrot.slane %v1876_v29, 4  ;;  %v5470_v58 = vld [vmem:[#allocation24_spill] sm:$0xff]  ;;  %v5471_v49 = vld [vmem:[#allocation31_spill] sm:$0xff] }
 0x1d2   :  { %v821_v13 = vadd.f32 %v820_v42, %v819_v6  ;;  %v1366_v0 = vrot.slane %v1365_v11, 2  ;;  %v1605_v38 = vadd.f32 %v1604_v23, %v1603_v27  ;;  %v2149_v48 = vadd.f32 %v2148_v54, %v2134_v22  ;;  %v5473_v27 = vld [vmem:[#allocation36_spill] sm:$0xff]  ;;  %v5476_v42 = vld [vmem:[#allocation26_spill] sm:$0xff] }
 0x1d3   :  { %v1921_v63 = vrot.slane %v1920_v14, 1  ;;  %v2194_v18 = vrot.slane %v2193_v50, 1  ;;  %v1094_v15 = vadd.f32 %v1093_v37, %v1092_v34  ;;  %v1878_v10 = vadd.f32 %v1877_v41, %v1876_v29  ;;  %v5474_v31 = vld [vmem:[#allocation20_spill] sm:$0xff]  ;;  %v5475_v34 = vld [vmem:[#allocation34_spill] sm:$0xff]  ;;  %v5480_v37 = vld [vmem:[#allocation29_spill] sm:$0xff] }
 0x1d4   :  { %v822_v45 = vrot.slane %v821_v13, 1  ;;  %v1367_v62 = vadd.f32 %v1366_v0, %v1365_v11  ;;  %v1606_v24 = vrot.slane %v1605_v38, 2  ;;  %v2150_v19 = vrot.slane %v2149_v48, 4  ;;  %v5477_v11 = vld [vmem:[#allocation42_spill] sm:$0xff]  ;;  %v5481_v41 = vld [vmem:[#allocation43_spill] sm:$0xff]  ;;  %v5482_v0 = vld [vmem:[#allocation28_spill] sm:$0xff] }
 0x1d5   :  { %v1922_v12 = vadd.f32 %v1921_v63, %v1920_v14  ;;  %v2195_v56 = vadd.f32 %v2194_v18, %v2193_v50  ;;  %v1095_v51 = vrot.slane %v1094_v15, 1  ;;  %v1879_v17 = vrot.slane %v1878_v10, 2 }
 0x1d6   :  { %v823_v46 = vadd.f32 %v822_v45, %v821_v13  ;;  %v1368_v26 = vrot.slane %v1367_v62, 1  ;;  %v1607_v2 = vadd.f32 %v1606_v24, %v1605_v38  ;;  %v2151_v55 = vadd.f32 %v2150_v19, %v2149_v48  ;;  %v2118_v48 = vld [vmem:[%s4791_s3 + $0x22] sm:$0x1] }
 0x1d7   :  { %v1923_v60 = vadd.f32 %v1922_v12, %v1885_v36  ;;  %v2196_v16 = vadd.f32 %v2195_v56, %v2158_v43  ;;  %v1096_v32 = vadd.f32 %v1095_v51, %v1094_v15  ;;  %v1880_v5 = vadd.f32 %v1879_v17, %v1878_v10 }
 0x1d8   :  { %v824_v61 = vadd.f32 %v823_v46, %v786_v47  ;;  %v1369_v28 = vadd.f32 %v1368_v26, %v1367_v62  ;;  %v1608_v1 = vrot.slane %v1607_v2, 1  ;;  %v2152_v57 = vrot.slane %v2151_v55, 2 }
 0x1d9   :  { %1924 = vst [vmem:[%s4791_s3 + $0x1d] sm:$0x1] %v1923_v60  ;;  %2197 = vst [vmem:[%s4791_s3 + $0x23] sm:$0x1] %v2196_v16  ;;  %v1097_v39 = vadd.f32 %v1096_v32, %v1059_v25  ;;  %v1881_v20 = vrot.slane %v1880_v5, 1  ;;  %v280_v33 = vadd.f32 %v5469_v53, %v5468_v35  ;;  %v281_v4 = vadd.f32 %v5471_v49, %v5470_v58 }
 0x1da   :  { %825 = vst [vmem:[%s4791_s3 + $0x4] sm:$0x1] %v824_v61  ;;  %v1370_v59 = vadd.f32 %v1369_v28, %v1332_v7  ;;  %v1609_v21 = vadd.f32 %v1608_v1, %v1607_v2  ;;  %v2153_v6 = vadd.f32 %v2152_v57, %v2151_v55  ;;  %v282_v22 = vadd.f32 %v5473_v27, %v5472_v52  ;;  %v5483_v1 = vld [vmem:[#allocation16_spill] sm:$0xff]  ;;  %v5484_v57 = vld [vmem:[#allocation18_spill] sm:$0xff] }
 0x1db   :  { %1098 = vst [vmem:[%s4791_s3 + $0xa] sm:$0x1] %v1097_v39  ;;  %v1882_v3 = vadd.f32 %v1881_v20, %v1880_v5  ;;  %v283_v29 = vadd.f32 %v5475_v34, %v5474_v31  ;;  %v284_v23 = vadd.f32 %v5477_v11, %v5476_v42  ;;  %v285_v54 = vadd.f32 %v5479_v40, %v5478_v8  ;;  %v5485_v20 = vld [vmem:[#allocation15_spill] sm:$0xff] }
 0x1dc   :  { %1371 = vst [vmem:[%s4791_s3 + $0x10] sm:$0x1] %v1370_v59  ;;  %v1610_v14 = vadd.f32 %v1609_v21, %v1572_v44  ;;  %v2154_v50 = vrot.slane %v2153_v6, 1  ;;  %v286_v13 = vadd.f32 %v5481_v41, %v5480_v37  ;;  %v287_v38 = vadd.f32 %v5459_v30, %v5482_v0  ;;  %296 = vst [vmem:[#allocation8] sm:$0xff] %v280_v33 }
 0x1dd   :  { %v1883_v36 = vadd.f32 %v1882_v3, %v1845_v9  ;;  %297 = vst [vmem:[#allocation8 + $0x8] sm:$0xff] %v281_v4  ;;  %298 = vst [vmem:[#allocation8 + $0x10] sm:$0xff] %v282_v22  ;;  %v313_v18 = vmul.f32 %v5468_v35, %v5468_v35  ;;  %v314_v15 = vmul.f32 %v5470_v58, %v5470_v58 }
 0x1de   :  { %1611 = vst [vmem:[%s4791_s3 + $0x16] sm:$0x1] %v1610_v14  ;;  %v2155_v63 = vadd.f32 %v2154_v50, %v2153_v6  ;;  %299 = vst [vmem:[#allocation8 + $0x18] sm:$0xff] %v283_v29  ;;  %v315_v43 = vmul.f32 %v5472_v52, %v5472_v52  ;;  %v316_v45 = vmul.f32 %v5474_v31, %v5474_v31 }
 0x1df   :  { %1884 = vst [vmem:[%s4791_s3 + $0x1c] sm:$0x1] %v1883_v36  ;;  %300 = vst [vmem:[#allocation8 + $0x20] sm:$0xff] %v284_v23  ;;  %v317_v62 = vmul.f32 %v5476_v42, %v5476_v42  ;;  %v318_v24 = vmul.f32 %v5478_v8, %v5478_v8  ;;  %v319_v19 = vmul.f32 %v5480_v37, %v5480_v37 }
 0x1e0   :  { %v2156_v10 = vadd.f32 %v2155_v63, %v2118_v48  ;;  %301 = vst [vmem:[#allocation8 + $0x28] sm:$0xff] %v285_v54  ;;  %302 = vst [vmem:[#allocation8 + $0x30] sm:$0xff] %v286_v13  ;;  %v320_v12 = vmul.f32 %v5482_v0, %v5482_v0  ;;  %v321_v56 = vmul.f32 %v5469_v53, %v5469_v53 }
 0x1e1   :  { %303 = vst [vmem:[#allocation8 + $0x38] sm:$0xff] %v287_v38  ;;  %v322_v47 = vmul.f32 %v5471_v49, %v5471_v49  ;;  %v323_v51 = vmul.f32 %v5473_v27, %v5473_v27  ;;  %v324_v17 = vmul.f32 %v5475_v34, %v5475_v34  ;;  %v325_v25 = vmul.f32 %v5477_v11, %v5477_v11 }
 0x1e2   :  { %2157 = vst [vmem:[%s4791_s3 + $0x22] sm:$0x1] %v2156_v10  ;;  %v326_v46 = vmul.f32 %v5479_v40, %v5479_v40  ;;  %v327_v26 = vmul.f32 %v5481_v41, %v5481_v41  ;;  %v328_v2 = vmul.f32 %v5459_v30, %v5459_v30  ;;  %v329_v55 = vadd.f32 %v321_v56, %v313_v18  ;;  %s2427_s3 = smov [#allocation8]  }
 0x1e3   :  { %v330_v60 = vadd.f32 %v322_v47, %v314_v15  ;;  %v331_v16 = vadd.f32 %v323_v51, %v315_v43  ;;  %v332_v7 = vadd.f32 %v324_v17, %v316_v45  ;;  %v333_v32 = vadd.f32 %v325_v25, %v317_v62  ;;  %s2205_s11 = sshll.u32 %s2427_s3, 4  ;;  %s2206_s11 = int_to_ptr.vmem [resolvable:$true] %s2205_s11 }
 0x1e4   :  { %v334_v5 = vadd.f32 %v326_v46, %v318_v24  ;;  %v335_v61 = vadd.f32 %v327_v26, %v319_v19  ;;  %v336_v28 = vadd.f32 %v328_v2, %v320_v12  ;;  %345 = vst [vmem:[#allocation8 + $0x40] sm:$0xff] %v329_v55  ;;  %v370_v44 = vadd.f32 %v5484_v57, %v5483_v1  ;;  %s2362_s12 = scalar_lea.vmem %s2206_s11, 2048  ;;  %p2367_p11 = scmp.lt.s32.totalorder %s2206_s11, %s2206_s11 }
 0x1e5   :  { %346 = vst [vmem:[#allocation8 + $0x48] sm:$0xff] %v330_v60  ;;  %347 = vst [vmem:[#allocation8 + $0x50] sm:$0xff] %v331_v16  ;;  %v394_v30 = vmul.f32 %v5483_v1, %v5483_v1  ;;  %v395_v39 = vmul.f32 %v5484_v57, %v5484_v57  ;;  %p2363_p10 = scmp.ne.s32.totalorder %s2206_s11, %s2362_s12  ;;  %p2368_p12 = scmp.lt.s32.totalorder %s2362_s12, %s2362_s12 }
 0x1e6   :  { %348 = vst [vmem:[#allocation8 + $0x58] sm:$0xff] %v332_v7  ;;  %349 = vst [vmem:[#allocation8 + $0x60] sm:$0xff] %v333_v32  ;;  %v371_v35 = vadd.f32 %v370_v44, %v5485_v20 }
 0x1e7   :  { %350 = vst [vmem:[#allocation8 + $0x68] sm:$0xff] %v334_v5  ;;  %351 = vst [vmem:[#allocation8 + $0x70] sm:$0xff] %v335_v61  ;;  %p2369_p13 = por %p2368_p12, %p2367_p11 }
 0x1e8   :  { %352 = vst [vmem:[#allocation8 + $0x78] sm:$0xff] %v336_v28 }
 0x1e9   :  { %p2370_p0 = pnand %p2369_p13, %p2363_p10 }
 0x1eb   :  { %2373 = shalt.err (!%p2370_p0)
}
 0x1ec   :  { %s2374_s14 = scalar_lea.hbm %s4792_s4, 2048 }
 0x1ed   :  { %p2375_p1 = scmp.ne.s32.totalorder %s4792_s4, %s2374_s14  ;;  %p2378_p2 = scmp.lt.u32.totalorder %s2374_s14, %s4792_s4 }
 0x1ef   :  { %p2380_p3 = pnand %p2378_p2, %p2375_p1 }
 0x1f1   :  { %2383 = shalt.err (!%p2380_p3)
}
 0x1f2   :  { %2211 = dma.vmem_to_hbm [thread:$0]  %s2206_s11, 2048, %s4792_s4, [#allocation4], %s2416_s30, %s2416_s30, %s2417_s6   ;;  %v396_v53 = vmul.f32 %v5485_v20, %v5485_v20  ;;  %v5486_v33 = vld [vmem:[#allocation17_spill] sm:$0xff]  ;;  %v410_v4 = vadd.f32 %v395_v39, %v394_v30  ;;  %v5487_v9 = vld [vmem:[#allocation23_spill] sm:$0xff]  ;;  %v5489_v31 = vld [vmem:[#allocation30_spill] sm:$0xff] }
 0x1f3   :  { %v372_v58 = vadd.f32 %v371_v35, %v5486_v33  ;;  %v397_v49 = vmul.f32 %v5486_v33, %v5486_v33  ;;  %v398_v21 = vmul.f32 %v5487_v9, %v5487_v9  ;;  %v5488_v52 = vld [vmem:[#allocation21_spill] sm:$0xff]  ;;  %v400_v29 = vmul.f32 %v5489_v31, %v5489_v31  ;;  %v5490_v11 = vld [vmem:[#allocation27_spill] sm:$0xff]  ;;  %v5492_v41 = vld [vmem:[#allocation32_spill] sm:$0xff]  ;;  %s2428_s4 = smov [#allocation9]  }
 0x1f4   :  { %v411_v6 = vadd.f32 %v410_v4, %v396_v53  ;;  %v399_v22 = vmul.f32 %v5488_v52, %v5488_v52  ;;  %v401_v8 = vmul.f32 %v5490_v11, %v5490_v11  ;;  %v5491_v54 = vld [vmem:[#allocation35_spill] sm:$0xff]  ;;  %v403_v0 = vmul.f32 %v5492_v41, %v5492_v41  ;;  %v5493_v48 = vld [vmem:[#allocation38_spill] sm:$0xff]  ;;  %v5494_v15 = vld [vmem:[#allocation37_spill] sm:$0xff]  ;;  %s2218_s30 = sshll.u32 %s2428_s4, 4  ;;  %s2219_s30 = int_to_ptr.vmem [resolvable:$true] %s2218_s30 }
 0x1f5   :  { %v373_v59 = vadd.f32 %v372_v58, %v5487_v9  ;;  %v402_v50 = vmul.f32 %v5491_v54, %v5491_v54  ;;  %v404_v63 = vmul.f32 %v5493_v48, %v5493_v48  ;;  %v405_v43 = vmul.f32 %v5494_v15, %v5494_v15  ;;  %v5495_v62 = vld [vmem:[#allocation44_spill] sm:$0xff]  ;;  %v5496_v56 = vld [vmem:[#allocation41_spill] sm:$0xff]  ;;  %v5497_v25 = vld [vmem:[#allocation46_spill] sm:$0xff]  ;;  %s2384_s6 = scalar_lea.vmem %s2219_s30, 32  ;;  %p2389_p5 = scmp.lt.s32.totalorder %s2219_s30, %s2219_s30 }
 0x1f6   :  { %v412_v3 = vadd.f32 %v411_v6, %v397_v49  ;;  %v406_v19 = vmul.f32 %v5495_v62, %v5495_v62  ;;  %v407_v51 = vmul.f32 %v5496_v56, %v5496_v56  ;;  %v408_v26 = vmul.f32 %v5497_v25, %v5497_v25  ;;  %v5498_v55 = vld [vmem:[#allocation45_spill] sm:$0xff]  ;;  %v369_v20 = vld [vmem:[#allocation9] sm:$0x1]  ;;  %v393_v4 = vld [vmem:[#allocation9 + $0x1] sm:$0x1]  ;;  %p2385_p4 = scmp.ne.s32.totalorder %s2219_s30, %s2384_s6  ;;  %p2390_p6 = scmp.lt.s32.totalorder %s2384_s6, %s2384_s6 }
 0x1f7   :  { %v374_v27 = vadd.f32 %v373_v59, %v5488_v52  ;;  %v409_v16 = vmul.f32 %v5498_v55, %v5498_v55 }
 0x1f8   :  { %v413_v42 = vadd.f32 %v412_v3, %v398_v21  ;;  %p2391_p7 = por %p2390_p6, %p2389_p5 }
 0x1f9   :  { %v375_v34 = vadd.f32 %v374_v27, %v5489_v31 }
 0x1fa   :  { %v414_v40 = vadd.f32 %v413_v42, %v399_v22  ;;  %p2392_p8 = pnand %p2391_p7, %p2385_p4 }
 0x1fb   :  { %v376_v23 = vadd.f32 %v375_v34, %v5490_v11 }
 0x1fc   :  { %v415_v37 = vadd.f32 %v414_v40, %v400_v29 }
 0x1fd   :  { %v377_v14 = vadd.f32 %v376_v23, %v5491_v54 }
 0x1fe   :  { %v416_v38 = vadd.f32 %v415_v37, %v401_v8 }
 0x1ff   :  { %v378_v13 = vadd.f32 %v377_v14, %v5492_v41 }
 0x200   :  { %v417_v18 = vadd.f32 %v416_v38, %v402_v50 }
 0x201   :  { %v379_v36 = vadd.f32 %v378_v13, %v5493_v48 }
 0x202   :  { %v418_v45 = vadd.f32 %v417_v18, %v403_v0 }
 0x203   :  { %v380_v10 = vadd.f32 %v379_v36, %v5494_v15 }
 0x204   :  { %v419_v12 = vadd.f32 %v418_v45, %v404_v63 }
 0x205   :  { %v381_v24 = vadd.f32 %v380_v10, %v5495_v62 }
 0x206   :  { %v420_v17 = vadd.f32 %v419_v12, %v405_v43 }
 0x207   :  { %v382_v47 = vadd.f32 %v381_v24, %v5496_v56 }
 0x208   :  { %v421_v2 = vadd.f32 %v420_v17, %v406_v19 }
 0x209   :  { %v383_v46 = vadd.f32 %v382_v47, %v5497_v25 }
 0x20a   :  { %v422_v7 = vadd.f32 %v421_v2, %v407_v51 }
 0x20b   :  { %v384_v60 = vadd.f32 %v383_v46, %v5498_v55 }
 0x20c   :  { %v423_v5 = vadd.f32 %v422_v7, %v408_v26 }
 0x20d   :  { %v385_v32 = vrot.slane %v384_v60, 4 }
 0x20e   :  { %v424_v28 = vadd.f32 %v423_v5, %v409_v16 }
 0x20f   :  { %v386_v61 = vadd.f32 %v385_v32, %v384_v60 }
 0x210   :  { %v425_v57 = vrot.slane %v424_v28, 4 }
 0x211   :  { %v387_v1 = vrot.slane %v386_v61, 2 }
 0x212   :  { %v426_v30 = vadd.f32 %v425_v57, %v424_v28 }
 0x213   :  { %v388_v44 = vadd.f32 %v387_v1, %v386_v61 }
 0x214   :  { %v427_v35 = vrot.slane %v426_v30, 2 }
 0x215   :  { %v389_v39 = vrot.slane %v388_v44, 1 }
 0x216   :  { %v428_v33 = vadd.f32 %v427_v35, %v426_v30 }
 0x217   :  { %v390_v53 = vadd.f32 %v389_v39, %v388_v44 }
 0x218   :  { %v429_v49 = vrot.slane %v428_v33, 1 }
 0x219   :  { %v391_v58 = vadd.f32 %v390_v53, %v369_v20 }
 0x21a   :  { %v430_v9 = vadd.f32 %v429_v49, %v428_v33 }
 0x21b   :  { %392 = vst [vmem:[#allocation9] sm:$0x1] %v391_v58 }
 0x21c   :  { %v431_v59 = vadd.f32 %v430_v9, %v393_v4 }
 0x21e   :  { %432 = vst [vmem:[#allocation9 + $0x1] sm:$0x1] %v431_v59 }
 0x21f   :  { %2395 = shalt.err (!%p2392_p8)
}
 0x220   :  { %s2396_s23 = scalar_lea.hbm %s4793_s5, 32 }
 0x221   :  { %p2397_p9 = scmp.ne.s32.totalorder %s4793_s5, %s2396_s23  ;;  %p2400_p10 = scmp.lt.u32.totalorder %s2396_s23, %s4793_s5 }
 0x223   :  { %p2402_p11 = pnand %p2400_p10, %p2397_p9 }
 0x225   :  { %2405 = shalt.err (!%p2402_p11)
}
 0x226   :  { %2221 = dma.vmem_to_hbm [thread:$0]  %s2219_s30, 32, %s4793_s5, [#allocation10]  }
 0x227   :  { %2410 = dma.done.wait [#allocation4], 2048  }
 0x228   :  { %2411 = vsyncadd [#allocation4], 4294965248 }
 0x229   :  { %2412 = dma.done.wait [#allocation10], 32  }
 0x22a   :  { %2413 = vsyncadd [#allocation10], 4294967264 }
 0x22b   :  { %2230 = vsyncpa [#allocation3], 1 }
 0x22c   :  { %2231 = vsyncpa [#allocation6], 1 }
 0x22d   :  { %2232 = vsyncpa [#allocation4], 1 }
 0x22e   :  { %2233 = vsyncpa [#allocation10], 1 }

</bundles_post_ra>
